<compile_context>
chip_gen: v7x
topology: tpu7x:2x2x1
jax: 0.10.0
libtpu: 0.0.40
codegen_flags: <defaults>
</compile_context>

<pallas_src>
import functools

import numpy as np

import jax
import jax.numpy as jnp
from jax.experimental import pallas as pl
from jax.experimental.pallas import tpu as pltpu

KSIZE = 5        # conv kernel size
PAD = 2          # 'same' padding for 5x5
FC_LANES = 128   # pad the 10 logits to a lane-dense 128-wide kernel output
_VMEM_LIMIT = 32 * 1024 * 1024  # explicit, safe on v5e/v6e/v7x (usage is ~4 MiB)


# ---------------------------------------------------------------------------
# Fused Pallas kernel: conv1+BN+ReLU+pool -> conv2+BN+ReLU+pool -> FC (one image)
# ---------------------------------------------------------------------------
def _fused_forward_kernel(x_ref, m1_ref, b1_ref, m2_ref, b2_ref,
                          wfc_ref, bfc_ref, o_ref, y1_ref, y2_ref, *, K):
    """Whole CNNFashion_Mnist forward for one image.

    x_ref:   (1, Hp1, Wp1*Cin1)        bf16  zero-padded 28x28 image (32, 32)
    m1_ref:  (2K, Wp1*Cin1, Wo1*Cout1) bf16  layer1 banded conv mats, BN folded
    b1_ref:  (Hp2, Wo1*Cout1)          f32   layer1 bias, row-padded with zeros
    m2_ref:  (2K, Wo1*Cout1, Wo2*Cout2)bf16  layer2 banded conv mats (h-pad folded)
    b2_ref:  (1, Wo2*Cout2)            f32   layer2 bias
    wfc_ref: (Ho2, Wo2*Cout2, 128)     bf16  FC weight regrouped by (h, w*c)
    bfc_ref: (1, 128)                  f32   FC bias (padded)
    o_ref:   (1, 1, 128)               f32   logits (lane-padded)
    y1_ref:  (Hp2, Wo1*Cout1)          bf16  scratch: row-padded layer2 input
    y2_ref:  (Ho2, Wo2*Cout2)          bf16  scratch: layer2 pooled output
    """
    # ---------------- layer 1: conv(1->16,5,p=2) + BN + ReLU + pool2 ----------
    Hp1 = x_ref.shape[1]                    # 32
    R1 = Hp1 - (K - 1)                      # 28 conv output rows
    W1 = m1_ref.shape[2]                    # 224 = 14*16
    ze = jnp.zeros((R1, W1), jnp.float32)
    zo = jnp.zeros((R1, W1), jnp.float32)
    for kh in range(K):                     # K row shifts x 2 column parities
        xs = x_ref[0, kh:kh + R1, :]
        ze = ze + jnp.dot(xs, m1_ref[kh], preferred_element_type=jnp.float32)
        zo = zo + jnp.dot(xs, m1_ref[K + kh], preferred_element_type=jnp.float32)
    zh = jnp.maximum(ze, zo)                # horizontal half of the 2x2 max-pool

    # Vertical half of the pool, written directly into a row-padded (Hp2 rows)
    # layer-2 input: padding rows select nothing -> 0, and their bias rows are 0,
    # so they stay exactly 0 after the ReLU (conv2's vertical 'same' padding).
    Hp2 = y1_ref.shape[0]                   # 18 = 14 + 2*PAD
    row = jax.lax.broadcasted_iota(jnp.int32, (Hp2, R1), 1)
    oi = jax.lax.broadcasted_iota(jnp.int32, (Hp2, R1), 0)
    tgt = 2 * (oi - PAD)                    # out-of-range targets never match
    pe = (row == tgt).astype(jnp.float32)
    po = (row == tgt + 1).astype(jnp.float32)
    pooled1 = jnp.maximum(jnp.dot(pe, zh, preferred_element_type=jnp.float32),
                          jnp.dot(po, zh, preferred_element_type=jnp.float32))
    y1_ref[...] = jnp.maximum(pooled1 + b1_ref[...], 0.0).astype(y1_ref.dtype)

    # ---------------- layer 2: conv(16->32,5,p=2) + BN + ReLU + pool2 ---------
    R2 = Hp2 - (K - 1)                      # 14 conv output rows
    W2 = m2_ref.shape[2]                    # 224 = 7*32
    ze2 = jnp.zeros((R2, W2), jnp.float32)
    zo2 = jnp.zeros((R2, W2), jnp.float32)
    for kh in range(K):
        xs = y1_ref[kh:kh + R2, :]
        ze2 = ze2 + jnp.dot(xs, m2_ref[kh], preferred_element_type=jnp.float32)
        zo2 = zo2 + jnp.dot(xs, m2_ref[K + kh], preferred_element_type=jnp.float32)
    zh2 = jnp.maximum(ze2, zo2)

    Ho2 = y2_ref.shape[0]                   # 7
    row2 = jax.lax.broadcasted_iota(jnp.int32, (Ho2, R2), 1)
    oi2 = jax.lax.broadcasted_iota(jnp.int32, (Ho2, R2), 0)
    pe2 = (row2 == 2 * oi2).astype(jnp.float32)
    po2 = (row2 == 2 * oi2 + 1).astype(jnp.float32)
    pooled2 = jnp.maximum(jnp.dot(pe2, zh2, preferred_element_type=jnp.float32),
                          jnp.dot(po2, zh2, preferred_element_type=jnp.float32))
    y2_ref[...] = jnp.maximum(pooled2 + b2_ref[...], 0.0).astype(y2_ref.dtype)

    # ---------------- fc: contract (h, w*c) against (Ho2, 224, 128) -----------
    acc = jnp.zeros((1, o_ref.shape[2]), jnp.float32)
    for h in range(Ho2):
        acc = acc + jnp.dot(y2_ref[h:h + 1, :], wfc_ref[h],
                            preferred_element_type=jnp.float32)
    o_ref[0] = (acc + bfc_ref[...]).astype(o_ref.dtype)


# ---------------------------------------------------------------------------
# Host-side parameter preprocessing
# ---------------------------------------------------------------------------
def _build_conv_mats(conv_w, conv_b, gamma, beta, mean, var, W, in_padded, eps=1e-5):
    """Banded (block-Toeplitz) conv matrices with BN scale folded in.

    If in_padded:  input columns are the zero-padded width Wp = W + 2*PAD.
    Otherwise:     input columns are the raw width W and the horizontal 'same'
                   padding is folded into the band validity (out-of-range taps
                   simply contribute nothing).
    Returns (mats (2K, Win*Cin, Wo*Cout) bf16, bias_row (1, Wo*Cout) f32).
    """
    Cout, Cin, K, _ = conv_w.shape
    Win = W + 2 * PAD if in_padded else W
    off = 0 if in_padded else PAD
    Wo = W // 2
    scale = gamma / jnp.sqrt(var + eps)                          # (Cout,)
    bias = (conv_b - mean) * scale + beta                        # (Cout,)
    wt = jnp.transpose(conv_w, (2, 3, 1, 0)) * scale             # (K,K,Cin,Cout)
    wcol = jnp.arange(Win)[:, None]
    wout = jnp.arange(Wo)[None, :]
    mats = []
    for q in (0, 1):                                             # output-column parity
        kw = wcol + off - 2 * wout - q                           # (Win, Wo)
        valid = ((kw >= 0) & (kw < K)).astype(wt.dtype)
        g = wt[:, jnp.clip(kw, 0, K - 1)]                        # (K, Win, Wo, Cin, Cout)
        g = g * valid[None, :, :, None, None]
        g = jnp.transpose(g, (0, 1, 3, 2, 4))                    # (K, Win, Cin, Wo, Cout)
        mats.append(g.reshape(K, Win * Cin, Wo * Cout))
    mats = jnp.concatenate(mats, axis=0).astype(jnp.bfloat16)    # (2K, Win*Cin, Wo*Cout)
    bias_row = jnp.tile(bias, Wo).reshape(1, Wo * Cout).astype(jnp.float32)
    return mats, bias_row


# ---------------------------------------------------------------------------
# Forward pass (single jit, single fused pallas_call)
# ---------------------------------------------------------------------------
@jax.jit
def cnn_fashion_mnist_forward(x_nchw, params):
    x = jnp.transpose(x_nchw, (0, 2, 3, 1)).astype(jnp.float32)   # NCHW -> NHWC
    N, H, W, Cin = x.shape                                        # (N, 28, 28, 1)
    Cout1 = params["conv1_w"].shape[0]                            # 16
    Cout2 = params["conv2_w"].shape[0]                            # 32
    Ho1, Wo1 = H // 2, W // 2                                     # 14, 14
    Ho2, Wo2 = Ho1 // 2, Wo1 // 2                                 # 7, 7
    Hp1, Wp1 = H + 2 * PAD, W + 2 * PAD                           # 32, 32
    Hp2 = Ho1 + 2 * PAD                                           # 18

    # Layer-1 banded matrices (padded input width) + row-padded bias for layer-2.
    m1, b1row = _build_conv_mats(params["conv1_w"], params["conv1_b"],
                                 params["bn1_gamma"], params["bn1_beta"],
                                 params["bn1_mean"], params["bn1_var"],
                                 W=W, in_padded=True)
    b1pad = jnp.zeros((Hp2, Wo1 * Cout1), jnp.float32)
    b1pad = b1pad.at[PAD:PAD + Ho1].set(jnp.broadcast_to(b1row, (Ho1, Wo1 * Cout1)))

    # Layer-2 banded matrices (unpadded 224-lane input; horizontal padding folded).
    m2, b2row = _build_conv_mats(params["conv2_w"], params["conv2_b"],
                                 params["bn2_gamma"], params["bn2_beta"],
                                 params["bn2_mean"], params["bn2_var"],
                                 W=Wo1, in_padded=False)

    # FC weight: PyTorch Linear acts on an NCHW flatten (index c*49 + h*7 + w);
    # regroup it as (h, w*c, out) to match the kernel's (h, w*c) activation layout,
    # and pad the 10 outputs to 128 lanes.
    nout = params["fc_b"].shape[0]
    wfc = params["fc_w"].reshape(nout, Cout2, Ho2, Wo2)
    wfc = jnp.transpose(wfc, (2, 3, 1, 0)).reshape(Ho2, Wo2 * Cout2, nout)
    wfc = jnp.pad(wfc, ((0, 0), (0, 0), (0, FC_LANES - nout))).astype(jnp.bfloat16)
    bfc = jnp.pad(params["fc_b"], (0, FC_LANES - nout)).reshape(1, FC_LANES)
    bfc = bfc.astype(jnp.float32)

    # Padded input as (rows, Wp*Cin) slabs.
    xp = jnp.pad(x, ((0, 0), (PAD, PAD), (PAD, PAD), (0, 0)))
    xp = xp.reshape(N, Hp1, Wp1 * Cin).astype(jnp.bfloat16)

    kern = functools.partial(_fused_forward_kernel, K=KSIZE)
    out = pl.pallas_call(
        kern,
        out_shape=jax.ShapeDtypeStruct((N, 1, FC_LANES), jnp.float32),
        grid_spec=pltpu.PrefetchScalarGridSpec(
            num_scalar_prefetch=0,
            grid=(N,),
            in_specs=[
                pl.BlockSpec((1, Hp1, Wp1 * Cin), lambda i: (i, 0, 0)),
                pl.BlockSpec((2 * KSIZE, Wp1 * Cin, Wo1 * Cout1), lambda i: (0, 0, 0)),
                pl.BlockSpec((Hp2, Wo1 * Cout1), lambda i: (0, 0)),
                pl.BlockSpec((2 * KSIZE, Wo1 * Cout1, Wo2 * Cout2), lambda i: (0, 0, 0)),
                pl.BlockSpec((1, Wo2 * Cout2), lambda i: (0, 0)),
                pl.BlockSpec((Ho2, Wo2 * Cout2, FC_LANES), lambda i: (0, 0, 0)),
                pl.BlockSpec((1, FC_LANES), lambda i: (0, 0)),
            ],
            out_specs=pl.BlockSpec((1, 1, FC_LANES), lambda i: (i, 0, 0)),
            scratch_shapes=[
                pltpu.VMEM((Hp2, Wo1 * Cout1), jnp.bfloat16),   # layer2 input (row-padded)
                pltpu.VMEM((Ho2, Wo2 * Cout2), jnp.bfloat16),   # layer2 pooled output
            ],
        ),
        compiler_params=pltpu.CompilerParams(
            dimension_semantics=("parallel",),
            vmem_limit_bytes=_VMEM_LIMIT,
        ),
    )(xp, m1, b1pad, m2, b2row, wfc, bfc)

    return out.reshape(N, FC_LANES)[:, :nout]


# ---------------------------------------------------------------------------
# Pure-JAX reference (same bf16 quantization points as the kernel)
# ---------------------------------------------------------------------------
def _reference_forward(x_nchw, params, eps=1e-5):
    f32, bf16 = jnp.float32, jnp.bfloat16

    def q(a):
        return a.astype(bf16).astype(f32)

    def block(x, w, cb, g, be, mu, var):
        scale = g / jnp.sqrt(var + eps)
        wf = q(jnp.transpose(w, (2, 3, 1, 0)) * scale)             # HWIO, BN scale folded
        bias = (cb - mu) * scale + be
        y = jax.lax.conv_general_dilated(
            x, wf, (1, 1), "SAME",
            dimension_numbers=("NHWC", "HWIO", "NHWC"),
            precision=jax.lax.Precision.HIGHEST)
        y = jnp.maximum(y + bias, 0.0)
        y = jax.lax.reduce_window(y, -jnp.inf, jax.lax.max,
                                  (1, 2, 2, 1), (1, 2, 2, 1), "VALID")
        return q(y)

    x = q(jnp.transpose(x_nchw, (0, 2, 3, 1)))
    y = block(x, params["conv1_w"], params["conv1_b"], params["bn1_gamma"],
              params["bn1_beta"], params["bn1_mean"], params["bn1_var"])
    y = block(y, params["conv2_w"], params["conv2_b"], params["bn2_gamma"],
              params["bn2_beta"], params["bn2_mean"], params["bn2_var"])
    flat = jnp.transpose(y, (0, 3, 1, 2)).reshape(y.shape[0], -1)   # PyTorch NCHW flatten
    return jnp.dot(flat, q(params["fc_w"]).T,
                   precision=jax.lax.Precision.HIGHEST) + params["fc_b"]


# ---------------------------------------------------------------------------
# Parameters (PyTorch layouts)
# ---------------------------------------------------------------------------
def init_params(key):
    ks = jax.random.split(key, 14)
    p = {}
    # layer1: Conv2d(1, 16, 5, padding=2) + BatchNorm2d(16)
    p["conv1_w"] = 0.1 * jax.random.normal(ks[0], (16, 1, 5, 5), jnp.float32)
    p["conv1_b"] = 0.1 * jax.random.normal(ks[1], (16,), jnp.float32)
    p["bn1_gamma"] = 1.0 + 0.1 * jax.random.normal(ks[2], (16,), jnp.float32)
    p["bn1_beta"] = 0.1 * jax.random.normal(ks[3], (16,), jnp.float32)
    p["bn1_mean"] = 0.1 * jax.random.normal(ks[4], (16,), jnp.float32)
    p["bn1_var"] = 1.0 + 0.1 * jax.random.uniform(ks[5], (16,), jnp.float32)
    # layer2: Conv2d(16, 32, 5, padding=2) + BatchNorm2d(32)
    p["conv2_w"] = 0.05 * jax.random.normal(ks[6], (32, 16, 5, 5), jnp.float32)
    p["conv2_b"] = 0.1 * jax.random.normal(ks[7], (32,), jnp.float32)
    p["bn2_gamma"] = 1.0 + 0.1 * jax.random.normal(ks[8], (32,), jnp.float32)
    p["bn2_beta"] = 0.1 * jax.random.normal(ks[9], (32,), jnp.float32)
    p["bn2_mean"] = 0.1 * jax.random.normal(ks[10], (32,), jnp.float32)
    p["bn2_var"] = 1.0 + 0.1 * jax.random.uniform(ks[11], (32,), jnp.float32)
    # fc: Linear(7*7*32, 10), PyTorch (out, in) layout
    p["fc_w"] = 0.05 * jax.random.normal(ks[12], (10, 7 * 7 * 32), jnp.float32)
    p["fc_b"] = 0.1 * jax.random.normal(ks[13], (10,), jnp.float32)
    return p


if __name__ == "__main__":
    key = jax.random.PRNGKey(0)
    pkey, xkey = jax.random.split(key)
    params = init_params(pkey)
    # Fashion-MNIST shaped input implied by fc = Linear(7*7*32, 10): (N, 1, 28, 28)
    x = jax.random.uniform(xkey, (2, 1, 28, 28), jnp.float32)

    logits = cnn_fashion_mnist_forward(x, params)
    jax.block_until_ready(logits)
    assert logits.shape == (2, 10) and logits.dtype == jnp.float32

    ref = _reference_forward(x, params)
    np.testing.assert_allclose(np.asarray(logits), np.asarray(ref), rtol=5e-2, atol=5e-2)
    print("KERNEL_OK")
</pallas_src>

<mosaic_0001>
module attributes {stable_mosaic.version = 11 : i64} {
  func.func @_fused_forward_kernel(%arg0: i32, %arg1: memref<1x32x32xbf16, #tpu.memory_space<vmem>>, %arg2: memref<10x32x224xbf16, #tpu.memory_space<vmem>>, %arg3: memref<18x224xf32, #tpu.memory_space<vmem>>, %arg4: memref<10x224x224xbf16, #tpu.memory_space<vmem>>, %arg5: memref<1x224xf32, #tpu.memory_space<vmem>>, %arg6: memref<7x224x128xbf16, #tpu.memory_space<vmem>>, %arg7: memref<1x128xf32, #tpu.memory_space<vmem>>, %arg8: memref<1x1x128xf32, #tpu.memory_space<vmem>>, %arg9: memref<18x224xbf16, #tpu.memory_space<vmem>>, %arg10: memref<7x224xbf16, #tpu.memory_space<vmem>>) attributes {dimension_semantics = [#tpu.dimension_semantics<parallel>], iteration_bounds = array<i64: 2>, scalar_prefetch = 0 : i64, scratch_operands = 2 : i64, tpu.core_type = #tpu.core_type<tc>, window_params = [{transform_indices = @transform_0, window_bounds = array<i64: 1, 32, 32>}, {pipeline_mode = #tpu.pipeline_mode<synchronous>, transform_indices = @transform_1, window_bounds = array<i64: 10, 32, 224>}, {pipeline_mode = #tpu.pipeline_mode<synchronous>, transform_indices = @transform_2, window_bounds = array<i64: 18, 224>}, {pipeline_mode = #tpu.pipeline_mode<synchronous>, transform_indices = @transform_3, window_bounds = array<i64: 10, 224, 224>}, {pipeline_mode = #tpu.pipeline_mode<synchronous>, transform_indices = @transform_4, window_bounds = array<i64: 1, 224>}, {pipeline_mode = #tpu.pipeline_mode<synchronous>, transform_indices = @transform_5, window_bounds = array<i64: 7, 224, 128>}, {pipeline_mode = #tpu.pipeline_mode<synchronous>, transform_indices = @transform_6, window_bounds = array<i64: 1, 128>}, {transform_indices = @transform_7, window_bounds = array<i64: 1, 1, 128>}]} {
    %cst = arith.constant 0.000000e+00 : f32
    %0 = vector.broadcast %cst : f32 to vector<28x224xf32>
    %cst_0 = arith.constant 0.000000e+00 : f32
    %1 = vector.broadcast %cst_0 : f32 to vector<28x224xf32>
    %c0 = arith.constant 0 : index
    %c0_1 = arith.constant 0 : index
    %c0_2 = arith.constant 0 : index
    %2 = vector.load %arg1[%c0, %c0_1, %c0_2] : memref<1x32x32xbf16, #tpu.memory_space<vmem>>, vector<1x28x32xbf16>
    %3 = vector.shape_cast %2 : vector<1x28x32xbf16> to vector<28x32xbf16>
    %c0_3 = arith.constant 0 : index
    %c0_4 = arith.constant 0 : index
    %c0_5 = arith.constant 0 : index
    %4 = vector.load %arg2[%c0_3, %c0_4, %c0_5] : memref<10x32x224xbf16, #tpu.memory_space<vmem>>, vector<1x32x224xbf16>
    %5 = vector.shape_cast %4 : vector<1x32x224xbf16> to vector<32x224xbf16>
    %cst_6 = arith.constant dense<0.000000e+00> : vector<28x224xf32>
    %6 = tpu.matmul %3, %5, %cst_6 {dimension_numbers = #tpu.dot_dimension_numbers<[1], [0], [0], [1], [0, 0, 1, 1], [], []>} : vector<28x32xbf16>, vector<32x224xbf16>, vector<28x224xf32> -> vector<28x224xf32>
    %7 = arith.addf %0, %6 : vector<28x224xf32>
    %c5 = arith.constant 5 : index
    %c0_7 = arith.constant 0 : index
    %c0_8 = arith.constant 0 : index
    %8 = vector.load %arg2[%c5, %c0_7, %c0_8] : memref<10x32x224xbf16, #tpu.memory_space<vmem>>, vector<1x32x224xbf16>
    %9 = vector.shape_cast %8 : vector<1x32x224xbf16> to vector<32x224xbf16>
    %cst_9 = arith.constant dense<0.000000e+00> : vector<28x224xf32>
    %10 = tpu.matmul %3, %9, %cst_9 {dimension_numbers = #tpu.dot_dimension_numbers<[1], [0], [0], [1], [0, 0, 1, 1], [], []>} : vector<28x32xbf16>, vector<32x224xbf16>, vector<28x224xf32> -> vector<28x224xf32>
    %11 = arith.addf %1, %10 : vector<28x224xf32>
    %c0_10 = arith.constant 0 : index
    %c1 = arith.constant 1 : index
    %c0_11 = arith.constant 0 : index
    %12 = vector.load %arg1[%c0_10, %c1, %c0_11] : memref<1x32x32xbf16, #tpu.memory_space<vmem>>, vector<1x28x32xbf16>
    %13 = vector.shape_cast %12 : vector<1x28x32xbf16> to vector<28x32xbf16>
    %c1_12 = arith.constant 1 : index
    %c0_13 = arith.constant 0 : index
    %c0_14 = arith.constant 0 : index
    %14 = vector.load %arg2[%c1_12, %c0_13, %c0_14] : memref<10x32x224xbf16, #tpu.memory_space<vmem>>, vector<1x32x224xbf16>
    %15 = vector.shape_cast %14 : vector<1x32x224xbf16> to vector<32x224xbf16>
    %cst_15 = arith.constant dense<0.000000e+00> : vector<28x224xf32>
    %16 = tpu.matmul %13, %15, %cst_15 {dimension_numbers = #tpu.dot_dimension_numbers<[1], [0], [0], [1], [0, 0, 1, 1], [], []>} : vector<28x32xbf16>, vector<32x224xbf16>, vector<28x224xf32> -> vector<28x224xf32>
    %17 = arith.addf %7, %16 : vector<28x224xf32>
    %c6 = arith.constant 6 : index
    %c0_16 = arith.constant 0 : index
    %c0_17 = arith.constant 0 : index
    %18 = vector.load %arg2[%c6, %c0_16, %c0_17] : memref<10x32x224xbf16, #tpu.memory_space<vmem>>, vector<1x32x224xbf16>
    %19 = vector.shape_cast %18 : vector<1x32x224xbf16> to vector<32x224xbf16>
    %cst_18 = arith.constant dense<0.000000e+00> : vector<28x224xf32>
    %20 = tpu.matmul %13, %19, %cst_18 {dimension_numbers = #tpu.dot_dimension_numbers<[1], [0], [0], [1], [0, 0, 1, 1], [], []>} : vector<28x32xbf16>, vector<32x224xbf16>, vector<28x224xf32> -> vector<28x224xf32>
    %21 = arith.addf %11, %20 : vector<28x224xf32>
    %c0_19 = arith.constant 0 : index
    %c2 = arith.constant 2 : index
    %c0_20 = arith.constant 0 : index
    %22 = vector.load %arg1[%c0_19, %c2, %c0_20] : memref<1x32x32xbf16, #tpu.memory_space<vmem>>, vector<1x28x32xbf16>
    %23 = vector.shape_cast %22 : vector<1x28x32xbf16> to vector<28x32xbf16>
    %c2_21 = arith.constant 2 : index
    %c0_22 = arith.constant 0 : index
    %c0_23 = arith.constant 0 : index
    %24 = vector.load %arg2[%c2_21, %c0_22, %c0_23] : memref<10x32x224xbf16, #tpu.memory_space<vmem>>, vector<1x32x224xbf16>
    %25 = vector.shape_cast %24 : vector<1x32x224xbf16> to vector<32x224xbf16>
    %cst_24 = arith.constant dense<0.000000e+00> : vector<28x224xf32>
    %26 = tpu.matmul %23, %25, %cst_24 {dimension_numbers = #tpu.dot_dimension_numbers<[1], [0], [0], [1], [0, 0, 1, 1], [], []>} : vector<28x32xbf16>, vector<32x224xbf16>, vector<28x224xf32> -> vector<28x224xf32>
    %27 = arith.addf %17, %26 : vector<28x224xf32>
    %c7 = arith.constant 7 : index
    %c0_25 = arith.constant 0 : index
    %c0_26 = arith.constant 0 : index
    %28 = vector.load %arg2[%c7, %c0_25, %c0_26] : memref<10x32x224xbf16, #tpu.memory_space<vmem>>, vector<1x32x224xbf16>
    %29 = vector.shape_cast %28 : vector<1x32x224xbf16> to vector<32x224xbf16>
    %cst_27 = arith.constant dense<0.000000e+00> : vector<28x224xf32>
    %30 = tpu.matmul %23, %29, %cst_27 {dimension_numbers = #tpu.dot_dimension_numbers<[1], [0], [0], [1], [0, 0, 1, 1], [], []>} : vector<28x32xbf16>, vector<32x224xbf16>, vector<28x224xf32> -> vector<28x224xf32>
    %31 = arith.addf %21, %30 : vector<28x224xf32>
    %c0_28 = arith.constant 0 : index
    %c3 = arith.constant 3 : index
    %c0_29 = arith.constant 0 : index
    %32 = vector.load %arg1[%c0_28, %c3, %c0_29] : memref<1x32x32xbf16, #tpu.memory_space<vmem>>, vector<1x28x32xbf16>
    %33 = vector.shape_cast %32 : vector<1x28x32xbf16> to vector<28x32xbf16>
    %c3_30 = arith.constant 3 : index
    %c0_31 = arith.constant 0 : index
    %c0_32 = arith.constant 0 : index
    %34 = vector.load %arg2[%c3_30, %c0_31, %c0_32] : memref<10x32x224xbf16, #tpu.memory_space<vmem>>, vector<1x32x224xbf16>
    %35 = vector.shape_cast %34 : vector<1x32x224xbf16> to vector<32x224xbf16>
    %cst_33 = arith.constant dense<0.000000e+00> : vector<28x224xf32>
    %36 = tpu.matmul %33, %35, %cst_33 {dimension_numbers = #tpu.dot_dimension_numbers<[1], [0], [0], [1], [0, 0, 1, 1], [], []>} : vector<28x32xbf16>, vector<32x224xbf16>, vector<28x224xf32> -> vector<28x224xf32>
    %37 = arith.addf %27, %36 : vector<28x224xf32>
    %c8 = arith.constant 8 : index
    %c0_34 = arith.constant 0 : index
    %c0_35 = arith.constant 0 : index
    %38 = vector.load %arg2[%c8, %c0_34, %c0_35] : memref<10x32x224xbf16, #tpu.memory_space<vmem>>, vector<1x32x224xbf16>
    %39 = vector.shape_cast %38 : vector<1x32x224xbf16> to vector<32x224xbf16>
    %cst_36 = arith.constant dense<0.000000e+00> : vector<28x224xf32>
    %40 = tpu.matmul %33, %39, %cst_36 {dimension_numbers = #tpu.dot_dimension_numbers<[1], [0], [0], [1], [0, 0, 1, 1], [], []>} : vector<28x32xbf16>, vector<32x224xbf16>, vector<28x224xf32> -> vector<28x224xf32>
    %41 = arith.addf %31, %40 : vector<28x224xf32>
    %c0_37 = arith.constant 0 : index
    %c4 = arith.constant 4 : index
    %c0_38 = arith.constant 0 : index
    %42 = vector.load %arg1[%c0_37, %c4, %c0_38] : memref<1x32x32xbf16, #tpu.memory_space<vmem>>, vector<1x28x32xbf16>
    %43 = vector.shape_cast %42 : vector<1x28x32xbf16> to vector<28x32xbf16>
    %c4_39 = arith.constant 4 : index
    %c0_40 = arith.constant 0 : index
    %c0_41 = arith.constant 0 : index
    %44 = vector.load %arg2[%c4_39, %c0_40, %c0_41] : memref<10x32x224xbf16, #tpu.memory_space<vmem>>, vector<1x32x224xbf16>
    %45 = vector.shape_cast %44 : vector<1x32x224xbf16> to vector<32x224xbf16>
    %cst_42 = arith.constant dense<0.000000e+00> : vector<28x224xf32>
    %46 = tpu.matmul %43, %45, %cst_42 {dimension_numbers = #tpu.dot_dimension_numbers<[1], [0], [0], [1], [0, 0, 1, 1], [], []>} : vector<28x32xbf16>, vector<32x224xbf16>, vector<28x224xf32> -> vector<28x224xf32>
    %47 = arith.addf %37, %46 : vector<28x224xf32>
    %c9 = arith.constant 9 : index
    %c0_43 = arith.constant 0 : index
    %c0_44 = arith.constant 0 : index
    %48 = vector.load %arg2[%c9, %c0_43, %c0_44] : memref<10x32x224xbf16, #tpu.memory_space<vmem>>, vector<1x32x224xbf16>
    %49 = vector.shape_cast %48 : vector<1x32x224xbf16> to vector<32x224xbf16>
    %cst_45 = arith.constant dense<0.000000e+00> : vector<28x224xf32>
    %50 = tpu.matmul %43, %49, %cst_45 {dimension_numbers = #tpu.dot_dimension_numbers<[1], [0], [0], [1], [0, 0, 1, 1], [], []>} : vector<28x32xbf16>, vector<32x224xbf16>, vector<28x224xf32> -> vector<28x224xf32>
    %51 = arith.addf %41, %50 : vector<28x224xf32>
    %52 = arith.maximumf %47, %51 : vector<28x224xf32>
    %53 = tpu.iota {dimensions = array<i32: 1>} : vector<18x28xi32>
    %54 = tpu.iota {dimensions = array<i32: 0>} : vector<18x28xi32>
    %c2_i32 = arith.constant 2 : i32
    %55 = vector.broadcast %c2_i32 : i32 to vector<18x28xi32>
    %56 = arith.subi %54, %55 : vector<18x28xi32>
    %c2_i32_46 = arith.constant 2 : i32
    %57 = vector.broadcast %c2_i32_46 : i32 to vector<18x28xi32>
    %58 = arith.muli %57, %56 : vector<18x28xi32>
    %59 = arith.cmpi eq, %53, %58 : vector<18x28xi32>
    %60 = arith.extui %59 : vector<18x28xi1> to vector<18x28xi32>
    %61 = arith.sitofp %60 : vector<18x28xi32> to vector<18x28xf32>
    %c1_i32 = arith.constant 1 : i32
    %62 = vector.broadcast %c1_i32 : i32 to vector<18x28xi32>
    %63 = arith.addi %58, %62 : vector<18x28xi32>
    %64 = arith.cmpi eq, %53, %63 : vector<18x28xi32>
    %65 = arith.extui %64 : vector<18x28xi1> to vector<18x28xi32>
    %66 = arith.sitofp %65 : vector<18x28xi32> to vector<18x28xf32>
    %cst_47 = arith.constant dense<0.000000e+00> : vector<18x224xf32>
    %67 = tpu.matmul %61, %52, %cst_47 {dimension_numbers = #tpu.dot_dimension_numbers<[1], [0], [0], [1], [0, 0, 1, 1], [], []>} : vector<18x28xf32>, vector<28x224xf32>, vector<18x224xf32> -> vector<18x224xf32>
    %cst_48 = arith.constant dense<0.000000e+00> : vector<18x224xf32>
    %68 = tpu.matmul %66, %52, %cst_48 {dimension_numbers = #tpu.dot_dimension_numbers<[1], [0], [0], [1], [0, 0, 1, 1], [], []>} : vector<18x28xf32>, vector<28x224xf32>, vector<18x224xf32> -> vector<18x224xf32>
    %69 = arith.maximumf %67, %68 : vector<18x224xf32>
    %c0_49 = arith.constant 0 : index
    %c0_50 = arith.constant 0 : index
    %70 = vector.load %arg3[%c0_49, %c0_50] : memref<18x224xf32, #tpu.memory_space<vmem>>, vector<18x224xf32>
    %71 = arith.addf %69, %70 : vector<18x224xf32>
    %cst_51 = arith.constant 0.000000e+00 : f32
    %72 = vector.broadcast %cst_51 : f32 to vector<18x224xf32>
    %73 = arith.maximumf %71, %72 : vector<18x224xf32>
    %74 = arith.truncf %73 : vector<18x224xf32> to vector<18x224xbf16>
    %c0_52 = arith.constant 0 : index
    %c0_53 = arith.constant 0 : index
    %75 = vector.load %arg9[%c0_52, %c0_53] : memref<18x224xbf16, #tpu.memory_space<vmem>>, vector<18x224xbf16>
    tpu.vector_store %arg9[%c0_52, %c0_53], %74 {strides = array<i32>} : memref<18x224xbf16, #tpu.memory_space<vmem>>, vector<18x224xbf16>,
    %cst_54 = arith.constant 0.000000e+00 : f32
    %76 = vector.broadcast %cst_54 : f32 to vector<14x224xf32>
    %cst_55 = arith.constant 0.000000e+00 : f32
    %77 = vector.broadcast %cst_55 : f32 to vector<14x224xf32>
    %c0_56 = arith.constant 0 : index
    %c0_57 = arith.constant 0 : index
    %78 = vector.load %arg9[%c0_56, %c0_57] : memref<18x224xbf16, #tpu.memory_space<vmem>>, vector<14x224xbf16>
    %c0_58 = arith.constant 0 : index
    %c0_59 = arith.constant 0 : index
    %c0_60 = arith.constant 0 : index
    %79 = vector.load %arg4[%c0_58, %c0_59, %c0_60] : memref<10x224x224xbf16, #tpu.memory_space<vmem>>, vector<1x224x224xbf16>
    %80 = vector.shape_cast %79 : vector<1x224x224xbf16> to vector<224x224xbf16>
    %cst_61 = arith.constant dense<0.000000e+00> : vector<14x224xf32>
    %81 = tpu.matmul %78, %80, %cst_61 {dimension_numbers = #tpu.dot_dimension_numbers<[1], [0], [0], [1], [0, 0, 1, 1], [], []>} : vector<14x224xbf16>, vector<224x224xbf16>, vector<14x224xf32> -> vector<14x224xf32>
    %82 = arith.addf %76, %81 : vector<14x224xf32>
    %c5_62 = arith.constant 5 : index
    %c0_63 = arith.constant 0 : index
    %c0_64 = arith.constant 0 : index
    %83 = vector.load %arg4[%c5_62, %c0_63, %c0_64] : memref<10x224x224xbf16, #tpu.memory_space<vmem>>, vector<1x224x224xbf16>
    %84 = vector.shape_cast %83 : vector<1x224x224xbf16> to vector<224x224xbf16>
    %cst_65 = arith.constant dense<0.000000e+00> : vector<14x224xf32>
    %85 = tpu.matmul %78, %84, %cst_65 {dimension_numbers = #tpu.dot_dimension_numbers<[1], [0], [0], [1], [0, 0, 1, 1], [], []>} : vector<14x224xbf16>, vector<224x224xbf16>, vector<14x224xf32> -> vector<14x224xf32>
    %86 = arith.addf %77, %85 : vector<14x224xf32>
    %c1_66 = arith.constant 1 : index
    %c0_67 = arith.constant 0 : index
    %87 = vector.load %arg9[%c1_66, %c0_67] : memref<18x224xbf16, #tpu.memory_space<vmem>>, vector<14x224xbf16>
    %c1_68 = arith.constant 1 : index
    %c0_69 = arith.constant 0 : index
    %c0_70 = arith.constant 0 : index
    %88 = vector.load %arg4[%c1_68, %c0_69, %c0_70] : memref<10x224x224xbf16, #tpu.memory_space<vmem>>, vector<1x224x224xbf16>
    %89 = vector.shape_cast %88 : vector<1x224x224xbf16> to vector<224x224xbf16>
    %cst_71 = arith.constant dense<0.000000e+00> : vector<14x224xf32>
    %90 = tpu.matmul %87, %89, %cst_71 {dimension_numbers = #tpu.dot_dimension_numbers<[1], [0], [0], [1], [0, 0, 1, 1], [], []>} : vector<14x224xbf16>, vector<224x224xbf16>, vector<14x224xf32> -> vector<14x224xf32>
    %91 = arith.addf %82, %90 : vector<14x224xf32>
    %c6_72 = arith.constant 6 : index
    %c0_73 = arith.constant 0 : index
    %c0_74 = arith.constant 0 : index
    %92 = vector.load %arg4[%c6_72, %c0_73, %c0_74] : memref<10x224x224xbf16, #tpu.memory_space<vmem>>, vector<1x224x224xbf16>
    %93 = vector.shape_cast %92 : vector<1x224x224xbf16> to vector<224x224xbf16>
    %cst_75 = arith.constant dense<0.000000e+00> : vector<14x224xf32>
    %94 = tpu.matmul %87, %93, %cst_75 {dimension_numbers = #tpu.dot_dimension_numbers<[1], [0], [0], [1], [0, 0, 1, 1], [], []>} : vector<14x224xbf16>, vector<224x224xbf16>, vector<14x224xf32> -> vector<14x224xf32>
    %95 = arith.addf %86, %94 : vector<14x224xf32>
    %c2_76 = arith.constant 2 : index
    %c0_77 = arith.constant 0 : index
    %96 = vector.load %arg9[%c2_76, %c0_77] : memref<18x224xbf16, #tpu.memory_space<vmem>>, vector<14x224xbf16>
    %c2_78 = arith.constant 2 : index
    %c0_79 = arith.constant 0 : index
    %c0_80 = arith.constant 0 : index
    %97 = vector.load %arg4[%c2_78, %c0_79, %c0_80] : memref<10x224x224xbf16, #tpu.memory_space<vmem>>, vector<1x224x224xbf16>
    %98 = vector.shape_cast %97 : vector<1x224x224xbf16> to vector<224x224xbf16>
    %cst_81 = arith.constant dense<0.000000e+00> : vector<14x224xf32>
    %99 = tpu.matmul %96, %98, %cst_81 {dimension_numbers = #tpu.dot_dimension_numbers<[1], [0], [0], [1], [0, 0, 1, 1], [], []>} : vector<14x224xbf16>, vector<224x224xbf16>, vector<14x224xf32> -> vector<14x224xf32>
    %100 = arith.addf %91, %99 : vector<14x224xf32>
    %c7_82 = arith.constant 7 : index
    %c0_83 = arith.constant 0 : index
    %c0_84 = arith.constant 0 : index
    %101 = vector.load %arg4[%c7_82, %c0_83, %c0_84] : memref<10x224x224xbf16, #tpu.memory_space<vmem>>, vector<1x224x224xbf16>
    %102 = vector.shape_cast %101 : vector<1x224x224xbf16> to vector<224x224xbf16>
    %cst_85 = arith.constant dense<0.000000e+00> : vector<14x224xf32>
    %103 = tpu.matmul %96, %102, %cst_85 {dimension_numbers = #tpu.dot_dimension_numbers<[1], [0], [0], [1], [0, 0, 1, 1], [], []>} : vector<14x224xbf16>, vector<224x224xbf16>, vector<14x224xf32> -> vector<14x224xf32>
    %104 = arith.addf %95, %103 : vector<14x224xf32>
    %c3_86 = arith.constant 3 : index
    %c0_87 = arith.constant 0 : index
    %105 = vector.load %arg9[%c3_86, %c0_87] : memref<18x224xbf16, #tpu.memory_space<vmem>>, vector<14x224xbf16>
    %c3_88 = arith.constant 3 : index
    %c0_89 = arith.constant 0 : index
    %c0_90 = arith.constant 0 : index
    %106 = vector.load %arg4[%c3_88, %c0_89, %c0_90] : memref<10x224x224xbf16, #tpu.memory_space<vmem>>, vector<1x224x224xbf16>
    %107 = vector.shape_cast %106 : vector<1x224x224xbf16> to vector<224x224xbf16>
    %cst_91 = arith.constant dense<0.000000e+00> : vector<14x224xf32>
    %108 = tpu.matmul %105, %107, %cst_91 {dimension_numbers = #tpu.dot_dimension_numbers<[1], [0], [0], [1], [0, 0, 1, 1], [], []>} : vector<14x224xbf16>, vector<224x224xbf16>, vector<14x224xf32> -> vector<14x224xf32>
    %109 = arith.addf %100, %108 : vector<14x224xf32>
    %c8_92 = arith.constant 8 : index
    %c0_93 = arith.constant 0 : index
    %c0_94 = arith.constant 0 : index
    %110 = vector.load %arg4[%c8_92, %c0_93, %c0_94] : memref<10x224x224xbf16, #tpu.memory_space<vmem>>, vector<1x224x224xbf16>
    %111 = vector.shape_cast %110 : vector<1x224x224xbf16> to vector<224x224xbf16>
    %cst_95 = arith.constant dense<0.000000e+00> : vector<14x224xf32>
    %112 = tpu.matmul %105, %111, %cst_95 {dimension_numbers = #tpu.dot_dimension_numbers<[1], [0], [0], [1], [0, 0, 1, 1], [], []>} : vector<14x224xbf16>, vector<224x224xbf16>, vector<14x224xf32> -> vector<14x224xf32>
    %113 = arith.addf %104, %112 : vector<14x224xf32>
    %c4_96 = arith.constant 4 : index
    %c0_97 = arith.constant 0 : index
    %114 = vector.load %arg9[%c4_96, %c0_97] : memref<18x224xbf16, #tpu.memory_space<vmem>>, vector<14x224xbf16>
    %c4_98 = arith.constant 4 : index
    %c0_99 = arith.constant 0 : index
    %c0_100 = arith.constant 0 : index
    %115 = vector.load %arg4[%c4_98, %c0_99, %c0_100] : memref<10x224x224xbf16, #tpu.memory_space<vmem>>, vector<1x224x224xbf16>
    %116 = vector.shape_cast %115 : vector<1x224x224xbf16> to vector<224x224xbf16>
    %cst_101 = arith.constant dense<0.000000e+00> : vector<14x224xf32>
    %117 = tpu.matmul %114, %116, %cst_101 {dimension_numbers = #tpu.dot_dimension_numbers<[1], [0], [0], [1], [0, 0, 1, 1], [], []>} : vector<14x224xbf16>, vector<224x224xbf16>, vector<14x224xf32> -> vector<14x224xf32>
    %118 = arith.addf %109, %117 : vector<14x224xf32>
    %c9_102 = arith.constant 9 : index
    %c0_103 = arith.constant 0 : index
    %c0_104 = arith.constant 0 : index
    %119 = vector.load %arg4[%c9_102, %c0_103, %c0_104] : memref<10x224x224xbf16, #tpu.memory_space<vmem>>, vector<1x224x224xbf16>
    %120 = vector.shape_cast %119 : vector<1x224x224xbf16> to vector<224x224xbf16>
    %cst_105 = arith.constant dense<0.000000e+00> : vector<14x224xf32>
    %121 = tpu.matmul %114, %120, %cst_105 {dimension_numbers = #tpu.dot_dimension_numbers<[1], [0], [0], [1], [0, 0, 1, 1], [], []>} : vector<14x224xbf16>, vector<224x224xbf16>, vector<14x224xf32> -> vector<14x224xf32>
    %122 = arith.addf %113, %121 : vector<14x224xf32>
    %123 = arith.maximumf %118, %122 : vector<14x224xf32>
    %124 = tpu.iota {dimensions = array<i32: 1>} : vector<7x14xi32>
    %125 = tpu.iota {dimensions = array<i32: 0>} : vector<7x14xi32>
    %c2_i32_106 = arith.constant 2 : i32
    %126 = vector.broadcast %c2_i32_106 : i32 to vector<7x14xi32>
    %127 = arith.muli %126, %125 : vector<7x14xi32>
    %128 = arith.cmpi eq, %124, %127 : vector<7x14xi32>
    %129 = arith.extui %128 : vector<7x14xi1> to vector<7x14xi32>
    %130 = arith.sitofp %129 : vector<7x14xi32> to vector<7x14xf32>
    %c2_i32_107 = arith.constant 2 : i32
    %131 = vector.broadcast %c2_i32_107 : i32 to vector<7x14xi32>
    %132 = arith.muli %131, %125 : vector<7x14xi32>
    %c1_i32_108 = arith.constant 1 : i32
    %133 = vector.broadcast %c1_i32_108 : i32 to vector<7x14xi32>
    %134 = arith.addi %132, %133 : vector<7x14xi32>
    %135 = arith.cmpi eq, %124, %134 : vector<7x14xi32>
    %136 = arith.extui %135 : vector<7x14xi1> to vector<7x14xi32>
    %137 = arith.sitofp %136 : vector<7x14xi32> to vector<7x14xf32>
    %cst_109 = arith.constant dense<0.000000e+00> : vector<7x224xf32>
    %138 = tpu.matmul %130, %123, %cst_109 {dimension_numbers = #tpu.dot_dimension_numbers<[1], [0], [0], [1], [0, 0, 1, 1], [], []>} : vector<7x14xf32>, vector<14x224xf32>, vector<7x224xf32> -> vector<7x224xf32>
    %cst_110 = arith.constant dense<0.000000e+00> : vector<7x224xf32>
    %139 = tpu.matmul %137, %123, %cst_110 {dimension_numbers = #tpu.dot_dimension_numbers<[1], [0], [0], [1], [0, 0, 1, 1], [], []>} : vector<7x14xf32>, vector<14x224xf32>, vector<7x224xf32> -> vector<7x224xf32>
    %140 = arith.maximumf %138, %139 : vector<7x224xf32>
    %c0_111 = arith.constant 0 : index
    %c0_112 = arith.constant 0 : index
    %141 = vector.load %arg5[%c0_111, %c0_112] : memref<1x224xf32, #tpu.memory_space<vmem>>, vector<1x224xf32>
    %142 = vector.broadcast %141 : vector<1x224xf32> to vector<7x224xf32>
    %143 = arith.addf %140, %142 : vector<7x224xf32>
    %cst_113 = arith.constant 0.000000e+00 : f32
    %144 = vector.broadcast %cst_113 : f32 to vector<7x224xf32>
    %145 = arith.maximumf %143, %144 : vector<7x224xf32>
    %146 = arith.truncf %145 : vector<7x224xf32> to vector<7x224xbf16>
    %c0_114 = arith.constant 0 : index
    %c0_115 = arith.constant 0 : index
    %147 = vector.load %arg10[%c0_114, %c0_115] : memref<7x224xbf16, #tpu.memory_space<vmem>>, vector<7x224xbf16>
    tpu.vector_store %arg10[%c0_114, %c0_115], %146 {strides = array<i32>} : memref<7x224xbf16, #tpu.memory_space<vmem>>, vector<7x224xbf16>,
    %cst_116 = arith.constant 0.000000e+00 : f32
    %148 = vector.broadcast %cst_116 : f32 to vector<1x128xf32>
    %c0_117 = arith.constant 0 : index
    %c0_118 = arith.constant 0 : index
    %149 = vector.load %arg10[%c0_117, %c0_118] : memref<7x224xbf16, #tpu.memory_space<vmem>>, vector<1x224xbf16>
    %c0_119 = arith.constant 0 : index
    %c0_120 = arith.constant 0 : index
    %c0_121 = arith.constant 0 : index
    %150 = vector.load %arg6[%c0_119, %c0_120, %c0_121] : memref<7x224x128xbf16, #tpu.memory_space<vmem>>, vector<1x224x128xbf16>
    %151 = vector.shape_cast %150 : vector<1x224x128xbf16> to vector<224x128xbf16>
    %cst_122 = arith.constant dense<0.000000e+00> : vector<1x128xf32>
    %152 = tpu.matmul %149, %151, %cst_122 {dimension_numbers = #tpu.dot_dimension_numbers<[1], [0], [0], [1], [0, 0, 1, 1], [], []>} : vector<1x224xbf16>, vector<224x128xbf16>, vector<1x128xf32> -> vector<1x128xf32>
    %153 = arith.addf %148, %152 : vector<1x128xf32>
    %c1_123 = arith.constant 1 : index
    %c0_124 = arith.constant 0 : index
    %154 = vector.load %arg10[%c1_123, %c0_124] : memref<7x224xbf16, #tpu.memory_space<vmem>>, vector<1x224xbf16>
    %c1_125 = arith.constant 1 : index
    %c0_126 = arith.constant 0 : index
    %c0_127 = arith.constant 0 : index
    %155 = vector.load %arg6[%c1_125, %c0_126, %c0_127] : memref<7x224x128xbf16, #tpu.memory_space<vmem>>, vector<1x224x128xbf16>
    %156 = vector.shape_cast %155 : vector<1x224x128xbf16> to vector<224x128xbf16>
    %cst_128 = arith.constant dense<0.000000e+00> : vector<1x128xf32>
    %157 = tpu.matmul %154, %156, %cst_128 {dimension_numbers = #tpu.dot_dimension_numbers<[1], [0], [0], [1], [0, 0, 1, 1], [], []>} : vector<1x224xbf16>, vector<224x128xbf16>, vector<1x128xf32> -> vector<1x128xf32>
    %158 = arith.addf %153, %157 : vector<1x128xf32>
    %c2_129 = arith.constant 2 : index
    %c0_130 = arith.constant 0 : index
    %159 = vector.load %arg10[%c2_129, %c0_130] : memref<7x224xbf16, #tpu.memory_space<vmem>>, vector<1x224xbf16>
    %c2_131 = arith.constant 2 : index
    %c0_132 = arith.constant 0 : index
    %c0_133 = arith.constant 0 : index
    %160 = vector.load %arg6[%c2_131, %c0_132, %c0_133] : memref<7x224x128xbf16, #tpu.memory_space<vmem>>, vector<1x224x128xbf16>
    %161 = vector.shape_cast %160 : vector<1x224x128xbf16> to vector<224x128xbf16>
    %cst_134 = arith.constant dense<0.000000e+00> : vector<1x128xf32>
    %162 = tpu.matmul %159, %161, %cst_134 {dimension_numbers = #tpu.dot_dimension_numbers<[1], [0], [0], [1], [0, 0, 1, 1], [], []>} : vector<1x224xbf16>, vector<224x128xbf16>, vector<1x128xf32> -> vector<1x128xf32>
    %163 = arith.addf %158, %162 : vector<1x128xf32>
    %c3_135 = arith.constant 3 : index
    %c0_136 = arith.constant 0 : index
    %164 = vector.load %arg10[%c3_135, %c0_136] : memref<7x224xbf16, #tpu.memory_space<vmem>>, vector<1x224xbf16>
    %c3_137 = arith.constant 3 : index
    %c0_138 = arith.constant 0 : index
    %c0_139 = arith.constant 0 : index
    %165 = vector.load %arg6[%c3_137, %c0_138, %c0_139] : memref<7x224x128xbf16, #tpu.memory_space<vmem>>, vector<1x224x128xbf16>
    %166 = vector.shape_cast %165 : vector<1x224x128xbf16> to vector<224x128xbf16>
    %cst_140 = arith.constant dense<0.000000e+00> : vector<1x128xf32>
    %167 = tpu.matmul %164, %166, %cst_140 {dimension_numbers = #tpu.dot_dimension_numbers<[1], [0], [0], [1], [0, 0, 1, 1], [], []>} : vector<1x224xbf16>, vector<224x128xbf16>, vector<1x128xf32> -> vector<1x128xf32>
    %168 = arith.addf %163, %167 : vector<1x128xf32>
    %c4_141 = arith.constant 4 : index
    %c0_142 = arith.constant 0 : index
    %169 = vector.load %arg10[%c4_141, %c0_142] : memref<7x224xbf16, #tpu.memory_space<vmem>>, vector<1x224xbf16>
    %c4_143 = arith.constant 4 : index
    %c0_144 = arith.constant 0 : index
    %c0_145 = arith.constant 0 : index
    %170 = vector.load %arg6[%c4_143, %c0_144, %c0_145] : memref<7x224x128xbf16, #tpu.memory_space<vmem>>, vector<1x224x128xbf16>
    %171 = vector.shape_cast %170 : vector<1x224x128xbf16> to vector<224x128xbf16>
    %cst_146 = arith.constant dense<0.000000e+00> : vector<1x128xf32>
    %172 = tpu.matmul %169, %171, %cst_146 {dimension_numbers = #tpu.dot_dimension_numbers<[1], [0], [0], [1], [0, 0, 1, 1], [], []>} : vector<1x224xbf16>, vector<224x128xbf16>, vector<1x128xf32> -> vector<1x128xf32>
    %173 = arith.addf %168, %172 : vector<1x128xf32>
    %c5_147 = arith.constant 5 : index
    %c0_148 = arith.constant 0 : index
    %174 = vector.load %arg10[%c5_147, %c0_148] : memref<7x224xbf16, #tpu.memory_space<vmem>>, vector<1x224xbf16>
    %c5_149 = arith.constant 5 : index
    %c0_150 = arith.constant 0 : index
    %c0_151 = arith.constant 0 : index
    %175 = vector.load %arg6[%c5_149, %c0_150, %c0_151] : memref<7x224x128xbf16, #tpu.memory_space<vmem>>, vector<1x224x128xbf16>
    %176 = vector.shape_cast %175 : vector<1x224x128xbf16> to vector<224x128xbf16>
    %cst_152 = arith.constant dense<0.000000e+00> : vector<1x128xf32>
    %177 = tpu.matmul %174, %176, %cst_152 {dimension_numbers = #tpu.dot_dimension_numbers<[1], [0], [0], [1], [0, 0, 1, 1], [], []>} : vector<1x224xbf16>, vector<224x128xbf16>, vector<1x128xf32> -> vector<1x128xf32>
    %178 = arith.addf %173, %177 : vector<1x128xf32>
    %c6_153 = arith.constant 6 : index
    %c0_154 = arith.constant 0 : index
    %179 = vector.load %arg10[%c6_153, %c0_154] : memref<7x224xbf16, #tpu.memory_space<vmem>>, vector<1x224xbf16>
    %c6_155 = arith.constant 6 : index
    %c0_156 = arith.constant 0 : index
    %c0_157 = arith.constant 0 : index
    %180 = vector.load %arg6[%c6_155, %c0_156, %c0_157] : memref<7x224x128xbf16, #tpu.memory_space<vmem>>, vector<1x224x128xbf16>
    %181 = vector.shape_cast %180 : vector<1x224x128xbf16> to vector<224x128xbf16>
    %cst_158 = arith.constant dense<0.000000e+00> : vector<1x128xf32>
    %182 = tpu.matmul %179, %181, %cst_158 {dimension_numbers = #tpu.dot_dimension_numbers<[1], [0], [0], [1], [0, 0, 1, 1], [], []>} : vector<1x224xbf16>, vector<224x128xbf16>, vector<1x128xf32> -> vector<1x128xf32>
    %183 = arith.addf %178, %182 : vector<1x128xf32>
    %c0_159 = arith.constant 0 : index
    %c0_160 = arith.constant 0 : index
    %184 = vector.load %arg7[%c0_159, %c0_160] : memref<1x128xf32, #tpu.memory_space<vmem>>, vector<1x128xf32>
    %185 = arith.addf %183, %184 : vector<1x128xf32>
    %c0_161 = arith.constant 0 : index
    %c0_162 = arith.constant 0 : index
    %c0_163 = arith.constant 0 : index
    %186 = vector.load %arg8[%c0_161, %c0_162, %c0_163] : memref<1x1x128xf32, #tpu.memory_space<vmem>>, vector<1x1x128xf32>
    %187 = vector.shape_cast %186 : vector<1x1x128xf32> to vector<1x128xf32>
    %188 = vector.shape_cast %185 : vector<1x128xf32> to vector<1x1x128xf32>
    tpu.vector_store %arg8[%c0_161, %c0_162, %c0_163], %188 {strides = array<i32>} : memref<1x1x128xf32, #tpu.memory_space<vmem>>, vector<1x1x128xf32>,
    return
  }
  func.func @transform_0(%arg0: i32) -> (i32, i32, i32) {
    %c0_i32 = arith.constant 0 : i32
    %c0_i32_0 = arith.constant 0 : i32
    %c0_i32_1 = arith.constant 0 : i32
    return %arg0, %c0_i32, %c0_i32_0 : i32, i32, i32
  }
  func.func @transform_1(%arg0: i32) -> (i32, i32, i32) {
    %c0_i32 = arith.constant 0 : i32
    %c0_i32_0 = arith.constant 0 : i32
    %c0_i32_1 = arith.constant 0 : i32
    %c0_i32_2 = arith.constant 0 : i32
    return %c0_i32, %c0_i32_0, %c0_i32_1 : i32, i32, i32
  }
  func.func @transform_2(%arg0: i32) -> (i32, i32) {
    %c0_i32 = arith.constant 0 : i32
    %c0_i32_0 = arith.constant 0 : i32
    %c0_i32_1 = arith.constant 0 : i32
    return %c0_i32, %c0_i32_0 : i32, i32
  }
  func.func @transform_3(%arg0: i32) -> (i32, i32, i32) {
    %c0_i32 = arith.constant 0 : i32
    %c0_i32_0 = arith.constant 0 : i32
    %c0_i32_1 = arith.constant 0 : i32
    %c0_i32_2 = arith.constant 0 : i32
    return %c0_i32, %c0_i32_0, %c0_i32_1 : i32, i32, i32
  }
  func.func @transform_4(%arg0: i32) -> (i32, i32) {
    %c0_i32 = arith.constant 0 : i32
    %c0_i32_0 = arith.constant 0 : i32
    %c0_i32_1 = arith.constant 0 : i32
    return %c0_i32, %c0_i32_0 : i32, i32
  }
  func.func @transform_5(%arg0: i32) -> (i32, i32, i32) {
    %c0_i32 = arith.constant 0 : i32
    %c0_i32_0 = arith.constant 0 : i32
    %c0_i32_1 = arith.constant 0 : i32
    %c0_i32_2 = arith.constant 0 : i32
    return %c0_i32, %c0_i32_0, %c0_i32_1 : i32, i32, i32
  }
  func.func @transform_6(%arg0: i32) -> (i32, i32) {
    %c0_i32 = arith.constant 0 : i32
    %c0_i32_0 = arith.constant 0 : i32
    %c0_i32_1 = arith.constant 0 : i32
    return %c0_i32, %c0_i32_0 : i32, i32
  }
  func.func @transform_7(%arg0: i32) -> (i32, i32, i32) {
    %c0_i32 = arith.constant 0 : i32
    %c0_i32_0 = arith.constant 0 : i32
    %c0_i32_1 = arith.constant 0 : i32
    return %arg0, %c0_i32, %c0_i32_0 : i32, i32, i32
  }
}

</mosaic_0001>

<bundles_post_ra>
// kernel: tile.13
= control target key start
LH: loop header
LB: loop body
LE: loop exit
PB: predicated region body
PF: predicated region fallthrough
CT: control target
= control target key end

     0   :  { %s28_s0 = inlined_call_operand.vmem [shape: f32[16], index: 0, kind: input, shape index: {}]   ;;  %s29_s1 = inlined_call_operand.vmem [shape: f32[14,16], index: 1, kind: output, shape index: {}]  }
   0x1   :  { %v4_v0 = vld [vmem:[%s28_s0] ss:$0 sm:$0xff] }
   0x2   :  { %5 = vst [vmem:[%s29_s1] sm:$0xff] %v4_v0  ;;  %8 = vst [vmem:[%s29_s1 + $0x8] sm:$0xff] %v4_v0 }

// kernel: tile.18
= control target key start
LH: loop header
LB: loop body
LE: loop exit
PB: predicated region body
PF: predicated region fallthrough
CT: control target
= control target key end

     0   :  { %s22_s0 = inlined_call_operand.vmem [shape: f32[32], index: 0, kind: input, shape index: {}]   ;;  %s23_s1 = inlined_call_operand.vmem [shape: f32[7,32], index: 1, kind: output, shape index: {}]  }
   0x1   :  { %v4_v0 = vld [vmem:[%s22_s0] ss:$0 sm:$0xff] }
   0x2   :  { %5 = vst [vmem:[%s23_s1] sm:$0xff] %v4_v0 }

// kernel: tile.19
= control target key start
LH: loop header
LB: loop body
LE: loop exit
PB: predicated region body
PF: predicated region fallthrough
CT: control target
= control target key end

     0   :  { %s13_s8 = smov 3  ;;  %s44_s9 = smov 96   ;;  %vm4_vm0 = vcmask 261120   ;;  %vm10_vm1 = vcmask 1048320   ;;  %vm17_vm2 = vcmask 785920   ;;  %vm24_vm3 = vcmask 523520   ;;  %s75_s0 = inlined_call_operand.vmem [shape: f32[7,32], index: 0, kind: input, shape index: {}]   ;;  %s76_s1 = inlined_call_operand.vmem [shape: f32[1,224], index: 1, kind: output, shape index: {}]  }
   0x1   :  { %v37_v0 = vld [vmem:[%s75_s0 + $0x3] sm:$0x1]   ;;  %s20_s10 = smov 3  ;;  %v38_v1 = vld [vmem:[%s75_s0 + $0x2] ss:$4 sm:%s13_s8]   ;;  %s2_s15 = smov 3 }
   0x2   :  { %8 = vrot.lane.b32.xlu0 %v37_v0, %s44_s9  ;;  %v39_v2 = vld [vmem:[%s75_s0 + $0x1] ss:$4 sm:%s20_s10]   ;;  %s45_s16 = smov 32  }
   0x3   :  { %22 = vrot.lane.b32.xlu1 %v39_v2, %s45_s16  ;;  %v3_v3 = vld [vmem:[%s75_s0] ss:$4 sm:%s2_s15]   ;;  %s46_s0 = smov 64  }
   0x4   :  { %5 = vst.msk [vmem:[#allocation0] ss:$8 sm:$0x3] %vm4_vm0, %v3_v3  }
   0x6   :  { %15 = vrot.lane.b32.xlu0 %v38_v1, %s46_s0 }
  0x74   :  { %v9_v4 = vpop.permute.xlu0 %8  }
  0x75   :  { %11 = vst.msk [vmem:[#allocation0] sm:$0x1] %vm10_vm1, %v9_v4   ;;  %v23_v5 = vpop.permute.xlu1 %22  }
  0x78   :  { %v16_v6 = vpop.permute.xlu0 %15  }
  0x79   :  { %18 = vst.msk [vmem:[#allocation0] ss:$8 sm:$0x3] %vm17_vm2, %v16_v6  }
  0x7a   :  { %25 = vst.msk [vmem:[#allocation0] ss:$8 sm:$0x3] %vm24_vm3, %v23_v5  }
  0x81   :  { %v29_v7 = vld [vmem:[#allocation0] sm:$0x1]  ;;  %v33_v8 = vld [vmem:[#allocation0 + $0x8] sm:$0x1] }
  0x82   :  { %31 = vst [vmem:[%s76_s1] sm:$0x1] %v29_v7  ;;  %40 = vst [vmem:[%s76_s1 + $0x1] sm:$0x1] %v33_v8 }

// kernel: cnn_fashion_mnist_forward.1
= control target key start
LH: loop header
LB: loop body
LE: loop exit
PB: predicated region body
PF: predicated region fallthrough
CT: control target
= control target key end

     0   :  { %12 = vsyncpa [#allocation5], 0  ;;  %s8740_s0 = inlined_call_operand.vmem [shape: bf16[2,32,32], index: 0, kind: input, shape index: {}]   ;;  %s8741_s1 = inlined_call_operand.vmem [shape: bf16[10,32,224], index: 1, kind: input, shape index: {}]   ;;  %s8742_s2 = inlined_call_operand.vmem [shape: f32[18,224], index: 2, kind: input, shape index: {}]   ;;  %s8743_s3 = inlined_call_operand.vmem [shape: bf16[10,224,224], index: 3, kind: input, shape index: {}]   ;;  %s8744_s4 = inlined_call_operand.vmem [shape: f32[1,224], index: 4, kind: input, shape index: {}]   ;;  %s8745_s5 = inlined_call_operand.vmem [shape: bf16[7,224,128], index: 5, kind: input, shape index: {}]   ;;  %s8746_s6 = inlined_call_operand.vmem [shape: f32[1,128], index: 6, kind: input, shape index: {}]   ;;  %s8747_s7 = inlined_call_operand.hbm [shape: f32[2,1,128], index: 7, kind: output, shape index: {}]  }
   0x1   :  { %14 = vsyncpa [#allocation5 + $0x1], 0  ;;  %s7039_s24 = smov 0   ;;  %s7041_s25 = smov 0  }
   0x2   :  { %s7043_s26 = smov 0   ;;  %s7045_s27 = smov 0  }
   0x3 LB: > { %s7060_s28 = sadd.s32 4294967295, %s6993_s27   ;;  %s5175_s29 = sadd.s32 4294967294, %s6993_s27   ;;  %s6993_s27 = sphi %s7045_s27, %s8757_s27   ;;  %s6989_s26 = sphi %s7043_s26, %s8756_s26   ;;  %s6985_s25 = sphi %s7041_s25, %s8755_s25   ;;  %s6981_s24 = sphi %s7039_s24, %s8754_s24  }
   0x4   : > { %s7064_s30 = sadd.s32 1, %s6993_s27   ;;  %s179_s8 = sadd.s32 1, %s6989_s26 }
   0x5   : > { %s176_s9 = ssub.s32 %s6993_s27, %s7064_s30  ;;  %p189_p0 = scmp.ne.s32.totalorder %s6989_s26, %s6985_s25 }
   0x6   : > { %p177_p1 = scmp.eq.s32.totalorder %s176_s9, 0  ;;  %p190_p2 = scmp.eq.s32.totalorder %s7060_s28, 1 }
   0x7   : > { %p195_p3 = scmp.ne.s32.totalorder %s6985_s25, %s6981_s24  ;;  %p196_p4 = scmp.eq.s32.totalorder %s5175_s29, 1 }
   0x8   : > { %s7075_s10 = scalar_select %p177_p1, %s6989_s26, %s179_s8  }
   0x9   : > { %p7077_p5 = por %p190_p2, %p189_p0  ;;  %p7081_p6 = por %p196_p4, %p195_p3 }
   0xa   : > { %p5178_p7 = scmp.ge.s32.totalorder %s6993_s27, 1  ;;  %p240_p8 = scmp.lt.s32.totalorder %s6993_s27, 3 }
   0xc   : > { %p241_p9 = pnand %p5178_p7, %p240_p8 }
   0xd   : > { %v6327_v0 = vld [vmem:[%s8741_s1 + $0x4] ss:$8 sps:$4 sm:$0xff] (!%p241_p9)   ;;  %p271_p10 = scmp.lt.s32.totalorder (!%p241_p9), %s7060_s28, 1  ;;  %v6329_v1 = vld [vmem:[%s8741_s1] ss:$8 sps:$4 sm:$0xff] (!%p241_p9)   ;;  %v6995_v2 = vmov (!%p241_p9), 0  }
   0xe   : > { %244 = sbr.rel (%p241_p9) target bundleno = 1681 (0x691), region = 48  ;;  %462 = vmatprep.mubr.bf16.mxu0 (!%p241_p9), %v6995_v2  ;;  %381 = vmatprep.mubr.bf16.mxu1 (!%p241_p9), %v6995_v2  ;;  %v6330_v3 = vld [vmem:[%s8741_s1 + $0x14] ss:$8 sps:$4 sm:$0xff] (!%p241_p9)   ;;  %v6332_v4 = vld [vmem:[%s8741_s1 + $0x24] ss:$8 sps:$4 sm:$0xff] (!%p241_p9)   ;;  %vm342_vm0 = vcmask (!%p241_p9), 261120  }
   0xf   : > { %430 = vmatprep.subr.bf16.mxu0 (!%p241_p9), %v6327_v0  ;;  %v6334_v5 = vld [vmem:[%s8741_s1 + $0x10] ss:$8 sps:$4 sm:$0xff] (!%p241_p9)   ;;  %v6335_v6 = vld [vmem:[%s8741_s1 + $0x20] ss:$8 sps:$4 sm:$0xff] (!%p241_p9)   ;;  %v6339_v7 = vld [vmem:[%s8741_s1 + $0x34] ss:$8 sps:$4 sm:$0xff] (!%p241_p9)   ;;  %349 = vmatprep.subr.bf16.mxu1 (!%p241_p9), %v6332_v4 }
  0x10   : > { %431 = vmatpush1.bf16.msra.mxu0 (!%p241_p9), %v6329_v1  ;;  %350 = vmatpush1.bf16.msra.mxu1 (!%p241_p9), %v6335_v6  ;;  %v6341_v10 = vld [vmem:[%s8741_s1 + $0x30] ss:$8 sps:$4 sm:$0xff] (!%p241_p9)   ;;  %vm306_vm1 = vsmask.f32 (!%p241_p9), 7424  ;;  %v6345_v17 = vld [vmem:[%s8741_s1 + $0x40] ss:$8 sps:$4 sm:$0xff] (!%p241_p9)  }
  0x11   : > { %432 = vmatprep.subr.bf16.mxu0 (!%p241_p9), %v6330_v3  ;;  %351 = vmatprep.subr.bf16.mxu1 (!%p241_p9), %v6339_v7  ;;  %v6347_v18 = vld [vmem:[%s8741_s1 + $0x44] ss:$8 sps:$4 sm:$0xff] (!%p241_p9)   ;;  %v6351_v25 = vld [vmem:[%s8741_s1 + $0x50] ss:$8 sps:$4 sm:$0xff] (!%p241_p9)   ;;  %v6353_v26 = vld [vmem:[%s8741_s1 + $0x54] ss:$8 sps:$4 sm:$0xff] (!%p241_p9)  }
  0x12   : > { %v6350_v23 = vld [vmem:[%s8741_s1 + $0xc4] ss:$8 sps:$4 sm:$0xff] (!%p241_p9)   ;;  %v6348_v28 = vld [vmem:[%s8741_s1 + $0xc0] ss:$8 sps:$4 sm:$0xff] (!%p241_p9)   ;;  %v6356_v30 = vld [vmem:[%s8741_s1 + $0xd4] ss:$8 sps:$4 sm:$0xff] (!%p241_p9)  }
  0x13   : > { %v6359_v33 = vld [vmem:[%s8741_s1 + $0x64] ss:$8 sps:$4 sm:$0xff] (!%p241_p9)   ;;  %v6354_v35 = vld [vmem:[%s8741_s1 + $0xd0] ss:$8 sps:$4 sm:$0xff] (!%p241_p9)   ;;  %vm643_vm2 = vcmask (!%p241_p9), 1046528   ;;  %vm1029_vm4 = vcmask (!%p241_p9), 1045504  }
  0x14   : > { %433 = vmatpush1.bf16.msra.mxu0 (!%p241_p9), %v6334_v5  ;;  %352 = vmatpush1.bf16.msra.mxu1 (!%p241_p9), %v6341_v10  ;;  %v6362_v36 = vld [vmem:[%s8741_s1 + $0xa4] ss:$8 sps:$4 sm:$0xff] (!%p241_p9)   ;;  %v6357_v43 = vld [vmem:[%s8741_s1 + $0x60] ss:$8 sps:$4 sm:$0xff] (!%p241_p9)   ;;  %v6365_v44 = vld [vmem:[%s8741_s1 + $0x74] ss:$8 sps:$4 sm:$0xff] (!%p241_p9)  }
  0x15   : > { %s272_s19 = scalar_select %p271_p10, %s7060_s28, 1  ;;  %673 = vmatprep.subr.bf16.mxu0 %v6347_v18  ;;  %508 = vmatprep.subr.bf16.mxu1 %v6350_v23  ;;  %v6363_v46 = vld [vmem:[%s8741_s1 + $0x70] ss:$8 sps:$4 sm:$0xff]   ;;  %v6371_v50 = vld [vmem:[%s8741_s1 + $0x84] ss:$8 sps:$4 sm:$0xff]   ;;  %v6996_v18 = vmov 0.0  }
  0x16   : > { %v6360_v51 = vld [vmem:[%s8741_s1 + $0xa0] ss:$8 sps:$4 sm:$0xff]   ;;  %v6368_v53 = vld [vmem:[%s8741_s1 + $0xb4] ss:$8 sps:$4 sm:$0xff]   ;;  %v6366_v57 = vld [vmem:[%s8741_s1 + $0xb0] ss:$8 sps:$4 sm:$0xff]  }
  0x17   : > { %s6152_s9 = sshll.u32 %s272_s19, 4  ;;  %v6374_v58 = vld [vmem:[%s8741_s1 + $0xe4] ss:$8 sps:$4 sm:$0xff]   ;;  %vm829_vm3 = vsmask.f32 6400  ;;  %vm1257_vm5 = vcmask 1043456  }
  0x18   : > { %s7115_s17 = scalar_lea.vmem %s8740_s0, %s6152_s9  ;;  %v6369_v61 = vld [vmem:[%s8741_s1 + $0x80] ss:$8 sps:$4 sm:$0xff]   ;;  %v6377_v62 = vld [vmem:[%s8741_s1 + $0x94] ss:$8 sps:$4 sm:$0xff]   ;;  %v6375_v0 = vld [vmem:[%s8741_s1 + $0x90] ss:$8 sps:$4 sm:$0xff]  }
  0x19   : > { %v277_v8 = vld [vmem:[%s7115_s17] sm:$0xf]  ;;  %v7119_v9 = vld [vmem:[%s7115_s17 + $0x4] sm:$0xf]  ;;  %v279_v12 = vld [vmem:[%s7115_s17 + $0x8] sm:$0xf] }
  0x1a   : > { %v7125_v11 = vcombine.low %v277_v8, %v7119_v9  ;;  %v290_v13 = vld [vmem:[%s7115_s17 + $0xc] sm:$0x7]  ;;  %v634_v19 = vld [vmem:[%s7115_s17] sm:$0xe]  ;;  %v6380_v4 = vld [vmem:[%s8741_s1 + $0xf4] ss:$8 sps:$4 sm:$0xff]  }
  0x1b   : > { %v5190_v14 = vcombine.low %v279_v12, %v290_v13  ;;  %v280_v21 = vld [vmem:[%s7115_s17 + $0xc] sm:$0x3]  ;;  %v5224_v31 = vcombine.low %v634_v19, %v7119_v9  ;;  %v1020_v1 = vld [vmem:[%s7115_s17] sm:$0xc]  ;;  %v6378_v6 = vld [vmem:[%s8741_s1 + $0xf0] ss:$8 sps:$4 sm:$0xff]  }
  0x1c   : > { %v308_v15 = vshrl.u32 %v7125_v11, 16  ;;  %v310_v16 = vshll.u32 %v7125_v11, 16  ;;  %5202 = vmatmul.mubr.msk.bf16.vlgmr.msra.gmra.mrb[0].mxu0 %vm342_vm0, %v7125_v11  ;;  %v7154_v29 = vcombine.low %v279_v12, %v280_v21  ;;  %v820_v39 = vld [vmem:[%s7115_s17 + $0xc] sm:$0xf]  ;;  %v6372_v3 = vld [vmem:[%s8741_s1 + $0xe0] ss:$8 sps:$4 sm:$0xff]   ;;  %v5266_v5 = vcombine.low %v1020_v1, %v7119_v9 }
  0x1d   : > { %v315_v20 = vshll.u32 %v5190_v14, 16  ;;  %472 = vmatprep.mubr.bf16.mxu0 %v6995_v2  ;;  %674 = vmatpush1.bf16.msra.mxu0 %v6345_v17  ;;  %v319_v34 = vshrl.u32 %v5190_v14, 16  ;;  %v644_v37 = vrot.slane %v5224_v31, 1  ;;  %v7175_v38 = vrot.slane %v5190_v14, 1  ;;  %v6383_v7 = vld [vmem:[%s8741_s1 + $0x104] ss:$8 sps:$4 sm:$0xff]  }
  0x1e   : > { %v312_v22 = vrot.slane %v310_v16, 1  ;;  %675 = vmatprep.subr.bf16.mxu0 %v6353_v26  ;;  %v5245_v41 = vcombine.low %v279_v12, %v820_v39  ;;  %v831_v45 = vshrl.u32 %v5224_v31, 16  ;;  %v834_v47 = vshll.u32 %v5224_v31, 16  ;;  %v6386_v12 = vld [vmem:[%s8741_s1 + $0x114] ss:$8 sps:$4 sm:$0xff]   ;;  %s269_s16 = sand.u32 1, %s6985_s25  }
  0x1f   : > { %v317_v24 = vrot.slane %v315_v20, 1  ;;  %v7179_v42 = vsel %vm643_vm2, %v644_v37, %v7175_v38  ;;  %v1030_v8 = vrot.slane %v5266_v5, 2  ;;  %v6384_v13 = vld [vmem:[%s8741_s1 + $0x110] ss:$8 sps:$4 sm:$0xff]   ;;  %v6389_v14 = vld [vmem:[%s8741_s1 + $0x124] ss:$8 sps:$4 sm:$0xff]  }
  0x20   : > { %v313_v27 = vor.u32 %v312_v22, %v308_v15  ;;  %v839_v48 = vshrl.u32 %v5245_v41, 16  ;;  %v842_v49 = vshll.u32 %v5245_v41, 16  ;;  %v833_v52 = vrot.slane %v831_v45, 1  ;;  %v6387_v15 = vld [vmem:[%s8741_s1 + $0x120] ss:$8 sps:$4 sm:$0xff]   ;;  %s6149_s20 = sshll.u32 %s7060_s28, 4 }
  0x21   : > { %676 = vmatpush1.bf16.msra.mxu0 %v6351_v25  ;;  %v321_v40 = vor.u32 %v319_v34, %v317_v24  ;;  %v836_v54 = vrot.slane %v834_v47, 2  ;;  %v1031_v9 = vrot.slane %v5245_v41, 2  ;;  %v6392_v16 = vld [vmem:[%s8741_s1 + $0x134] ss:$8 sps:$4 sm:$0xff]   ;;  %v6390_v17 = vld [vmem:[%s8741_s1 + $0x130] ss:$8 sps:$4 sm:$0xff]   ;;  %s8698_s8 = scalar_lea.hbm %s8747_s7, %s6149_s20 }
  0x22   : > { %v318_v32 = vsel %vm306_vm1, %v313_v27, %v317_v24  ;;  %873 = vmatprep.subr.bf16.mxu0 %v6359_v33  ;;  %v841_v55 = vrot.slane %v839_v48, 1  ;;  %v844_v56 = vrot.slane %v842_v49, 2  ;;  %v6393_v19 = vld [vmem:[%s8743_s3 + $0xe0] ss:$8 sps:$4 sm:$0xff]   ;;  %v6395_v20 = vld [vmem:[%s8743_s3 + $0xe4] ss:$8 sps:$4 sm:$0xff]  }
  0x23   : > { %5195 = vmatmul.mubr.msk.bf16.vlgmr.msra.gmra.mrb[0].mxu1 %vm342_vm0, %v318_v32  ;;  %v837_v59 = vor.u32 %v836_v54, %v833_v52  ;;  %v1032_v10 = vsel %vm1029_vm4, %v1030_v8, %v1031_v9  ;;  %v6401_v21 = vld [vmem:[%s8743_s3 + $0xf4] ss:$8 sps:$4 sm:$0xff]   ;;  %v6399_v22 = vld [vmem:[%s8743_s3 + $0xf0] ss:$8 sps:$4 sm:$0xff]   ;;  %v6407_v23 = vld [vmem:[%s8743_s3 + $0x104] ss:$8 sps:$4 sm:$0xff]  }
  0x24   : > { %509 = vmatpush1.bf16.msra.mxu1 %v6348_v28  ;;  %391 = vmatprep.mubr.bf16.mxu1 %v6995_v2  ;;  %v845_v60 = vor.u32 %v844_v56, %v841_v55  ;;  %v6405_v24 = vld [vmem:[%s8743_s3 + $0x100] ss:$8 sps:$4 sm:$0xff]   ;;  %v6413_v26 = vld [vmem:[%s8743_s3 + $0x114] ss:$8 sps:$4 sm:$0xff]   ;;  %vm6997_vm6 = vmmov 1   ;;  %vm1247_vm9 = vcmask 228352  }
  0x25   : > { %5203 = vmatmul.mubr.msk.bf16.gmra.mrb[4].mxu0 %vm342_vm0, %v7154_v29  ;;  %510 = vmatprep.subr.bf16.mxu1 %v6356_v30  ;;  %v6411_v30 = vld [vmem:[%s8743_s3 + $0x110] ss:$8 sps:$4 sm:$0xff]   ;;  %vm7323_vm7 = vmpackc.low %vm1257_vm5, %vm6997_vm6  ;;  %vm1483_vm15 = vcmask 785412   ;;  %vm1487_vm2 = vcmask 1040384   ;;  %s270_s21 = scalar_lea.vmem [#allocation4], %s269_s16  ;;  %s5108_s9 = scalar_lea.sflag [#allocation5], %s269_s16 }
  0x26   : > { %705 = vmatprep.mubr.bf16.mxu0 %v6995_v2  ;;  %v846_v63 = vsel %vm829_vm3, %v837_v59, %v845_v60  ;;  %s5120_s22 = sshll.u32 %s270_s21, 4  ;;  %s6998_s13 = smov [#allocation4]   ;;  %s8700_s22 = int_to_ptr.vmem [resolvable:$true] %s5120_s22 }
  0x27   : > { %s6931_s28 = scalar_lea.vmem %s8700_s22, 16  ;;  %s6935_s14 = sshll.u32 %s6998_s13, 4  ;;  %s6936_s14 = int_to_ptr.vmem [resolvable:$false] %s6935_s14 }
  0x28   : > { %511 = vmatpush1.bf16.msra.mxu1 %v6354_v35  ;;  %p6932_p11 = scmp.ne.s32.totalorder %s8700_s22, %s6931_s28  ;;  %s6937_s17 = scalar_lea.vmem %s6936_s14, 32 }
  0x29   : > { %581 = vmatprep.subr.bf16.mxu1 %v6362_v36  ;;  %p6938_p0 = scmp.lt.s32.totalorder %s8700_s22, %s6936_s14  ;;  %p6939_p1 = scmp.lt.s32.totalorder %s6937_s17, %s6931_s28 }
  0x2a   : > { %p6933_p12 = pnand %p6932_p11, %p7077_p5 }
  0x2b   : > { %5196 = vmatmul.mubr.msk.bf16.gmra.mrb[4].mxu1 %vm342_vm0, %v321_v40  ;;  %p6940_p2 = por %p6939_p1, %p6938_p0 }
  0x2c   : > { %540 = vmatprep.mubr.bf16.mxu1 %v6995_v2  ;;  %p6934_p13 = pneg %p6933_p12 }
  0x2d   : > { %5229 = vmatmul.mubr.msk.bf16.vlgmr.msra.gmra.mrb[0].mxu0 %vm342_vm0, %v7179_v42 }
  0x2e   : > { %715 = vmatprep.mubr.bf16.mxu0 %v6995_v2  ;;  %874 = vmatpush1.bf16.msra.mxu0 %v6357_v43  ;;  %p6941_p3 = pnand %p6940_p2, %p6934_p13 }
  0x2f   : > { %875 = vmatprep.subr.bf16.mxu0 %v6365_v44 }
  0x32   : > { %876 = vmatpush1.bf16.msra.mxu0 %v6363_v46 }
  0x33   : > { %5212 = vmatmul.mubr.msk.bf16.vlgmr.msra.gmra.mrb[8].mxu1 %vm342_vm0, %v318_v32  ;;  %1059 = vmatprep.subr.bf16.mxu0 %v6371_v50 }
  0x34   : > { %582 = vmatpush1.bf16.msra.mxu1 %v6360_v51  ;;  %550 = vmatprep.mubr.bf16.mxu1 %v6995_v2  ;;  %v1214_v51 = vlaneseq }
  0x35   : > { %5230 = vmatmul.mubr.msk.bf16.gmra.mrb[4].mxu0 %vm342_vm0, %v7175_v38  ;;  %583 = vmatprep.subr.bf16.mxu1 %v6368_v53 }
  0x36   : > { %905 = vmatprep.mubr.bf16.mxu0 %v6995_v2  ;;  %v7318_v5 = vand.u32 127, %v1214_v51 }
  0x38   : > { %584 = vmatpush1.bf16.msra.mxu1 %v6366_v57  ;;  %v7314_v57 = vshrl.u32 %v1214_v51, 7  ;;  %v6440_v51 = vld [vmem:[%s8743_s3 + $0x5b4] ss:$8 sps:$4 sm:$0xff]  }
  0x39   : > { %759 = vmatprep.subr.bf16.mxu1 %v6374_v58 }
  0x3b   : > { %5213 = vmatmul.mubr.msk.bf16.gmra.mrb[12].mxu1 %vm342_vm0, %v321_v40 }
  0x3c   : > { %613 = vmatprep.mubr.bf16.mxu1 %v6995_v2 }
  0x3d   : > { %5250 = vmatmul.mubr.msk.bf16.vlgmr.msra.gmra.mrb[0].mxu0 %vm342_vm0, %v846_v63 }
  0x3e   : > { %915 = vmatprep.mubr.bf16.mxu0 %v6995_v2  ;;  %1060 = vmatpush1.bf16.msra.mxu0 %v6369_v61 }
  0x3f   : > { %1061 = vmatprep.subr.bf16.mxu0 %v6377_v62 }
  0x42   : > { %1062 = vmatpush1.bf16.msra.mxu0 %v6375_v0  ;;  %v1218_v0 = vadd.s32 8, %v7314_v57 }
  0x43   : > { %5218 = vmatmul.mubr.msk.bf16.vlgmr.msra.gmra.mrb[8].mxu1 %vm342_vm0, %v7125_v11  ;;  %v6381_v11 = vld [vmem:[%s8741_s1 + $0x100] ss:$8 sps:$4 sm:$0xff]   ;;  %1747 = vmatprep.subr.bf16.mxu0 %v6395_v20 }
  0x44   : > { %760 = vmatpush1.bf16.msra.mxu1 %v6372_v3  ;;  %623 = vmatprep.mubr.bf16.mxu1 %v6995_v2 }
  0x45   : > { %5251 = vmatmul.mubr.msk.bf16.gmra.mrb[4].mxu0 %vm342_vm0, %v845_v60  ;;  %761 = vmatprep.subr.bf16.mxu1 %v6380_v4 }
  0x46   : > { %1091 = vmatprep.mubr.bf16.mxu0 %v6995_v2 }
  0x48   : > { %762 = vmatpush1.bf16.msra.mxu1 %v6378_v6 }
  0x49   : > { %959 = vmatprep.subr.bf16.mxu1 %v6383_v7 }
  0x4b   : > { %5219 = vmatmul.mubr.msk.bf16.gmra.mrb[12].mxu1 %vm342_vm0, %v7154_v29 }
  0x4c   : > { %791 = vmatprep.mubr.bf16.mxu1 %v6995_v2 }
  0x4d   : > { %5271 = vmatmul.mubr.msk.bf16.vlgmr.msra.gmra.mrb[0].mxu0 %vm342_vm0, %v1032_v10 }
  0x4e   : > { %1101 = vmatprep.mubr.bf16.mxu0 %v6995_v2  ;;  %1748 = vmatpush1.bf16.msra.mxu0 %v6393_v19 }
  0x4f   : > { %1749 = vmatprep.subr.bf16.mxu0 %v6401_v21 }
  0x52   : > { %1750 = vmatpush1.bf16.msra.mxu0 %v6399_v22 }
  0x53   : > { %5239 = vmatmul.mubr.msk.bf16.vlgmr.msra.gmra.mrb[8].mxu1 %vm342_vm0, %v7179_v42  ;;  %1751 = vmatprep.subr.bf16.mxu0 %v6407_v23 }
  0x54   : > { %960 = vmatpush1.bf16.msra.mxu1 %v6381_v11  ;;  %801 = vmatprep.mubr.bf16.mxu1 %v6995_v2 }
  0x55   : > { %5272 = vmatmul.mubr.msk.bf16.gmra.mrb[4].mxu0 %vm342_vm0, %v1031_v9  ;;  %961 = vmatprep.subr.bf16.mxu1 %v6386_v12 }
  0x56   : > { %1752 = vmatpush1.bf16.msra.mxu0 %v6405_v24  ;;  %v6398_v24 = vld [vmem:[%s8743_s3 + $0x544] ss:$8 sps:$4 sm:$0xff]  }
  0x57   : > { %1753 = vmatprep.subr.bf16.mxu0 %v6413_v26 }
  0x58   : > { %962 = vmatpush1.bf16.msra.mxu1 %v6384_v13 }
  0x59   : > { %1145 = vmatprep.subr.bf16.mxu1 %v6389_v14 }
  0x5a   : > { %1754 = vmatpush1.bf16.msra.mxu0 %v6411_v30  ;;  %v6404_v30 = vld [vmem:[%s8743_s3 + $0x554] ss:$8 sps:$4 sm:$0xff]  }
  0x5b   : > { %5240 = vmatmul.mubr.msk.bf16.gmra.mrb[12].mxu1 %vm342_vm0, %v7175_v38 }
  0x5c   : > { %991 = vmatprep.mubr.bf16.mxu1 %v6995_v2 }
  0x63   : > { %5260 = vmatmul.mubr.msk.bf16.vlgmr.msra.gmra.mrb[8].mxu1 %vm342_vm0, %v846_v63  ;;  %v5283_v63 = vadd.s32 4294967294, %v7314_v57 }
  0x64   : > { %1146 = vmatpush1.bf16.msra.mxu1 %v6387_v15  ;;  %1001 = vmatprep.mubr.bf16.mxu1 %v6995_v2  ;;  %v6471_v15 = vld [vmem:[%s8743_s3 + $0x1b0] ss:$8 sps:$4 sm:$0xff]  }
  0x65   : > { %1147 = vmatprep.subr.bf16.mxu1 %v6392_v16  ;;  %v1223_v8 = vmul.u32 2, %v5283_v63  ;;  %v6455_v63 = vld [vmem:[%s8743_s3 + $0x184] ss:$8 sps:$4 sm:$0xff]  }
  0x67   : > { %vm1226_vm8 = vcmp.eq.s32.totalorder %v7318_v5, %v1223_v8  ;;  %v1235_v23 = vadd.s32 1, %v1223_v8  ;;  %v6462_v8 = vld [vmem:[%s8743_s3 + $0x5f0] ss:$8 sps:$4 sm:$0xff]  }
  0x68   : > { %1148 = vmatpush1.bf16.msra.mxu1 %v6390_v17  ;;  %v5286_v20 = vsel %vm1226_vm8, 1.0, %v6996_v18 }
  0x69   : > { %vm1238_vm12 = vcmp.eq.s32.totalorder %v7318_v5, %v1235_v23 }
  0x6b   : > { %5261 = vmatmul.mubr.msk.bf16.gmra.mrb[12].mxu1 %vm342_vm0, %v845_v60 }
  0x6c   : > { %1177 = vmatprep.mubr.bf16.mxu1 %v6995_v2 }
  0x73   : > { %5281 = vmatmul.mubr.msk.bf16.vlgmr.msra.gmra.mrb[8].mxu1 %vm342_vm0, %v1032_v10  ;;  %v1219_v10 = vadd.s32 16, %v7314_v57 }
  0x74   : > { %1187 = vmatprep.mubr.bf16.mxu1 %v6995_v2 }
  0x75   : > { %v5285_v19 = vadd.s32 4294967294, %v1219_v10  ;;  %v6465_v10 = vld [vmem:[%s8743_s3 + $0x1a0] ss:$8 sps:$4 sm:$0xff]  }
  0x77   : > { %v1225_v21 = vmul.u32 2, %v5285_v19  ;;  %v6483_v19 = vld [vmem:[%s8743_s3 + $0x464] ss:$8 sps:$4 sm:$0xff]  }
  0x79   : > { %vm1228_vm11 = vcmp.eq.s32.totalorder %v7318_v5, %v1225_v21 }
  0x7b   : > { %5282 = vmatmul.mubr.msk.bf16.gmra.mrb[12].mxu1 %vm342_vm0, %v1031_v9  ;;  %v5284_v9 = vadd.s32 4294967294, %v1218_v0  ;;  %v6458_v0 = vld [vmem:[%s8743_s3 + $0x5e4] ss:$8 sps:$4 sm:$0xff]   ;;  %vm7522_vm0 = vmor %vm1483_vm15, %vm1257_vm5 }
  0x7c   : > { %1328 = vmatprep.mubr.f32.mxu1 %v6996_v18 }
  0x7d   : > { %v1224_v17 = vmul.u32 2, %v5284_v9  ;;  %v6467_v9 = vld [vmem:[%s8743_s3 + $0x1a4] ss:$8 sps:$4 sm:$0xff]  }
  0x7f   : > { %vm1227_vm10 = vcmp.eq.s32.totalorder %v7318_v5, %v1224_v17  ;;  %v1236_v26 = vadd.s32 1, %v1224_v17  ;;  %v6480_v17 = vld [vmem:[%s8743_s3 + $0x4] ss:$8 sps:$4 sm:$0xff]  }
  0x80   : > { %v5287_v22 = vsel %vm1227_vm10, 1.0, %v6996_v18 }
  0x81   : > { %vm1239_vm13 = vcmp.eq.s32.totalorder %v7318_v5, %v1236_v26 }
  0xf6   : > { %v383_v25 = vpop.f32.mrb[0].mxu1 }
  0xf7   : > { %v385_v27 = vpop.f32.mrb[1].mxu1 }
  0xf8   : > { %v387_v28 = vpop.f32.mrb[2].mxu1 }
  0xf9   : > { %v389_v29 = vpop.f32.mrb[3].mxu1 }
  0xfe   : > { %v393_v31 = vpop.f32.mrb[4].mxu1 }
  0xff   : > { %v395_v32 = vpop.f32.mrb[5].mxu1 }
 0x100   : > { %v397_v33 = vpop.f32.mrb[6].mxu1 }
 0x101   : > { %v399_v34 = vpop.f32.mrb[7].mxu1 }
 0x120   : > { %v1093_v35 = vpop.f32.mrb[0].mxu0 }
 0x121   : > { %v6189_v36 = vadd.f32 %v1093_v35, %v383_v25  ;;  %v1095_v37 = vpop.f32.mrb[1].mxu0  ;;  %v5288_v25 = vsel %vm1228_vm11, 1.0, %v6996_v18  ;;  %v6408_v35 = vld [vmem:[%s8743_s3 + $0x560] ss:$8 sps:$4 sm:$0xff]  }
 0x122   : > { %v6190_v38 = vadd.f32 %v1095_v37, %v385_v27  ;;  %v1097_v39 = vpop.f32.mrb[2].mxu0  ;;  %v5289_v27 = vsel %vm1238_vm12, 1.0, %v6996_v18  ;;  %v6414_v37 = vld [vmem:[%s8743_s3 + $0x570] ss:$8 sps:$4 sm:$0xff]   ;;  %vm3759_vm12 = vcmask 113664  }
 0x123   : > { %v6191_v40 = vadd.f32 %v1097_v39, %v387_v28  ;;  %v1099_v41 = vpop.f32.mrb[3].mxu0  ;;  %v6396_v28 = vld [vmem:[%s8743_s3 + $0x540] ss:$8 sps:$4 sm:$0xff]   ;;  %v6422_v39 = vld [vmem:[%s8743_s3 + $0x584] ss:$8 sps:$4 sm:$0xff]  }
 0x124   : > { %v6192_v42 = vadd.f32 %v1099_v41, %v389_v29  ;;  %v1237_v29 = vadd.s32 1, %v1225_v21  ;;  %v6420_v41 = vld [vmem:[%s8743_s3 + $0x580] ss:$8 sps:$4 sm:$0xff]  }
 0x126   : > { %vm1240_vm14 = vcmp.eq.s32.totalorder %v7318_v5, %v1237_v29 }
 0x128   : > { %v1103_v43 = vpop.f32.mrb[4].mxu0 }
 0x129   : > { %v6193_v44 = vadd.f32 %v1103_v43, %v393_v31  ;;  %v1105_v45 = vpop.f32.mrb[5].mxu0  ;;  %v5290_v31 = vsel %vm1239_vm13, 1.0, %v6996_v18  ;;  %v6428_v43 = vld [vmem:[%s8743_s3 + $0x594] ss:$8 sps:$4 sm:$0xff]  }
 0x12a   : > { %v6194_v46 = vadd.f32 %v1105_v45, %v395_v32  ;;  %v1107_v47 = vpop.f32.mrb[6].mxu0  ;;  %v6402_v32 = vld [vmem:[%s8743_s3 + $0x550] ss:$8 sps:$4 sm:$0xff]  }
 0x12b   : > { %v6195_v48 = vadd.f32 %v1107_v47, %v397_v33  ;;  %v1109_v49 = vpop.f32.mrb[7].mxu0  ;;  %v6410_v33 = vld [vmem:[%s8743_s3 + $0x564] ss:$8 sps:$4 sm:$0xff]   ;;  %v6426_v45 = vld [vmem:[%s8743_s3 + $0x590] ss:$8 sps:$4 sm:$0xff]  }
 0x12c   : > { %v6196_v50 = vadd.f32 %v1109_v49, %v399_v34  ;;  %v5291_v34 = vsel %vm1240_vm14, 1.0, %v6996_v18  ;;  %v6434_v47 = vld [vmem:[%s8743_s3 + $0x5a4] ss:$8 sps:$4 sm:$0xff]   ;;  %v6432_v49 = vld [vmem:[%s8743_s3 + $0x5a0] ss:$8 sps:$4 sm:$0xff]  }
 0x146   : > { %v1179_v52 = vpop.f32.mrb[8].mxu1 }
 0x147   : > { %v1206_v53 = vmax.f32 %v6189_v36, %v1179_v52  ;;  %v1181_v54 = vpop.f32.mrb[9].mxu1  ;;  %v6416_v36 = vld [vmem:[%s8743_s3 + $0x574] ss:$8 sps:$4 sm:$0xff]   ;;  %v6435_v52 = vld [vmem:[%s8743_s3 + $0x150] ss:$8 sps:$4 sm:$0xff]  }
 0x148   : > { %v1207_v55 = vmax.f32 %v6190_v38, %v1181_v54  ;;  %v1183_v56 = vpop.f32.mrb[10].mxu1  ;;  %v6419_v38 = vld [vmem:[%s8743_s3 + $0x124] ss:$8 sps:$4 sm:$0xff]  }
 0x149   : > { %v1208_v58 = vmax.f32 %v6191_v40, %v1183_v56  ;;  %v1185_v59 = vpop.f32.mrb[11].mxu1  ;;  %v6417_v40 = vld [vmem:[%s8743_s3 + $0x120] ss:$8 sps:$4 sm:$0xff]   ;;  %1755 = vmatprep.subr.bf16.mxu0 %v6419_v38  ;;  %v6443_v54 = vld [vmem:[%s8743_s3 + $0x164] ss:$8 sps:$4 sm:$0xff]  }
 0x14a   : > { %v1209_v60 = vmax.f32 %v6192_v42, %v1185_v59  ;;  %1756 = vmatpush1.bf16.msra.mxu0 %v6417_v40  ;;  %v6425_v42 = vld [vmem:[%s8743_s3 + $0x134] ss:$8 sps:$4 sm:$0xff]   ;;  %v6441_v56 = vld [vmem:[%s8743_s3 + $0x160] ss:$8 sps:$4 sm:$0xff]  }
 0x14b   : > { %v6159_v61 = vpack.c.bf16 %v1208_v58, %v1206_v53  ;;  %1757 = vmatprep.subr.bf16.mxu0 %v6425_v42  ;;  %v6438_v53 = vld [vmem:[%s8743_s3 + $0x5b0] ss:$8 sps:$4 sm:$0xff]   ;;  %v6444_v58 = vld [vmem:[%s8743_s3 + $0x5c0] ss:$8 sps:$4 sm:$0xff]   ;;  %v6449_v59 = vld [vmem:[%s8743_s3 + $0x174] ss:$8 sps:$4 sm:$0xff]  }
 0x14c   : > { %v6157_v62 = vpack.c.bf16 %v1209_v60, %v1207_v55  ;;  %v6446_v55 = vld [vmem:[%s8743_s3 + $0x5c4] ss:$8 sps:$4 sm:$0xff]   ;;  %v6452_v60 = vld [vmem:[%s8743_s3 + $0x5d4] ss:$8 sps:$4 sm:$0xff]   ;;  %v6522_v42 = vld [vmem:[%s8743_s3 + $0x70] ss:$8 sps:$4 sm:$0xff]  }
 0x14e   : > { %v1189_v1 = vpop.f32.mrb[12].mxu1  ;;  %6158 = vmatprep.subr.bf16.mxu1 %v6157_v62 }
 0x14f   : > { %v1210_v3 = vmax.f32 %v6193_v44, %v1189_v1  ;;  %v1191_v4 = vpop.f32.mrb[13].mxu1  ;;  %6160 = vmatpush1.bf16.msra.mxu1 %v6159_v61  ;;  %v6423_v44 = vld [vmem:[%s8743_s3 + $0x130] ss:$8 sps:$4 sm:$0xff]   ;;  %v6453_v1 = vld [vmem:[%s8743_s3 + $0x180] ss:$8 sps:$4 sm:$0xff]  }
 0x150   : > { %v1211_v6 = vmax.f32 %v6194_v46, %v1191_v4  ;;  %v1193_v7 = vpop.f32.mrb[14].mxu1  ;;  %1758 = vmatpush1.bf16.msra.mxu0 %v6423_v44  ;;  %v6431_v46 = vld [vmem:[%s8743_s3 + $0x144] ss:$8 sps:$4 sm:$0xff]   ;;  %v6461_v4 = vld [vmem:[%s8743_s3 + $0x194] ss:$8 sps:$4 sm:$0xff]  }
 0x151   : > { %v1212_v11 = vmax.f32 %v6195_v48, %v1193_v7  ;;  %v1195_v12 = vpop.f32.mrb[15].mxu1  ;;  %v6429_v48 = vld [vmem:[%s8743_s3 + $0x140] ss:$8 sps:$4 sm:$0xff]   ;;  %1759 = vmatprep.subr.bf16.mxu0 %v6431_v46  ;;  %v6459_v7 = vld [vmem:[%s8743_s3 + $0x190] ss:$8 sps:$4 sm:$0xff]  }
 0x152   : > { %v1213_v13 = vmax.f32 %v6196_v50, %v1195_v12  ;;  %v6437_v50 = vld [vmem:[%s8743_s3 + $0x154] ss:$8 sps:$4 sm:$0xff]   ;;  %v6470_v12 = vld [vmem:[%s8743_s3 + $0x604] ss:$8 sps:$4 sm:$0xff]  }
 0x153   : > { %v6164_v14 = vpack.c.bf16 %v1212_v11, %v1210_v3  ;;  %v6456_v3 = vld [vmem:[%s8743_s3 + $0x5e0] ss:$8 sps:$4 sm:$0xff]  }
 0x154   : > { %v6161_v16 = vpack.c.bf16 %v1213_v13, %v1211_v6  ;;  %1760 = vmatpush1.bf16.msra.mxu0 %v6429_v48  ;;  %v6464_v6 = vld [vmem:[%s8743_s3 + $0x5f4] ss:$8 sps:$4 sm:$0xff]   ;;  %v6468_v11 = vld [vmem:[%s8743_s3 + $0x600] ss:$8 sps:$4 sm:$0xff]  }
 0x155   : > { %1761 = vmatprep.subr.bf16.mxu0 %v6437_v50  ;;  %v6473_v13 = vld [vmem:[%s8743_s3 + $0x1b4] ss:$8 sps:$4 sm:$0xff]  }
 0x156   : > { %6163 = vmatprep.subr.msk.bf16.mxu1 %vm7323_vm7, %v6161_v16 }
 0x157   : > { %6166 = vmatpush1.bf16.msk.msra.mxu1 %vm7323_vm7, %v6164_v14 }
 0x158   : > { %6168 = vmatprep.subr.bf16.mxu1 %v6157_v62  ;;  %1762 = vmatpush1.bf16.msra.mxu0 %v6435_v52  ;;  %v6450_v62 = vld [vmem:[%s8743_s3 + $0x5d0] ss:$8 sps:$4 sm:$0xff]  }
 0x159   : > { %1763 = vmatprep.subr.bf16.mxu0 %v6443_v54 }
 0x15a   : > { %5294 = vmatmul.mubr.msk.f32.vlgmr.msra.gmra.mrb[16].mxu1 %vm1247_vm9, %v5286_v20 }
 0x15b   : > { %6170 = vmatpush1.bf16.msra.mxu1 %v6159_v61  ;;  %1334 = vmatprep.mubr.f32.mxu1 %v6996_v18  ;;  %v6447_v61 = vld [vmem:[%s8743_s3 + $0x170] ss:$8 sps:$4 sm:$0xff]  }
 0x15c   : > { %6173 = vmatprep.subr.msk.bf16.mxu1 %vm7323_vm7, %v6161_v16  ;;  %1764 = vmatpush1.bf16.msra.mxu0 %v6441_v56  ;;  %v6474_v16 = vld [vmem:[%s8743_s3 + $0x610] ss:$8 sps:$4 sm:$0xff]  }
 0x15d   : > { %1765 = vmatprep.subr.bf16.mxu0 %v6449_v59 }
 0x15e   : > { %5295 = vmatmul.mubr.msk.f32.gmra.mrb[18].mxu1 %vm1247_vm9, %v5287_v22 }
 0x15f   : > { %6176 = vmatpush1.bf16.msk.msra.mxu1 %vm7323_vm7, %v6164_v14  ;;  %1340 = vmatprep.mubr.f32.mxu1 %v6996_v18  ;;  %v6476_v14 = vld [vmem:[%s8743_s3 + $0x614] ss:$8 sps:$4 sm:$0xff]   ;;  %vm1488_vm7 = vcmask 782340  }
 0x160   : > { %2151 = vmatprep.subr.bf16.mxu1 %v6398_v24  ;;  %1766 = vmatpush1.bf16.msra.mxu0 %v6447_v61  ;;  %vm1489_vm8 = vmor %vm1488_vm7, %vm1487_vm2 }
 0x161   : > { %1767 = vmatprep.subr.bf16.mxu0 %v6455_v63 }
 0x162   : > { %5296 = vmatmul.mubr.msk.f32.gmra.mrb[20].mxu1 %vm1247_vm9, %v5288_v25 }
 0x163   : > { %1420 = vmatprep.mubr.f32.mxu1 %v6996_v18 }
 0x164   : > { %1768 = vmatpush1.bf16.msra.mxu0 %v6453_v1 }
 0x165   : > { %1769 = vmatprep.subr.bf16.mxu0 %v6461_v4 }
 0x166   : > { %5299 = vmatmul.mubr.msk.f32.vlgmr.msra.gmra.mrb[22].mxu1 %vm1247_vm9, %v5289_v27  ;;  %v1445_v27 = vld [vmem:[%s8742_s2] sm:$0xff] }
 0x167   : > { %1426 = vmatprep.mubr.f32.mxu1 %v6996_v18  ;;  %2152 = vmatpush1.bf16.msra.mxu1 %v6396_v28 }
 0x168   : > { %2153 = vmatprep.subr.bf16.mxu1 %v6404_v30  ;;  %1770 = vmatpush1.bf16.msra.mxu0 %v6459_v7  ;;  %v1446_v30 = vld [vmem:[%s8742_s2 + $0x8] sm:$0xff] }
 0x169   : > { %1771 = vmatprep.subr.bf16.mxu0 %v6467_v9 }
 0x16a   : > { %5300 = vmatmul.mubr.msk.f32.gmra.mrb[24].mxu1 %vm1247_vm9, %v5290_v31 }
 0x16b   : > { %1432 = vmatprep.mubr.f32.mxu1 %v6996_v18  ;;  %2154 = vmatpush1.bf16.msra.mxu1 %v6402_v32 }
 0x16c   : > { %2155 = vmatprep.subr.bf16.mxu1 %v6410_v33  ;;  %1772 = vmatpush1.bf16.msra.mxu0 %v6465_v10  ;;  %v6478_v10 = vld [vmem:[%s8743_s3] ss:$8 sps:$4 sm:$0xff]  }
 0x16d   : > { %1773 = vmatprep.subr.bf16.mxu0 %v6473_v13 }
 0x16e   : > { %5301 = vmatmul.mubr.msk.f32.gmra.mrb[26].mxu1 %vm1247_vm9, %v5291_v34  ;;  %vm1743_vm9 = vcmask 785408  }
 0x16f   : > { %2156 = vmatpush1.bf16.msra.mxu1 %v6408_v35  ;;  %v1447_v35 = vld [vmem:[%s8742_s2 + $0x10] sm:$0xff] }
 0x170   : > { %2157 = vmatprep.subr.bf16.mxu1 %v6416_v36  ;;  %1774 = vmatpush1.bf16.msra.mxu0 %v6471_v15  ;;  %v6491_v15 = vld [vmem:[%s8743_s3 + $0x474] ss:$8 sps:$4 sm:$0xff]  }
 0x171   : > { %1939 = vmatprep.subr.bf16.mxu0 %v6480_v17  ;;  %v6486_v17 = vld [vmem:[%s8743_s3 + $0x10] ss:$8 sps:$4 sm:$0xff]  }
 0x173   : > { %2158 = vmatpush1.bf16.msra.mxu1 %v6414_v37 }
 0x174   : > { %2159 = vmatprep.subr.bf16.mxu1 %v6422_v39  ;;  %v1448_v39 = vld [vmem:[%s8742_s2 + $0x18] sm:$0xff] }
 0x177   : > { %2160 = vmatpush1.bf16.msra.mxu1 %v6420_v41 }
 0x178   : > { %2161 = vmatprep.subr.bf16.mxu1 %v6428_v43 }
 0x17b   : > { %2162 = vmatpush1.bf16.msra.mxu1 %v6426_v45 }
 0x17c   : > { %2163 = vmatprep.subr.bf16.mxu1 %v6434_v47  ;;  %v1449_v47 = vld [vmem:[%s8742_s2 + $0x20] sm:$0x3] }
 0x17f   : > { %2164 = vmatpush1.bf16.msra.mxu1 %v6432_v49 }
 0x180   : > { %2165 = vmatprep.subr.bf16.mxu1 %v6440_v51  ;;  %v1450_v51 = vld [vmem:[%s8742_s2 + $0x28] sm:$0x3] }
 0x183   : > { %2166 = vmatpush1.bf16.msra.mxu1 %v6438_v53 }
 0x184   : > { %2167 = vmatprep.subr.bf16.mxu1 %v6446_v55 }
 0x187   : > { %2168 = vmatpush1.bf16.msra.mxu1 %v6444_v58 }
 0x188   : > { %2169 = vmatprep.subr.bf16.mxu1 %v6452_v60 }
 0x18b   : > { %2170 = vmatpush1.bf16.msra.mxu1 %v6450_v62 }
 0x18c   : > { %2171 = vmatprep.subr.bf16.mxu1 %v6458_v0 }
 0x18f   : > { %2172 = vmatpush1.bf16.msra.mxu1 %v6456_v3 }
 0x190   : > { %2173 = vmatprep.subr.bf16.mxu1 %v6464_v6 }
 0x193   : > { %2174 = vmatpush1.bf16.msra.mxu1 %v6462_v8 }
 0x194   : > { %2175 = vmatprep.subr.bf16.mxu1 %v6470_v12 }
 0x197   : > { %2176 = vmatpush1.bf16.msra.mxu1 %v6468_v11  ;;  %v6481_v11 = vld [vmem:[%s8743_s3 + $0x460] ss:$8 sps:$4 sm:$0xff]  }
 0x198   : > { %2177 = vmatprep.subr.bf16.mxu1 %v6476_v14  ;;  %v6488_v14 = vld [vmem:[%s8743_s3 + $0x14] ss:$8 sps:$4 sm:$0xff]  }
 0x19b   : > { %2178 = vmatpush1.bf16.msra.mxu1 %v6474_v16 }
 0x19c   : > { %2334 = vmatprep.subr.bf16.mxu1 %v6483_v19  ;;  %v6489_v19 = vld [vmem:[%s8743_s3 + $0x470] ss:$8 sps:$4 sm:$0xff]  }
 0x22d   : > { %v1330_v20 = vpop.f32.mrb[16].mxu1 }
 0x22e   : > { %v1332_v21 = vpop.f32.mrb[17].mxu1 }
 0x231   : > { %v1336_v22 = vpop.f32.mrb[18].mxu1 }
 0x232   : > { %v1338_v23 = vpop.f32.mrb[19].mxu1 }
 0x235   : > { %v1342_v24 = vpop.f32.mrb[20].mxu1 }
 0x236   : > { %v1344_v25 = vpop.f32.mrb[21].mxu1 }
 0x239   : > { %v1422_v26 = vpop.f32.mrb[22].mxu1 }
 0x23a   : > { %v1439_v28 = vmax.f32 %v1330_v20, %v1422_v26  ;;  %v1424_v29 = vpop.f32.mrb[23].mxu1  ;;  %v6494_v20 = vld [vmem:[%s8743_s3 + $0x24] ss:$8 sps:$4 sm:$0xff]   ;;  %v6498_v26 = vld [vmem:[%s8743_s3 + $0x30] ss:$8 sps:$4 sm:$0xff]  }
 0x23b   : > { %v1440_v31 = vmax.f32 %v1332_v21, %v1424_v29  ;;  %v6497_v21 = vld [vmem:[%s8743_s3 + $0x484] ss:$8 sps:$4 sm:$0xff]  }
 0x23c   : > { %v1451_v32 = vadd.f32 %v1445_v27, %v1439_v28  ;;  %v6501_v27 = vld [vmem:[%s8743_s3 + $0x490] ss:$8 sps:$4 sm:$0xff]   ;;  %v6506_v28 = vld [vmem:[%s8743_s3 + $0x44] ss:$8 sps:$4 sm:$0xff]  }
 0x23d   : > { %v1452_v33 = vadd.f32 %v1446_v30, %v1440_v31  ;;  %v1428_v34 = vpop.f32.mrb[24].mxu1  ;;  %v6509_v29 = vld [vmem:[%s8743_s3 + $0x4a4] ss:$8 sps:$4 sm:$0xff]   ;;  %v6504_v30 = vld [vmem:[%s8743_s3 + $0x40] ss:$8 sps:$4 sm:$0xff]  }
 0x23e   : > { %v1457_v36 = vmax.f32 %v1451_v32, 0.0  ;;  %v1441_v37 = vmax.f32 %v1336_v22, %v1428_v34  ;;  %v1430_v38 = vpop.f32.mrb[25].mxu1  ;;  %v6492_v22 = vld [vmem:[%s8743_s3 + $0x20] ss:$8 sps:$4 sm:$0xff]   ;;  %v6512_v32 = vld [vmem:[%s8743_s3 + $0x54] ss:$8 sps:$4 sm:$0xff]  }
 0x23f   : > { %v1458_v40 = vmax.f32 %v1452_v33, 0.0  ;;  %v1442_v41 = vmax.f32 %v1338_v23, %v1430_v38  ;;  %v6495_v23 = vld [vmem:[%s8743_s3 + $0x480] ss:$8 sps:$4 sm:$0xff]   ;;  %v6515_v33 = vld [vmem:[%s8743_s3 + $0x4b4] ss:$8 sps:$4 sm:$0xff]  }
 0x240   : > { %v1453_v43 = vadd.f32 %v1447_v35, %v1441_v37  ;;  %v6507_v31 = vld [vmem:[%s8743_s3 + $0x4a0] ss:$8 sps:$4 sm:$0xff]   ;;  %v6510_v34 = vld [vmem:[%s8743_s3 + $0x50] ss:$8 sps:$4 sm:$0xff]   ;;  %v6521_v37 = vld [vmem:[%s8743_s3 + $0x4c4] ss:$8 sps:$4 sm:$0xff]  }
 0x241   : > { %v6153_v44 = vpack.c.bf16 %v1458_v40, %v1457_v36  ;;  %v1454_v45 = vadd.f32 %v1448_v39, %v1442_v41  ;;  %v1434_v46 = vpop.f32.mrb[26].mxu1  ;;  %v6513_v35 = vld [vmem:[%s8743_s3 + $0x4b0] ss:$8 sps:$4 sm:$0xff]   ;;  %v6518_v36 = vld [vmem:[%s8743_s3 + $0x64] ss:$8 sps:$4 sm:$0xff]  }
 0x242   : > { %v1459_v48 = vmax.f32 %v1453_v43, 0.0  ;;  %v1443_v49 = vmax.f32 %v1342_v24, %v1434_v46  ;;  %v1436_v50 = vpop.f32.mrb[27].mxu1  ;;  %v6500_v24 = vld [vmem:[%s8743_s3 + $0x34] ss:$8 sps:$4 sm:$0xff]   ;;  %v6516_v38 = vld [vmem:[%s8743_s3 + $0x60] ss:$8 sps:$4 sm:$0xff]  }
 0x243   : > { %1485 = vst.msk [vmem:[#allocation2] sm:$0xff] %vm7522_vm0, %v6153_v44  ;;  %v1460_v52 = vmax.f32 %v1454_v45, 0.0  ;;  %v1444_v53 = vmax.f32 %v1344_v25, %v1436_v50  ;;  %v6503_v25 = vld [vmem:[%s8743_s3 + $0x494] ss:$8 sps:$4 sm:$0xff]   ;;  %v6519_v39 = vld [vmem:[%s8743_s3 + $0x4c0] ss:$8 sps:$4 sm:$0xff]  }
 0x244   : > { %v1455_v54 = vadd.f32 %v1449_v47, %v1443_v49  ;;  %v6524_v40 = vld [vmem:[%s8743_s3 + $0x74] ss:$8 sps:$4 sm:$0xff]   ;;  %v6525_v43 = vld [vmem:[%s8743_s3 + $0x4d0] ss:$8 sps:$4 sm:$0xff]   ;;  %v6530_v44 = vld [vmem:[%s8743_s3 + $0x84] ss:$8 sps:$4 sm:$0xff]  }
 0x245   : > { %v6154_v55 = vpack.c.bf16 %v1460_v52, %v1459_v48  ;;  %v1456_v56 = vadd.f32 %v1450_v51, %v1444_v53  ;;  %v6527_v41 = vld [vmem:[%s8743_s3 + $0x4d4] ss:$8 sps:$4 sm:$0xff]   ;;  %v6533_v45 = vld [vmem:[%s8743_s3 + $0x4e4] ss:$8 sps:$4 sm:$0xff]   ;;  %v6528_v46 = vld [vmem:[%s8743_s3 + $0x80] ss:$8 sps:$4 sm:$0xff]  }
 0x246   : > { %v1461_v58 = vmax.f32 %v1455_v54, 0.0  ;;  %v6531_v47 = vld [vmem:[%s8743_s3 + $0x4e0] ss:$8 sps:$4 sm:$0xff]   ;;  %v6536_v48 = vld [vmem:[%s8743_s3 + $0x94] ss:$8 sps:$4 sm:$0xff]  }
 0x247   : > { %1486 = vst.msk [vmem:[#allocation2 + $0x8] sm:$0xff] %vm7522_vm0, %v6154_v55  ;;  %v1462_v59 = vmax.f32 %v1456_v56, 0.0  ;;  %v6539_v49 = vld [vmem:[%s8743_s3 + $0x4f4] ss:$8 sps:$4 sm:$0xff]   ;;  %v6534_v50 = vld [vmem:[%s8743_s3 + $0x90] ss:$8 sps:$4 sm:$0xff]  }
 0x248   : > { %v6537_v51 = vld [vmem:[%s8743_s3 + $0x4f0] ss:$8 sps:$4 sm:$0xff]   ;;  %v6542_v52 = vld [vmem:[%s8743_s3 + $0xa4] ss:$8 sps:$4 sm:$0xff]   ;;  %v6540_v54 = vld [vmem:[%s8743_s3 + $0xa0] ss:$8 sps:$4 sm:$0xff]  }
 0x249   : > { %v6155_v60 = vpack.c.bf16 %v1462_v59, %v1461_v58  ;;  %v6545_v53 = vld [vmem:[%s8743_s3 + $0x504] ss:$8 sps:$4 sm:$0xff]   ;;  %v6543_v55 = vld [vmem:[%s8743_s3 + $0x500] ss:$8 sps:$4 sm:$0xff]   ;;  %v6548_v56 = vld [vmem:[%s8743_s3 + $0xb4] ss:$8 sps:$4 sm:$0xff]  }
 0x24a   : > { %v7536_v61 = vld [vmem:[#allocation2] sm:$0xff]  ;;  %v6551_v58 = vld [vmem:[%s8743_s3 + $0x514] ss:$8 sps:$4 sm:$0xff]   ;;  %v6546_v59 = vld [vmem:[%s8743_s3 + $0xb0] ss:$8 sps:$4 sm:$0xff]  }
 0x24b   : > { %1490 = vst.msk [vmem:[#allocation2 + $0x10] sm:$0x11] %vm1489_vm8, %v6155_v60  ;;  %v6549_v60 = vld [vmem:[%s8743_s3 + $0x510] ss:$8 sps:$4 sm:$0xff]  }
 0x24e   : > { %v7538_v62 = vld [vmem:[#allocation2 + $0x8] sm:$0xff] }
 0x24f   : > { %v5362_v63 = vcombine.high %v7536_v61, %v7538_v62  ;;  %v5361_v0 = vcombine.low %v7536_v61, %v7538_v62  ;;  %v7550_v13 = vld [vmem:[#allocation2 + $0x8] sm:$0x77] }
 0x250   : > { %v5393_v16 = vcombine.high %v7536_v61, %v7550_v13 }
 0x251   : > { %v1598_v1 = vshll.u32 %v5362_v63, 16  ;;  %v1591_v3 = vshll.u32 %v5361_v0, 16  ;;  %v1596_v4 = vshrl.u32 %v5362_v63, 16  ;;  %v1589_v7 = vshrl.u32 %v5361_v0, 16  ;;  %v6554_v63 = vld [vmem:[%s8743_s3 + $0xc4] ss:$8 sps:$4 sm:$0xff]  }
 0x252   : > { %v6557_v0 = vld [vmem:[%s8743_s3 + $0x524] ss:$8 sps:$4 sm:$0xff]  }
 0x253   : > { %v1600_v6 = vrot.slane %v1598_v1, 1  ;;  %v1593_v8 = vrot.slane %v1591_v3, 1  ;;  %v6552_v1 = vld [vmem:[%s8743_s3 + $0xc0] ss:$8 sps:$4 sm:$0xff]  }
 0x254   : > { %v6555_v3 = vld [vmem:[%s8743_s3 + $0x520] ss:$8 sps:$4 sm:$0xff]  }
 0x255   : > { %v1601_v9 = vor.u32 %v1600_v6, %v1596_v4  ;;  %v1594_v12 = vor.u32 %v1593_v8, %v1589_v7  ;;  %v6560_v4 = vld [vmem:[%s8743_s3 + $0xd4] ss:$8 sps:$4 sm:$0xff]   ;;  %v6558_v7 = vld [vmem:[%s8743_s3 + $0xd0] ss:$8 sps:$4 sm:$0xff]  }
 0x256   : > { %v6563_v6 = vld [vmem:[%s8743_s3 + $0x534] ss:$8 sps:$4 sm:$0xff]   ;;  %v6561_v8 = vld [vmem:[%s8743_s3 + $0x530] ss:$8 sps:$4 sm:$0xff]  }
 0x257   : > { %5391 = vmatprep.mubr.msk.bf16.mxu0 %vm1743_vm9, %v1601_v9  ;;  %5479 = vmatprep.mubr.msk.bf16.mxu1 %vm1743_vm9, %v1601_v9  ;;  %v6567_v9 = vld [vmem:[%s8743_s3 + $0x1c4] ss:$8 sps:$4 sm:$0xff]  }
 0x258   : > { %1780 = vmatmul.mubr.bf16.vlgmr.msra.gmra.mrb[8].mxu0 %v1594_v12  ;;  %2184 = vmatmul.mubr.bf16.vlgmr.msra.gmra.mrb[28].mxu1 %v1594_v12 }
 0x259   : > { %1940 = vmatpush1.bf16.msra.mxu0 %v6478_v10  ;;  %2335 = vmatpush1.bf16.msra.mxu1 %v6481_v11  ;;  %v6570_v10 = vld [vmem:[%s8743_s3 + $0x624] ss:$8 sps:$4 sm:$0xff]  }
 0x25a   : > { %5422 = vmatprep.mubr.msk.bf16.mxu0 %vm1743_vm9, %v5393_v16  ;;  %5508 = vmatprep.mubr.msk.bf16.mxu1 %vm1743_vm9, %v5393_v16  ;;  %v7720_v11 = vld [vmem:[#allocation2] sm:$0xee] }
 0x25b   : > { %1941 = vmatprep.subr.bf16.mxu0 %v6488_v14  ;;  %2336 = vmatprep.subr.bf16.mxu1 %v6491_v15  ;;  %v5538_v12 = vcombine.high %v7720_v11, %v7538_v62  ;;  %v6565_v14 = vld [vmem:[%s8743_s3 + $0x1c0] ss:$8 sps:$4 sm:$0xff]   ;;  %v5392_v15 = vcombine.low %v7536_v61, %v7550_v13  ;;  %v6572_v61 = vld [vmem:[%s8743_s3 + $0x1d0] ss:$8 sps:$4 sm:$0xff]  }
 0x25c   : > { %v6568_v16 = vld [vmem:[%s8743_s3 + $0x620] ss:$8 sps:$4 sm:$0xff]   ;;  %v6575_v13 = vld [vmem:[%s8743_s3 + $0x630] ss:$8 sps:$4 sm:$0xff]  }
 0x25d   : > { %1942 = vmatpush1.bf16.msra.mxu0 %v6486_v17  ;;  %2337 = vmatpush1.bf16.msra.mxu1 %v6489_v19  ;;  %v2413_v17 = vrot.slane %v5538_v12, 1  ;;  %v6574_v19 = vld [vmem:[%s8743_s3 + $0x1d4] ss:$8 sps:$4 sm:$0xff]  }
 0x25e   : > { %1943 = vmatprep.subr.bf16.mxu0 %v6494_v20  ;;  %2338 = vmatprep.subr.bf16.mxu1 %v6497_v21  ;;  %v6577_v20 = vld [vmem:[%s8743_s3 + $0x634] ss:$8 sps:$4 sm:$0xff]   ;;  %v6580_v21 = vld [vmem:[%s8743_s3 + $0x1e4] ss:$8 sps:$4 sm:$0xff]  }
 0x25f   : > { %v6649_v12 = vld [vmem:[%s8743_s3 + $0x6f4] ss:$8 sps:$4 sm:$0xff]  }
 0x261   : > { %1944 = vmatpush1.bf16.msra.mxu0 %v6492_v22  ;;  %2339 = vmatpush1.bf16.msra.mxu1 %v6495_v23  ;;  %v6583_v22 = vld [vmem:[%s8743_s3 + $0x644] ss:$8 sps:$4 sm:$0xff]   ;;  %v6578_v23 = vld [vmem:[%s8743_s3 + $0x1e0] ss:$8 sps:$4 sm:$0xff]  }
 0x262   : > { %1945 = vmatprep.subr.bf16.mxu0 %v6500_v24  ;;  %2340 = vmatprep.subr.bf16.mxu1 %v6503_v25  ;;  %v6581_v24 = vld [vmem:[%s8743_s3 + $0x640] ss:$8 sps:$4 sm:$0xff]   ;;  %v6586_v25 = vld [vmem:[%s8743_s3 + $0x1f4] ss:$8 sps:$4 sm:$0xff]  }
 0x265   : > { %1946 = vmatpush1.bf16.msra.mxu0 %v6498_v26  ;;  %2341 = vmatpush1.bf16.msra.mxu1 %v6501_v27  ;;  %v6589_v26 = vld [vmem:[%s8743_s3 + $0x654] ss:$8 sps:$4 sm:$0xff]   ;;  %v6584_v27 = vld [vmem:[%s8743_s3 + $0x1f0] ss:$8 sps:$4 sm:$0xff]  }
 0x266   : > { %1947 = vmatprep.subr.bf16.mxu0 %v6506_v28  ;;  %2342 = vmatprep.subr.bf16.mxu1 %v6509_v29  ;;  %v6587_v28 = vld [vmem:[%s8743_s3 + $0x650] ss:$8 sps:$4 sm:$0xff]   ;;  %v6592_v29 = vld [vmem:[%s8743_s3 + $0x204] ss:$8 sps:$4 sm:$0xff]  }
 0x269   : > { %1948 = vmatpush1.bf16.msra.mxu0 %v6504_v30  ;;  %2343 = vmatpush1.bf16.msra.mxu1 %v6507_v31  ;;  %v6595_v30 = vld [vmem:[%s8743_s3 + $0x664] ss:$8 sps:$4 sm:$0xff]   ;;  %v6590_v31 = vld [vmem:[%s8743_s3 + $0x200] ss:$8 sps:$4 sm:$0xff]  }
 0x26a   : > { %1949 = vmatprep.subr.bf16.mxu0 %v6512_v32  ;;  %2344 = vmatprep.subr.bf16.mxu1 %v6515_v33  ;;  %v6593_v32 = vld [vmem:[%s8743_s3 + $0x660] ss:$8 sps:$4 sm:$0xff]   ;;  %v6598_v33 = vld [vmem:[%s8743_s3 + $0x214] ss:$8 sps:$4 sm:$0xff]  }
 0x26d   : > { %1950 = vmatpush1.bf16.msra.mxu0 %v6510_v34  ;;  %2345 = vmatpush1.bf16.msra.mxu1 %v6513_v35  ;;  %v6601_v34 = vld [vmem:[%s8743_s3 + $0x674] ss:$8 sps:$4 sm:$0xff]   ;;  %v6596_v35 = vld [vmem:[%s8743_s3 + $0x210] ss:$8 sps:$4 sm:$0xff]  }
 0x26e   : > { %1951 = vmatprep.subr.bf16.mxu0 %v6518_v36  ;;  %2346 = vmatprep.subr.bf16.mxu1 %v6521_v37  ;;  %v6599_v36 = vld [vmem:[%s8743_s3 + $0x670] ss:$8 sps:$4 sm:$0xff]   ;;  %v6604_v37 = vld [vmem:[%s8743_s3 + $0x224] ss:$8 sps:$4 sm:$0xff]  }
 0x271   : > { %1952 = vmatpush1.bf16.msra.mxu0 %v6516_v38  ;;  %2347 = vmatpush1.bf16.msra.mxu1 %v6519_v39  ;;  %v6607_v38 = vld [vmem:[%s8743_s3 + $0x684] ss:$8 sps:$4 sm:$0xff]   ;;  %v6602_v39 = vld [vmem:[%s8743_s3 + $0x220] ss:$8 sps:$4 sm:$0xff]  }
 0x272   : > { %1953 = vmatprep.subr.bf16.mxu0 %v6524_v40  ;;  %2348 = vmatprep.subr.bf16.mxu1 %v6527_v41  ;;  %v6605_v40 = vld [vmem:[%s8743_s3 + $0x680] ss:$8 sps:$4 sm:$0xff]   ;;  %v6610_v41 = vld [vmem:[%s8743_s3 + $0x234] ss:$8 sps:$4 sm:$0xff]  }
 0x275   : > { %1954 = vmatpush1.bf16.msra.mxu0 %v6522_v42  ;;  %2349 = vmatpush1.bf16.msra.mxu1 %v6525_v43  ;;  %v6613_v42 = vld [vmem:[%s8743_s3 + $0x694] ss:$8 sps:$4 sm:$0xff]   ;;  %v6608_v43 = vld [vmem:[%s8743_s3 + $0x230] ss:$8 sps:$4 sm:$0xff]  }
 0x276   : > { %1955 = vmatprep.subr.bf16.mxu0 %v6530_v44  ;;  %2350 = vmatprep.subr.bf16.mxu1 %v6533_v45  ;;  %v6611_v44 = vld [vmem:[%s8743_s3 + $0x690] ss:$8 sps:$4 sm:$0xff]   ;;  %v6616_v45 = vld [vmem:[%s8743_s3 + $0x244] ss:$8 sps:$4 sm:$0xff]  }
 0x279   : > { %1956 = vmatpush1.bf16.msra.mxu0 %v6528_v46  ;;  %2351 = vmatpush1.bf16.msra.mxu1 %v6531_v47  ;;  %v6619_v46 = vld [vmem:[%s8743_s3 + $0x6a4] ss:$8 sps:$4 sm:$0xff]   ;;  %v6614_v47 = vld [vmem:[%s8743_s3 + $0x240] ss:$8 sps:$4 sm:$0xff]  }
 0x27a   : > { %1957 = vmatprep.subr.bf16.mxu0 %v6536_v48  ;;  %2352 = vmatprep.subr.bf16.mxu1 %v6539_v49  ;;  %v6617_v48 = vld [vmem:[%s8743_s3 + $0x6a0] ss:$8 sps:$4 sm:$0xff]   ;;  %v6622_v49 = vld [vmem:[%s8743_s3 + $0x254] ss:$8 sps:$4 sm:$0xff]  }
 0x27d   : > { %1958 = vmatpush1.bf16.msra.mxu0 %v6534_v50  ;;  %2353 = vmatpush1.bf16.msra.mxu1 %v6537_v51  ;;  %v6625_v50 = vld [vmem:[%s8743_s3 + $0x6b4] ss:$8 sps:$4 sm:$0xff]   ;;  %v6620_v51 = vld [vmem:[%s8743_s3 + $0x250] ss:$8 sps:$4 sm:$0xff]  }
 0x27e   : > { %1959 = vmatprep.subr.bf16.mxu0 %v6542_v52  ;;  %2354 = vmatprep.subr.bf16.mxu1 %v6545_v53  ;;  %v6623_v52 = vld [vmem:[%s8743_s3 + $0x6b0] ss:$8 sps:$4 sm:$0xff]   ;;  %v6628_v53 = vld [vmem:[%s8743_s3 + $0x264] ss:$8 sps:$4 sm:$0xff]  }
 0x281   : > { %1960 = vmatpush1.bf16.msra.mxu0 %v6540_v54  ;;  %2355 = vmatpush1.bf16.msra.mxu1 %v6543_v55  ;;  %v6631_v54 = vld [vmem:[%s8743_s3 + $0x6c4] ss:$8 sps:$4 sm:$0xff]   ;;  %v6626_v55 = vld [vmem:[%s8743_s3 + $0x260] ss:$8 sps:$4 sm:$0xff]  }
 0x282   : > { %1961 = vmatprep.subr.bf16.mxu0 %v6548_v56  ;;  %2356 = vmatprep.subr.bf16.mxu1 %v6551_v58  ;;  %v6629_v56 = vld [vmem:[%s8743_s3 + $0x6c0] ss:$8 sps:$4 sm:$0xff]   ;;  %v6634_v58 = vld [vmem:[%s8743_s3 + $0x274] ss:$8 sps:$4 sm:$0xff]  }
 0x285   : > { %1962 = vmatpush1.bf16.msra.mxu0 %v6546_v59  ;;  %2357 = vmatpush1.bf16.msra.mxu1 %v6549_v60  ;;  %v6637_v59 = vld [vmem:[%s8743_s3 + $0x6d4] ss:$8 sps:$4 sm:$0xff]   ;;  %v6632_v60 = vld [vmem:[%s8743_s3 + $0x270] ss:$8 sps:$4 sm:$0xff]  }
 0x286   : > { %1963 = vmatprep.subr.bf16.mxu0 %v6554_v63  ;;  %2358 = vmatprep.subr.bf16.mxu1 %v6557_v0  ;;  %v6635_v63 = vld [vmem:[%s8743_s3 + $0x6d0] ss:$8 sps:$4 sm:$0xff]   ;;  %v6640_v0 = vld [vmem:[%s8743_s3 + $0x284] ss:$8 sps:$4 sm:$0xff]  }
 0x289   : > { %1964 = vmatpush1.bf16.msra.mxu0 %v6552_v1  ;;  %2359 = vmatpush1.bf16.msra.mxu1 %v6555_v3  ;;  %v7869_v1 = vld [vmem:[#allocation2] sm:$0xee]  ;;  %v7871_v3 = vld [vmem:[#allocation2 + $0x10] sm:$0x11] }
 0x28a   : > { %1965 = vmatprep.subr.bf16.mxu0 %v6560_v4  ;;  %2360 = vmatprep.subr.bf16.mxu1 %v6563_v6  ;;  %v6643_v4 = vld [vmem:[%s8743_s3 + $0x6e4] ss:$8 sps:$4 sm:$0xff]   ;;  %v5654_v6 = vcombine.high %v7869_v1, %v7538_v62 }
 0x28d   : > { %1966 = vmatpush1.bf16.msra.mxu0 %v6558_v7  ;;  %2361 = vmatpush1.bf16.msra.mxu1 %v6561_v8  ;;  %v6638_v7 = vld [vmem:[%s8743_s3 + $0x280] ss:$8 sps:$4 sm:$0xff]   ;;  %v7883_v8 = vcombine.high %v7871_v3, %v7871_v3 }
 0x28e   : > { %2558 = vmatprep.subr.bf16.mxu0 %v6567_v9  ;;  %2774 = vmatprep.subr.bf16.mxu1 %v6570_v10  ;;  %v6641_v9 = vld [vmem:[%s8743_s3 + $0x6e0] ss:$8 sps:$4 sm:$0xff]   ;;  %v6646_v10 = vld [vmem:[%s8743_s3 + $0x294] ss:$8 sps:$4 sm:$0xff]  }
 0x290   : > { %1972 = vmatmul.mubr.bf16.vlgmr.msra.gmra.mrb[8].mxu0 %v5392_v15  ;;  %2367 = vmatmul.mubr.bf16.vlgmr.msra.gmra.mrb[28].mxu1 %v5392_v15  ;;  %v2883_v15 = vshll.u32 %v5654_v6, 16 }
 0x291   : > { %2559 = vmatpush1.bf16.msra.mxu0 %v6565_v14  ;;  %5567 = vmatprep.mubr.msk.bf16.mxu0 %vm1743_vm9, %v2413_v17  ;;  %v2880_v14 = vshrl.u32 %v5654_v6, 16  ;;  %v6710_v6 = vld [vmem:[%s8743_s3 + $0x790] ss:$8 sps:$4 sm:$0xff]  }
 0x292   : > { %2775 = vmatpush1.bf16.msra.mxu1 %v6568_v16  ;;  %5624 = vmatprep.mubr.msk.bf16.mxu1 %vm1743_vm9, %v2413_v17  ;;  %v6644_v16 = vld [vmem:[%s8743_s3 + $0x290] ss:$8 sps:$4 sm:$0xff]   ;;  %v2888_v17 = vshll.u32 %v7883_v8, 16 }
 0x293   : > { %2560 = vmatprep.subr.bf16.mxu0 %v6574_v19  ;;  %2776 = vmatprep.subr.bf16.mxu1 %v6577_v20  ;;  %v6647_v19 = vld [vmem:[%s8743_s3 + $0x6f0] ss:$8 sps:$4 sm:$0xff]   ;;  %v5537_v20 = vcombine.low %v7720_v11, %v7538_v62  ;;  %v6654_v11 = vld [vmem:[%s8743_s3 + $0x700] ss:$8 sps:$4 sm:$0xff]  }
 0x295   : > { %2561 = vmatpush1.bf16.msra.mxu0 %v6572_v61  ;;  %v6653_v61 = vld [vmem:[%s8743_s3 + $0x2a4] ss:$8 sps:$4 sm:$0xff]  }
 0x296   : > { %2777 = vmatpush1.bf16.msra.mxu1 %v6575_v13  ;;  %2562 = vmatprep.subr.bf16.mxu0 %v6580_v21  ;;  %v6656_v13 = vld [vmem:[%s8743_s3 + $0x704] ss:$8 sps:$4 sm:$0xff]   ;;  %v2882_v21 = vrot.slane %v2880_v14, 1  ;;  %v6721_v14 = vld [vmem:[%s8743_s3 + $0x354] ss:$8 sps:$4 sm:$0xff]  }
 0x297   : > { %2778 = vmatprep.subr.bf16.mxu1 %v6583_v22  ;;  %v2885_v22 = vrot.slane %v2883_v15, 2  ;;  %v6724_v15 = vld [vmem:[%s8743_s3 + $0x7b4] ss:$8 sps:$4 sm:$0xff]  }
 0x299   : > { %2563 = vmatpush1.bf16.msra.mxu0 %v6578_v23  ;;  %v6651_v23 = vld [vmem:[%s8743_s3 + $0x2a0] ss:$8 sps:$4 sm:$0xff]  }
 0x29a   : > { %2779 = vmatpush1.bf16.msra.mxu1 %v6581_v24  ;;  %2564 = vmatprep.subr.bf16.mxu0 %v6586_v25  ;;  %v2890_v24 = vrot.slane %v2888_v17, 2  ;;  %v2412_v25 = vrot.slane %v5537_v20, 1  ;;  %v5653_v17 = vcombine.low %v7869_v1, %v7538_v62  ;;  %v6727_v20 = vld [vmem:[%s8743_s3 + $0x364] ss:$8 sps:$4 sm:$0xff]   ;;  %v6725_v1 = vld [vmem:[%s8743_s3 + $0x360] ss:$8 sps:$4 sm:$0xff]  }
 0x29b   : > { %2780 = vmatprep.subr.bf16.mxu1 %v6589_v26  ;;  %v2886_v26 = vor.u32 %v2885_v22, %v2882_v21 }
 0x29c   : > { %v2867_v21 = vshrl.u32 %v5653_v17, 16  ;;  %v2870_v22 = vshll.u32 %v5653_v17, 16  ;;  %v6791_v17 = vld [vmem:[%s8743_s3 + $0x860] ss:$8 sps:$4 sm:$0xff]  }
 0x29d   : > { %2565 = vmatpush1.bf16.msra.mxu0 %v6584_v27  ;;  %v6661_v27 = vld [vmem:[%s8743_s3 + $0x2b4] ss:$8 sps:$4 sm:$0xff]  }
 0x29e   : > { %2781 = vmatpush1.bf16.msra.mxu1 %v6587_v28  ;;  %2566 = vmatprep.subr.bf16.mxu0 %v6592_v29  ;;  %v6664_v28 = vld [vmem:[%s8743_s3 + $0x714] ss:$8 sps:$4 sm:$0xff]   ;;  %v2891_v29 = vsel %vm829_vm3, %v2886_v26, %v2890_v24  ;;  %v2869_v26 = vrot.slane %v2867_v21, 1  ;;  %v6802_v21 = vld [vmem:[%s8743_s3 + $0x424] ss:$8 sps:$4 sm:$0xff]  }
 0x29f   : > { %2782 = vmatprep.subr.bf16.mxu1 %v6595_v30  ;;  %v6659_v30 = vld [vmem:[%s8743_s3 + $0x2b0] ss:$8 sps:$4 sm:$0xff]   ;;  %v6733_v24 = vld [vmem:[%s8743_s3 + $0x374] ss:$8 sps:$4 sm:$0xff]  }
 0x2a1   : > { %2567 = vmatpush1.bf16.msra.mxu0 %v6590_v31  ;;  %v6662_v31 = vld [vmem:[%s8743_s3 + $0x710] ss:$8 sps:$4 sm:$0xff]  }
 0x2a2   : > { %2783 = vmatpush1.bf16.msra.mxu1 %v6593_v32  ;;  %2568 = vmatprep.subr.bf16.mxu0 %v6598_v33  ;;  %v6667_v32 = vld [vmem:[%s8743_s3 + $0x2c4] ss:$8 sps:$4 sm:$0xff]  }
 0x2a3   : > { %2784 = vmatprep.subr.bf16.mxu1 %v6601_v34  ;;  %v6670_v33 = vld [vmem:[%s8743_s3 + $0x724] ss:$8 sps:$4 sm:$0xff]   ;;  %v6665_v34 = vld [vmem:[%s8743_s3 + $0x2c0] ss:$8 sps:$4 sm:$0xff]  }
 0x2a5   : > { %2569 = vmatpush1.bf16.msra.mxu0 %v6596_v35  ;;  %v6668_v35 = vld [vmem:[%s8743_s3 + $0x720] ss:$8 sps:$4 sm:$0xff]  }
 0x2a6   : > { %2785 = vmatpush1.bf16.msra.mxu1 %v6599_v36  ;;  %2570 = vmatprep.subr.bf16.mxu0 %v6604_v37  ;;  %v6673_v36 = vld [vmem:[%s8743_s3 + $0x2d4] ss:$8 sps:$4 sm:$0xff]  }
 0x2a7   : > { %2786 = vmatprep.subr.bf16.mxu1 %v6607_v38  ;;  %v6676_v37 = vld [vmem:[%s8743_s3 + $0x734] ss:$8 sps:$4 sm:$0xff]   ;;  %v6671_v38 = vld [vmem:[%s8743_s3 + $0x2d0] ss:$8 sps:$4 sm:$0xff]  }
 0x2a9   : > { %2571 = vmatpush1.bf16.msra.mxu0 %v6602_v39  ;;  %v6674_v39 = vld [vmem:[%s8743_s3 + $0x730] ss:$8 sps:$4 sm:$0xff]  }
 0x2aa   : > { %2787 = vmatpush1.bf16.msra.mxu1 %v6605_v40  ;;  %2572 = vmatprep.subr.bf16.mxu0 %v6610_v41  ;;  %v6679_v40 = vld [vmem:[%s8743_s3 + $0x2e4] ss:$8 sps:$4 sm:$0xff]  }
 0x2ab   : > { %2788 = vmatprep.subr.bf16.mxu1 %v6613_v42  ;;  %v6682_v41 = vld [vmem:[%s8743_s3 + $0x744] ss:$8 sps:$4 sm:$0xff]   ;;  %v6677_v42 = vld [vmem:[%s8743_s3 + $0x2e0] ss:$8 sps:$4 sm:$0xff]  }
 0x2ad   : > { %2573 = vmatpush1.bf16.msra.mxu0 %v6608_v43  ;;  %v6680_v43 = vld [vmem:[%s8743_s3 + $0x740] ss:$8 sps:$4 sm:$0xff]  }
 0x2ae   : > { %2789 = vmatpush1.bf16.msra.mxu1 %v6611_v44  ;;  %2574 = vmatprep.subr.bf16.mxu0 %v6616_v45  ;;  %v6685_v44 = vld [vmem:[%s8743_s3 + $0x2f4] ss:$8 sps:$4 sm:$0xff]  }
 0x2af   : > { %2790 = vmatprep.subr.bf16.mxu1 %v6619_v46  ;;  %v6688_v45 = vld [vmem:[%s8743_s3 + $0x754] ss:$8 sps:$4 sm:$0xff]   ;;  %v6683_v46 = vld [vmem:[%s8743_s3 + $0x2f0] ss:$8 sps:$4 sm:$0xff]  }
 0x2b1   : > { %2575 = vmatpush1.bf16.msra.mxu0 %v6614_v47  ;;  %v6686_v47 = vld [vmem:[%s8743_s3 + $0x750] ss:$8 sps:$4 sm:$0xff]  }
 0x2b2   : > { %2791 = vmatpush1.bf16.msra.mxu1 %v6617_v48  ;;  %2576 = vmatprep.subr.bf16.mxu0 %v6622_v49  ;;  %v6691_v48 = vld [vmem:[%s8743_s3 + $0x304] ss:$8 sps:$4 sm:$0xff]  }
 0x2b3   : > { %2792 = vmatprep.subr.bf16.mxu1 %v6625_v50  ;;  %v6694_v49 = vld [vmem:[%s8743_s3 + $0x764] ss:$8 sps:$4 sm:$0xff]   ;;  %v6689_v50 = vld [vmem:[%s8743_s3 + $0x300] ss:$8 sps:$4 sm:$0xff]  }
 0x2b5   : > { %2577 = vmatpush1.bf16.msra.mxu0 %v6620_v51  ;;  %v6692_v51 = vld [vmem:[%s8743_s3 + $0x760] ss:$8 sps:$4 sm:$0xff]  }
 0x2b6   : > { %2793 = vmatpush1.bf16.msra.mxu1 %v6623_v52  ;;  %2578 = vmatprep.subr.bf16.mxu0 %v6628_v53  ;;  %v6697_v52 = vld [vmem:[%s8743_s3 + $0x314] ss:$8 sps:$4 sm:$0xff]  }
 0x2b7   : > { %2794 = vmatprep.subr.bf16.mxu1 %v6631_v54  ;;  %v6700_v53 = vld [vmem:[%s8743_s3 + $0x774] ss:$8 sps:$4 sm:$0xff]   ;;  %v6695_v54 = vld [vmem:[%s8743_s3 + $0x310] ss:$8 sps:$4 sm:$0xff]  }
 0x2b9   : > { %2579 = vmatpush1.bf16.msra.mxu0 %v6626_v55  ;;  %v6698_v55 = vld [vmem:[%s8743_s3 + $0x770] ss:$8 sps:$4 sm:$0xff]  }
 0x2ba   : > { %2795 = vmatpush1.bf16.msra.mxu1 %v6629_v56  ;;  %2580 = vmatprep.subr.bf16.mxu0 %v6634_v58  ;;  %v6703_v56 = vld [vmem:[%s8743_s3 + $0x324] ss:$8 sps:$4 sm:$0xff]  }
 0x2bb   : > { %2796 = vmatprep.subr.bf16.mxu1 %v6637_v59  ;;  %v6706_v58 = vld [vmem:[%s8743_s3 + $0x784] ss:$8 sps:$4 sm:$0xff]   ;;  %v6701_v59 = vld [vmem:[%s8743_s3 + $0x320] ss:$8 sps:$4 sm:$0xff]  }
 0x2bd   : > { %2581 = vmatpush1.bf16.msra.mxu0 %v6632_v60  ;;  %v6704_v60 = vld [vmem:[%s8743_s3 + $0x780] ss:$8 sps:$4 sm:$0xff]  }
 0x2be   : > { %2797 = vmatpush1.bf16.msra.mxu1 %v6635_v63  ;;  %2582 = vmatprep.subr.bf16.mxu0 %v6640_v0  ;;  %v6709_v63 = vld [vmem:[%s8743_s3 + $0x334] ss:$8 sps:$4 sm:$0xff]  }
 0x2bf   : > { %2798 = vmatprep.subr.bf16.mxu1 %v6643_v4  ;;  %v6712_v0 = vld [vmem:[%s8743_s3 + $0x794] ss:$8 sps:$4 sm:$0xff]   ;;  %v6707_v4 = vld [vmem:[%s8743_s3 + $0x330] ss:$8 sps:$4 sm:$0xff]  }
 0x2c1   : > { %2583 = vmatpush1.bf16.msra.mxu0 %v6638_v7  ;;  %v6715_v7 = vld [vmem:[%s8743_s3 + $0x344] ss:$8 sps:$4 sm:$0xff]  }
 0x2c2   : > { %2799 = vmatpush1.bf16.msra.mxu1 %v6641_v9  ;;  %2584 = vmatprep.subr.bf16.mxu0 %v6646_v10  ;;  %v6718_v9 = vld [vmem:[%s8743_s3 + $0x7a4] ss:$8 sps:$4 sm:$0xff]   ;;  %v6713_v10 = vld [vmem:[%s8743_s3 + $0x340] ss:$8 sps:$4 sm:$0xff]  }
 0x2c3   : > { %2800 = vmatprep.subr.bf16.mxu1 %v6649_v12  ;;  %v6716_v12 = vld [vmem:[%s8743_s3 + $0x7a0] ss:$8 sps:$4 sm:$0xff]  }
 0x2c5   : > { %2585 = vmatpush1.bf16.msra.mxu0 %v6644_v16  ;;  %v6719_v16 = vld [vmem:[%s8743_s3 + $0x350] ss:$8 sps:$4 sm:$0xff]  }
 0x2c6   : > { %2801 = vmatpush1.bf16.msra.mxu1 %v6647_v19  ;;  %3036 = vmatprep.subr.bf16.mxu0 %v6653_v61  ;;  %v6722_v19 = vld [vmem:[%s8743_s3 + $0x7b0] ss:$8 sps:$4 sm:$0xff]   ;;  %v6730_v61 = vld [vmem:[%s8743_s3 + $0x7c4] ss:$8 sps:$4 sm:$0xff]  }
 0x2c7   : > { %3252 = vmatprep.subr.bf16.mxu1 %v6656_v13  ;;  %v8060_v13 = vcombine.low %v7871_v3, %v7871_v3  ;;  %v6736_v3 = vld [vmem:[%s8743_s3 + $0x7d4] ss:$8 sps:$4 sm:$0xff]  }
 0x2c8   : > { %2591 = vmatmul.mubr.bf16.vlgmr.msra.gmra.mrb[8].mxu0 %v2412_v25 }
 0x2c9   : > { %2807 = vmatmul.mubr.bf16.vlgmr.msra.gmra.mrb[28].mxu1 %v2412_v25  ;;  %3037 = vmatpush1.bf16.msra.mxu0 %v6651_v23  ;;  %v6728_v23 = vld [vmem:[%s8743_s3 + $0x7c0] ss:$8 sps:$4 sm:$0xff]   ;;  %v2875_v25 = vshll.u32 %v8060_v13, 16 }
 0x2ca   : > { %5685 = vmatprep.mubr.msk.bf16.mxu0 %vm1743_vm9, %v2891_v29  ;;  %3253 = vmatpush1.bf16.msra.mxu1 %v6654_v11  ;;  %v6731_v11 = vld [vmem:[%s8743_s3 + $0x370] ss:$8 sps:$4 sm:$0xff]  }
 0x2cb   : > { %5742 = vmatprep.mubr.msk.bf16.mxu1 %vm1743_vm9, %v2891_v29  ;;  %3038 = vmatprep.subr.bf16.mxu0 %v6661_v27  ;;  %v2872_v27 = vrot.slane %v2870_v22, 2  ;;  %v6741_v29 = vld [vmem:[%s8743_s3 + $0x384] ss:$8 sps:$4 sm:$0xff]  }
 0x2cc   : > { %3254 = vmatprep.subr.bf16.mxu1 %v6664_v28  ;;  %v6734_v28 = vld [vmem:[%s8743_s3 + $0x7d0] ss:$8 sps:$4 sm:$0xff]   ;;  %v6805_v22 = vld [vmem:[%s8743_s3 + $0x884] ss:$8 sps:$4 sm:$0xff]  }
 0x2cd   : > { %3039 = vmatpush1.bf16.msra.mxu0 %v6659_v30  ;;  %v8084_v30 = vld [vmem:[#allocation2] sm:$0xcc] }
 0x2ce   : > { %3255 = vmatpush1.bf16.msra.mxu1 %v6662_v31  ;;  %3040 = vmatprep.subr.bf16.mxu0 %v6667_v32  ;;  %v2877_v31 = vrot.slane %v2875_v25, 2  ;;  %v6744_v32 = vld [vmem:[%s8743_s3 + $0x7e4] ss:$8 sps:$4 sm:$0xff]   ;;  %v6811_v25 = vld [vmem:[%s8743_s3 + $0x894] ss:$8 sps:$4 sm:$0xff]  }
 0x2cf   : > { %3256 = vmatprep.subr.bf16.mxu1 %v6670_v33  ;;  %v5772_v33 = vcombine.high %v8084_v30, %v7538_v62 }
 0x2d1   : > { %3041 = vmatpush1.bf16.msra.mxu0 %v6665_v34  ;;  %v2873_v34 = vor.u32 %v2872_v27, %v2869_v26  ;;  %v6809_v26 = vld [vmem:[%s8743_s3 + $0x890] ss:$8 sps:$4 sm:$0xff]   ;;  %v6814_v27 = vld [vmem:[%s8743_s3 + $0x444] ss:$8 sps:$4 sm:$0xff]  }
 0x2d2   : > { %3257 = vmatpush1.bf16.msra.mxu1 %v6668_v35  ;;  %3042 = vmatprep.subr.bf16.mxu0 %v6673_v36  ;;  %v6739_v35 = vld [vmem:[%s8743_s3 + $0x380] ss:$8 sps:$4 sm:$0xff]   ;;  %v3338_v36 = vrot.slane %v7883_v8, 2 }
 0x2d3   : > { %3258 = vmatprep.subr.bf16.mxu1 %v6676_v37  ;;  %v6742_v37 = vld [vmem:[%s8743_s3 + $0x7e0] ss:$8 sps:$4 sm:$0xff]  }
 0x2d5   : > { %3043 = vmatpush1.bf16.msra.mxu0 %v6671_v38  ;;  %v2878_v38 = vsel %vm829_vm3, %v2873_v34, %v2877_v31  ;;  %v6815_v31 = vld [vmem:[%s8743_s3 + $0x8a0] ss:$8 sps:$4 sm:$0xff]   ;;  %v6818_v34 = vld [vmem:[%s8743_s3 + $0x450] ss:$8 sps:$4 sm:$0xff]   ;;  %vm6178_vm3 = vmpackc.low %vm1029_vm4, %vm6997_vm6 }
 0x2d6   : > { %3259 = vmatpush1.bf16.msra.mxu1 %v6674_v39  ;;  %3044 = vmatprep.subr.bf16.mxu0 %v6679_v40  ;;  %v3337_v39 = vrot.slane %v5772_v33, 2  ;;  %v6748_v40 = vld [vmem:[%s8743_s3 + $0x394] ss:$8 sps:$4 sm:$0xff]   ;;  %vm3945_vm6 = vmand %vm1483_vm15, %vm306_vm1 }
 0x2d7   : > { %3260 = vmatprep.subr.bf16.mxu1 %v6682_v41  ;;  %v6751_v41 = vld [vmem:[%s8743_s3 + $0x7f4] ss:$8 sps:$4 sm:$0xff]  }
 0x2d8   : > { %v3339_v8 = vsel %vm1029_vm4, %v3337_v39, %v3338_v36  ;;  %v6823_v33 = vld [vmem:[%s8743_s3 + $0x8b4] ss:$8 sps:$4 sm:$0xff]   ;;  %v6821_v36 = vld [vmem:[%s8743_s3 + $0x8b0] ss:$8 sps:$4 sm:$0xff]  }
 0x2d9   : > { %3045 = vmatpush1.bf16.msra.mxu0 %v6677_v42  ;;  %v6746_v42 = vld [vmem:[%s8743_s3 + $0x390] ss:$8 sps:$4 sm:$0xff]  }
 0x2da   : > { %3261 = vmatpush1.bf16.msra.mxu1 %v6680_v43  ;;  %3046 = vmatprep.subr.bf16.mxu0 %v6685_v44  ;;  %v6749_v43 = vld [vmem:[%s8743_s3 + $0x7f0] ss:$8 sps:$4 sm:$0xff]   ;;  %v6754_v44 = vld [vmem:[%s8743_s3 + $0x3a4] ss:$8 sps:$4 sm:$0xff]  }
 0x2db   : > { %3262 = vmatprep.subr.bf16.mxu1 %v6688_v45  ;;  %v6757_v45 = vld [vmem:[%s8743_s3 + $0x804] ss:$8 sps:$4 sm:$0xff]  }
 0x2dd   : > { %3047 = vmatpush1.bf16.msra.mxu0 %v6683_v46  ;;  %v6752_v46 = vld [vmem:[%s8743_s3 + $0x3a0] ss:$8 sps:$4 sm:$0xff]  }
 0x2de   : > { %3263 = vmatpush1.bf16.msra.mxu1 %v6686_v47  ;;  %3048 = vmatprep.subr.bf16.mxu0 %v6691_v48  ;;  %v6755_v47 = vld [vmem:[%s8743_s3 + $0x800] ss:$8 sps:$4 sm:$0xff]   ;;  %v6760_v48 = vld [vmem:[%s8743_s3 + $0x3b4] ss:$8 sps:$4 sm:$0xff]  }
 0x2df   : > { %3264 = vmatprep.subr.bf16.mxu1 %v6694_v49  ;;  %v6763_v49 = vld [vmem:[%s8743_s3 + $0x814] ss:$8 sps:$4 sm:$0xff]  }
 0x2e1   : > { %3049 = vmatpush1.bf16.msra.mxu0 %v6689_v50  ;;  %v6758_v50 = vld [vmem:[%s8743_s3 + $0x3b0] ss:$8 sps:$4 sm:$0xff]  }
 0x2e2   : > { %3265 = vmatpush1.bf16.msra.mxu1 %v6692_v51  ;;  %3050 = vmatprep.subr.bf16.mxu0 %v6697_v52  ;;  %v6761_v51 = vld [vmem:[%s8743_s3 + $0x810] ss:$8 sps:$4 sm:$0xff]   ;;  %v6766_v52 = vld [vmem:[%s8743_s3 + $0x3c4] ss:$8 sps:$4 sm:$0xff]  }
 0x2e3   : > { %3266 = vmatprep.subr.bf16.mxu1 %v6700_v53  ;;  %v6769_v53 = vld [vmem:[%s8743_s3 + $0x824] ss:$8 sps:$4 sm:$0xff]  }
 0x2e5   : > { %3051 = vmatpush1.bf16.msra.mxu0 %v6695_v54  ;;  %v6764_v54 = vld [vmem:[%s8743_s3 + $0x3c0] ss:$8 sps:$4 sm:$0xff]  }
 0x2e6   : > { %3267 = vmatpush1.bf16.msra.mxu1 %v6698_v55  ;;  %3052 = vmatprep.subr.bf16.mxu0 %v6703_v56  ;;  %v6767_v55 = vld [vmem:[%s8743_s3 + $0x820] ss:$8 sps:$4 sm:$0xff]   ;;  %v6772_v56 = vld [vmem:[%s8743_s3 + $0x3d4] ss:$8 sps:$4 sm:$0xff]  }
 0x2e7   : > { %3268 = vmatprep.subr.bf16.mxu1 %v6706_v58  ;;  %v6775_v58 = vld [vmem:[%s8743_s3 + $0x834] ss:$8 sps:$4 sm:$0xff]  }
 0x2e9   : > { %3053 = vmatpush1.bf16.msra.mxu0 %v6701_v59  ;;  %v6770_v59 = vld [vmem:[%s8743_s3 + $0x3d0] ss:$8 sps:$4 sm:$0xff]  }
 0x2ea   : > { %3269 = vmatpush1.bf16.msra.mxu1 %v6704_v60  ;;  %3054 = vmatprep.subr.bf16.mxu0 %v6709_v63  ;;  %v6773_v60 = vld [vmem:[%s8743_s3 + $0x830] ss:$8 sps:$4 sm:$0xff]   ;;  %v6778_v63 = vld [vmem:[%s8743_s3 + $0x3e4] ss:$8 sps:$4 sm:$0xff]  }
 0x2eb   : > { %3270 = vmatprep.subr.bf16.mxu1 %v6712_v0  ;;  %v6781_v0 = vld [vmem:[%s8743_s3 + $0x844] ss:$8 sps:$4 sm:$0xff]  }
 0x2ed   : > { %3055 = vmatpush1.bf16.msra.mxu0 %v6707_v4  ;;  %v6776_v4 = vld [vmem:[%s8743_s3 + $0x3e0] ss:$8 sps:$4 sm:$0xff]  }
 0x2ee   : > { %3271 = vmatpush1.bf16.msra.mxu1 %v6710_v6  ;;  %3056 = vmatprep.subr.bf16.mxu0 %v6715_v7  ;;  %v6779_v6 = vld [vmem:[%s8743_s3 + $0x840] ss:$8 sps:$4 sm:$0xff]   ;;  %v6784_v7 = vld [vmem:[%s8743_s3 + $0x3f4] ss:$8 sps:$4 sm:$0xff]  }
 0x2ef   : > { %3272 = vmatprep.subr.bf16.mxu1 %v6718_v9  ;;  %v6787_v9 = vld [vmem:[%s8743_s3 + $0x854] ss:$8 sps:$4 sm:$0xff]  }
 0x2f1   : > { %3057 = vmatpush1.bf16.msra.mxu0 %v6713_v10  ;;  %v6782_v10 = vld [vmem:[%s8743_s3 + $0x3f0] ss:$8 sps:$4 sm:$0xff]  }
 0x2f2   : > { %3273 = vmatpush1.bf16.msra.mxu1 %v6716_v12  ;;  %3058 = vmatprep.subr.bf16.mxu0 %v6721_v14  ;;  %v6785_v12 = vld [vmem:[%s8743_s3 + $0x850] ss:$8 sps:$4 sm:$0xff]   ;;  %v6790_v14 = vld [vmem:[%s8743_s3 + $0x404] ss:$8 sps:$4 sm:$0xff]  }
 0x2f3   : > { %3274 = vmatprep.subr.bf16.mxu1 %v6724_v15  ;;  %v6793_v15 = vld [vmem:[%s8743_s3 + $0x864] ss:$8 sps:$4 sm:$0xff]  }
 0x2f5   : > { %3059 = vmatpush1.bf16.msra.mxu0 %v6719_v16  ;;  %v6788_v16 = vld [vmem:[%s8743_s3 + $0x400] ss:$8 sps:$4 sm:$0xff]  }
 0x2f6   : > { %3275 = vmatpush1.bf16.msra.mxu1 %v6722_v19  ;;  %3060 = vmatprep.subr.bf16.mxu0 %v6727_v20  ;;  %v6796_v19 = vld [vmem:[%s8743_s3 + $0x414] ss:$8 sps:$4 sm:$0xff]  }
 0x2f7   : > { %3276 = vmatprep.subr.bf16.mxu1 %v6730_v61  ;;  %v6799_v20 = vld [vmem:[%s8743_s3 + $0x874] ss:$8 sps:$4 sm:$0xff]   ;;  %v6794_v61 = vld [vmem:[%s8743_s3 + $0x410] ss:$8 sps:$4 sm:$0xff]  }
 0x2f9   : > { %3061 = vmatpush1.bf16.msra.mxu0 %v6725_v1  ;;  %v6797_v1 = vld [vmem:[%s8743_s3 + $0x870] ss:$8 sps:$4 sm:$0xff]  }
 0x2fa   : > { %3277 = vmatpush1.bf16.msra.mxu1 %v6728_v23  ;;  %3062 = vmatprep.subr.bf16.mxu0 %v6733_v24  ;;  %v6800_v23 = vld [vmem:[%s8743_s3 + $0x420] ss:$8 sps:$4 sm:$0xff]  }
 0x2fb   : > { %3278 = vmatprep.subr.bf16.mxu1 %v6736_v3  ;;  %v6803_v24 = vld [vmem:[%s8743_s3 + $0x880] ss:$8 sps:$4 sm:$0xff]   ;;  %v6808_v3 = vld [vmem:[%s8743_s3 + $0x434] ss:$8 sps:$4 sm:$0xff]  }
 0x2fd   : > { %3063 = vmatpush1.bf16.msra.mxu0 %v6731_v11  ;;  %v6806_v11 = vld [vmem:[%s8743_s3 + $0x430] ss:$8 sps:$4 sm:$0xff]  }
 0x2fe   : > { %3279 = vmatpush1.bf16.msra.mxu1 %v6734_v28  ;;  %3484 = vmatprep.subr.bf16.mxu0 %v6741_v29  ;;  %v6817_v28 = vld [vmem:[%s8743_s3 + $0x8a4] ss:$8 sps:$4 sm:$0xff]   ;;  %v6812_v29 = vld [vmem:[%s8743_s3 + $0x440] ss:$8 sps:$4 sm:$0xff]  }
 0x2ff   : > { %3700 = vmatprep.subr.bf16.mxu1 %v6744_v32  ;;  %v6820_v32 = vld [vmem:[%s8743_s3 + $0x454] ss:$8 sps:$4 sm:$0xff]  }
 0x300   : > { %3069 = vmatmul.mubr.bf16.vlgmr.msra.gmra.mrb[8].mxu0 %v2878_v38 }
 0x301   : > { %3285 = vmatmul.mubr.bf16.vlgmr.msra.gmra.mrb[28].mxu1 %v2878_v38  ;;  %3485 = vmatpush1.bf16.msra.mxu0 %v6739_v35  ;;  %v5771_v35 = vcombine.low %v8084_v30, %v7538_v62  ;;  %v3751_v62 = vmul.u32 2, %v7314_v57 }
 0x302   : > { %5801 = vmatprep.mubr.msk.bf16.mxu0 %vm1743_vm9, %v3339_v8  ;;  %3701 = vmatpush1.bf16.msra.mxu1 %v6742_v37  ;;  %v3335_v37 = vrot.slane %v8060_v13, 2 }
 0x303   : > { %5858 = vmatprep.mubr.msk.bf16.mxu1 %vm1743_vm9, %v3339_v8  ;;  %3486 = vmatprep.subr.bf16.mxu0 %v6748_v40  ;;  %v3334_v38 = vrot.slane %v5771_v35, 2  ;;  %vm3752_vm10 = vcmp.eq.s32.totalorder %v7318_v5, %v3751_v62 }
 0x304   : > { %3702 = vmatprep.subr.bf16.mxu1 %v6751_v41 }
 0x305   : > { %3487 = vmatpush1.bf16.msra.mxu0 %v6746_v42  ;;  %v3336_v39 = vsel %vm1029_vm4, %v3334_v38, %v3335_v37  ;;  %vm3942_vm4 = vsmask.f32 3328 }
 0x306   : > { %3703 = vmatpush1.bf16.msra.mxu1 %v6749_v43  ;;  %3488 = vmatprep.subr.bf16.mxu0 %v6754_v44  ;;  %vm3943_vm13 = vmand %vm1257_vm5, %vm3942_vm4 }
 0x307   : > { %3704 = vmatprep.subr.bf16.mxu1 %v6757_v45  ;;  %vm3946_vm14 = vmor %vm3945_vm6, %vm3943_vm13 }
 0x309   : > { %3489 = vmatpush1.bf16.msra.mxu0 %v6752_v46  ;;  %v3755_v46 = vadd.s32 1, %v3751_v62 }
 0x30a   : > { %3705 = vmatpush1.bf16.msra.mxu1 %v6755_v47  ;;  %3490 = vmatprep.subr.bf16.mxu0 %v6760_v48 }
 0x30b   : > { %3706 = vmatprep.subr.bf16.mxu1 %v6763_v49  ;;  %vm3756_vm11 = vcmp.eq.s32.totalorder %v7318_v5, %v3755_v46  ;;  %v6828_v5 = vld [vmem:[%s8745_s5 + $0x78] sm:$0xff]  }
 0x30d   : > { %3491 = vmatpush1.bf16.msra.mxu0 %v6758_v50 }
 0x30e   : > { %3707 = vmatpush1.bf16.msra.mxu1 %v6761_v51  ;;  %3492 = vmatprep.subr.bf16.mxu0 %v6766_v52  ;;  %v5859_v52 = vsel %vm3752_vm10, 1.0, %v6996_v18 }
 0x30f   : > { %3708 = vmatprep.subr.bf16.mxu1 %v6769_v53  ;;  %v5860_v53 = vsel %vm3756_vm11, 1.0, %v6996_v18 }
 0x311   : > { %3493 = vmatpush1.bf16.msra.mxu0 %v6764_v54  ;;  %v6825_v54 = vld [vmem:[%s8745_s5] sm:$0xff]  }
 0x312   : > { %3709 = vmatpush1.bf16.msra.mxu1 %v6767_v55  ;;  %3494 = vmatprep.subr.bf16.mxu0 %v6772_v56  ;;  %v6826_v55 = vld [vmem:[%s8745_s5 + $0x70] sm:$0xff]  }
 0x313   : > { %3710 = vmatprep.subr.bf16.mxu1 %v6775_v58  ;;  %v6829_v56 = vld [vmem:[%s8745_s5 + $0x10] sm:$0xff]   ;;  %v6830_v58 = vld [vmem:[%s8745_s5 + $0x80] sm:$0xff]  }
 0x315   : > { %3495 = vmatpush1.bf16.msra.mxu0 %v6770_v59  ;;  %v6831_v59 = vld [vmem:[%s8745_s5 + $0x18] sm:$0xff]  }
 0x316   : > { %3711 = vmatpush1.bf16.msra.mxu1 %v6773_v60  ;;  %3496 = vmatprep.subr.bf16.mxu0 %v6778_v63  ;;  %v6832_v60 = vld [vmem:[%s8745_s5 + $0x88] sm:$0xff]   ;;  %v6833_v63 = vld [vmem:[%s8745_s5 + $0x20] sm:$0xff]  }
 0x317   : > { %3712 = vmatprep.subr.bf16.mxu1 %v6781_v0  ;;  %v6834_v0 = vld [vmem:[%s8745_s5 + $0x90] sm:$0xff]  }
 0x319   : > { %3497 = vmatpush1.bf16.msra.mxu0 %v6776_v4  ;;  %v6835_v4 = vld [vmem:[%s8745_s5 + $0x28] sm:$0xff]  }
 0x31a   : > { %3713 = vmatpush1.bf16.msra.mxu1 %v6779_v6  ;;  %3498 = vmatprep.subr.bf16.mxu0 %v6784_v7  ;;  %v6836_v6 = vld [vmem:[%s8745_s5 + $0x98] sm:$0xff]   ;;  %v6837_v7 = vld [vmem:[%s8745_s5 + $0x30] sm:$0xff]  }
 0x31b   : > { %3714 = vmatprep.subr.bf16.mxu1 %v6787_v9  ;;  %v6838_v9 = vld [vmem:[%s8745_s5 + $0xa0] sm:$0xff]  }
 0x31d   : > { %3499 = vmatpush1.bf16.msra.mxu0 %v6782_v10  ;;  %v6839_v10 = vld [vmem:[%s8745_s5 + $0x38] sm:$0xff]  }
 0x31e   : > { %3715 = vmatpush1.bf16.msra.mxu1 %v6785_v12  ;;  %3500 = vmatprep.subr.bf16.mxu0 %v6790_v14  ;;  %v6840_v12 = vld [vmem:[%s8745_s5 + $0xa8] sm:$0xff]   ;;  %v6841_v14 = vld [vmem:[%s8745_s5 + $0x40] sm:$0xff]  }
 0x31f   : > { %3716 = vmatprep.subr.bf16.mxu1 %v6793_v15  ;;  %v6842_v15 = vld [vmem:[%s8745_s5 + $0xb0] sm:$0xff]  }
 0x321   : > { %3501 = vmatpush1.bf16.msra.mxu0 %v6788_v16  ;;  %v6843_v16 = vld [vmem:[%s8745_s5 + $0x48] sm:$0xff]  }
 0x322   : > { %3717 = vmatpush1.bf16.msra.mxu1 %v6791_v17  ;;  %3502 = vmatprep.subr.bf16.mxu0 %v6796_v19  ;;  %v6844_v17 = vld [vmem:[%s8745_s5 + $0xb8] sm:$0xff]   ;;  %v6845_v19 = vld [vmem:[%s8745_s5 + $0x50] sm:$0xff]  }
 0x323   : > { %3718 = vmatprep.subr.bf16.mxu1 %v6799_v20  ;;  %v6846_v20 = vld [vmem:[%s8745_s5 + $0xc0] sm:$0xff]  }
 0x325   : > { %3503 = vmatpush1.bf16.msra.mxu0 %v6794_v61  ;;  %v6847_v61 = vld [vmem:[%s8745_s5 + $0x58] sm:$0xff]  }
 0x326   : > { %3719 = vmatpush1.bf16.msra.mxu1 %v6797_v1  ;;  %3504 = vmatprep.subr.bf16.mxu0 %v6802_v21  ;;  %v6848_v1 = vld [vmem:[%s8745_s5 + $0xc8] sm:$0xff]   ;;  %v6849_v21 = vld [vmem:[%s8745_s5 + $0x60] sm:$0xff]  }
 0x327   : > { %3720 = vmatprep.subr.bf16.mxu1 %v6805_v22  ;;  %v6850_v22 = vld [vmem:[%s8745_s5 + $0xd0] sm:$0xff]  }
 0x329   : > { %3505 = vmatpush1.bf16.msra.mxu0 %v6800_v23  ;;  %v6851_v23 = vld [vmem:[%s8745_s5 + $0x68] sm:$0xff]  }
 0x32a   : > { %3721 = vmatpush1.bf16.msra.mxu1 %v6803_v24  ;;  %3506 = vmatprep.subr.bf16.mxu0 %v6808_v3  ;;  %v6852_v24 = vld [vmem:[%s8745_s5 + $0xd8] sm:$0xff]   ;;  %v3921_v3 = vsub.s32 0, %v7314_v57 }
 0x32b   : > { %3722 = vmatprep.subr.bf16.mxu1 %v6811_v25  ;;  %v3917_v25 = vld [vmem:[%s8744_s4] sm:$0x3] }
 0x32d   : > { %3507 = vmatpush1.bf16.msra.mxu0 %v6806_v11  ;;  %v3925_v11 = vsub.s32 1, %v7314_v57  ;;  %v3947_v57 = vld [vmem:[#allocation3] sm:$0xff] }
 0x32e   : > { %3723 = vmatpush1.bf16.msra.mxu1 %v6809_v26  ;;  %3508 = vmatprep.subr.bf16.mxu0 %v6814_v27  ;;  %v3922_v26 = vrot.slane %v3917_v25, %v3921_v3 }
 0x32f   : > { %3724 = vmatprep.subr.bf16.mxu1 %v6817_v28 }
 0x331   : > { %3509 = vmatpush1.bf16.msra.mxu0 %v6812_v29  ;;  %v3926_v29 = vrot.slane %v3917_v25, %v3925_v11  ;;  %v6887_v25 = vld [vmem:[%s8745_s5 + $0x1c0] sm:$0xff]  }
 0x332   : > { %3725 = vmatpush1.bf16.msra.mxu1 %v6815_v31  ;;  %3510 = vmatprep.subr.bf16.mxu0 %v6820_v32 }
 0x333   : > { %3726 = vmatprep.subr.bf16.mxu1 %v6823_v33 }
 0x335   : > { %3511 = vmatpush1.bf16.msra.mxu0 %v6818_v34 }
 0x336   : > { %3727 = vmatpush1.bf16.msra.mxu1 %v6821_v36 }
 0x338   : > { %3517 = vmatmul.mubr.bf16.vlgmr.msra.gmra.mrb[8].mxu0 %v3336_v39 }
 0x339   : > { %3733 = vmatmul.mubr.bf16.vlgmr.msra.gmra.mrb[28].mxu1 %v3336_v39  ;;  %3834 = vmatprep.mubr.f32.mxu0 %v6996_v18 }
 0x33a   : > { %3908 = vmatprep.mubr.f32.mxu1 %v6996_v18  ;;  %v6827_v18 = vld [vmem:[%s8745_s5 + $0x8] sm:$0xff]  }
 0x40b   : > { %v3518_v30 = vpop.f32.mrb[8].mxu0 }
 0x40c   : > { %v3734_v40 = vpop.f32.mrb[28].mxu1  ;;  %v3520_v41 = vpop.f32.mrb[9].mxu0 }
 0x40d   : > { %v3747_v8 = vmax.f32 %v3518_v30, %v3734_v40  ;;  %v3736_v42 = vpop.f32.mrb[29].mxu1  ;;  %v3522_v43 = vpop.f32.mrb[10].mxu0 }
 0x40e   : > { %v3748_v13 = vmax.f32 %v3520_v41, %v3736_v42  ;;  %v3738_v44 = vpop.f32.mrb[30].mxu1  ;;  %v3524_v45 = vpop.f32.mrb[11].mxu0  ;;  %v6855_v42 = vld [vmem:[%s8745_s5 + $0x150] sm:$0xff]  }
 0x40f   : > { %v3749_v47 = vmax.f32 %v3522_v43, %v3738_v44  ;;  %v3740_v48 = vpop.f32.mrb[31].mxu1 }
 0x410   : > { %v3750_v49 = vmax.f32 %v3524_v45, %v3740_v48  ;;  %v6856_v45 = vld [vmem:[%s8745_s5 + $0xe0] sm:$0xff]  }
 0x411   : > { %v6180_v50 = vpack.c.bf16 %v3749_v47, %v3747_v8  ;;  %v6857_v47 = vld [vmem:[%s8745_s5 + $0x158] sm:$0xff]  }
 0x412   : > { %v6177_v51 = vpack.c.bf16 %v3750_v49, %v3748_v13 }
 0x414   : > { %6179 = vmatprep.subr.msk.bf16.mxu0 %vm6178_vm3, %v6177_v51  ;;  %6185 = vmatprep.subr.msk.bf16.mxu1 %vm6178_vm3, %v6177_v51  ;;  %v6860_v51 = vld [vmem:[%s8745_s5 + $0x160] sm:$0xff]  }
 0x415   : > { %6182 = vmatpush1.bf16.msk.msra.mxu0 %vm6178_vm3, %v6180_v50  ;;  %6188 = vmatpush1.bf16.msk.msra.mxu1 %vm6178_vm3, %v6180_v50  ;;  %v6859_v50 = vld [vmem:[%s8745_s5 + $0xe8] sm:$0xff]  }
 0x416   : > { %4234 = vmatprep.subr.bf16.mxu1 %v6995_v2  ;;  %4107 = vmatprep.subr.bf16.mxu0 %v6995_v2 }
 0x418   : > { %5863 = vmatmul.mubr.msk.f32.vlgmr.msra.gmra.mrb[12].mxu0 %vm3759_vm12, %v5859_v52  ;;  %5866 = vmatmul.mubr.msk.f32.vlgmr.msra.gmra.mrb[32].mxu1 %vm3759_vm12, %v5860_v53  ;;  %v6861_v52 = vld [vmem:[%s8745_s5 + $0xf0] sm:$0xff]   ;;  %v6862_v53 = vld [vmem:[%s8745_s5 + $0x168] sm:$0xff]  }
 0x419   : > { %4235 = vmatpush1.bf16.msra.mxu1 %v6825_v54  ;;  %4108 = vmatpush1.bf16.msra.mxu0 %v6826_v55  ;;  %v6863_v54 = vld [vmem:[%s8745_s5 + $0xf8] sm:$0xff]   ;;  %v6864_v55 = vld [vmem:[%s8745_s5 + $0x170] sm:$0xff]  }
 0x41a   : > { %4236 = vmatprep.subr.bf16.mxu1 %v6995_v2  ;;  %4109 = vmatprep.subr.bf16.mxu0 %v6995_v2 }
 0x41d   : > { %4237 = vmatpush1.bf16.msra.mxu1 %v6827_v18  ;;  %4110 = vmatpush1.bf16.msra.mxu0 %v6828_v5  ;;  %v6865_v18 = vld [vmem:[%s8745_s5 + $0x100] sm:$0xff]   ;;  %v6866_v5 = vld [vmem:[%s8745_s5 + $0x178] sm:$0xff]  }
 0x41e   : > { %4238 = vmatprep.subr.bf16.mxu1 %v6995_v2  ;;  %4111 = vmatprep.subr.bf16.mxu0 %v6995_v2 }
 0x421   : > { %4239 = vmatpush1.bf16.msra.mxu1 %v6829_v56  ;;  %4112 = vmatpush1.bf16.msra.mxu0 %v6830_v58  ;;  %v6867_v56 = vld [vmem:[%s8745_s5 + $0x108] sm:$0xff]   ;;  %v6868_v58 = vld [vmem:[%s8745_s5 + $0x180] sm:$0xff]  }
 0x422   : > { %4240 = vmatprep.subr.bf16.mxu1 %v6995_v2  ;;  %4113 = vmatprep.subr.bf16.mxu0 %v6995_v2 }
 0x425   : > { %4241 = vmatpush1.bf16.msra.mxu1 %v6831_v59  ;;  %4114 = vmatpush1.bf16.msra.mxu0 %v6832_v60  ;;  %v6869_v59 = vld [vmem:[%s8745_s5 + $0x110] sm:$0xff]   ;;  %v6870_v60 = vld [vmem:[%s8745_s5 + $0x188] sm:$0xff]  }
 0x426   : > { %4242 = vmatprep.subr.bf16.mxu1 %v6995_v2  ;;  %4115 = vmatprep.subr.bf16.mxu0 %v6995_v2 }
 0x429   : > { %4243 = vmatpush1.bf16.msra.mxu1 %v6833_v63  ;;  %4116 = vmatpush1.bf16.msra.mxu0 %v6834_v0  ;;  %v6871_v63 = vld [vmem:[%s8745_s5 + $0x118] sm:$0xff]   ;;  %v6872_v0 = vld [vmem:[%s8745_s5 + $0x190] sm:$0xff]  }
 0x42a   : > { %4244 = vmatprep.subr.bf16.mxu1 %v6995_v2  ;;  %4117 = vmatprep.subr.bf16.mxu0 %v6995_v2 }
 0x42d   : > { %4245 = vmatpush1.bf16.msra.mxu1 %v6835_v4  ;;  %4118 = vmatpush1.bf16.msra.mxu0 %v6836_v6  ;;  %v6873_v4 = vld [vmem:[%s8745_s5 + $0x120] sm:$0xff]   ;;  %v6874_v6 = vld [vmem:[%s8745_s5 + $0x198] sm:$0xff]  }
 0x42e   : > { %4246 = vmatprep.subr.bf16.mxu1 %v6995_v2  ;;  %4119 = vmatprep.subr.bf16.mxu0 %v6995_v2 }
 0x431   : > { %4247 = vmatpush1.bf16.msra.mxu1 %v6837_v7  ;;  %4120 = vmatpush1.bf16.msra.mxu0 %v6838_v9  ;;  %v6875_v7 = vld [vmem:[%s8745_s5 + $0x128] sm:$0xff]   ;;  %v6876_v9 = vld [vmem:[%s8745_s5 + $0x1a0] sm:$0xff]  }
 0x432   : > { %4248 = vmatprep.subr.bf16.mxu1 %v6995_v2  ;;  %4121 = vmatprep.subr.bf16.mxu0 %v6995_v2 }
 0x435   : > { %4249 = vmatpush1.bf16.msra.mxu1 %v6839_v10  ;;  %4122 = vmatpush1.bf16.msra.mxu0 %v6840_v12  ;;  %v6877_v10 = vld [vmem:[%s8745_s5 + $0x130] sm:$0xff]   ;;  %v6878_v12 = vld [vmem:[%s8745_s5 + $0x1a8] sm:$0xff]  }
 0x436   : > { %4250 = vmatprep.subr.bf16.mxu1 %v6995_v2  ;;  %4123 = vmatprep.subr.bf16.mxu0 %v6995_v2 }
 0x439   : > { %4251 = vmatpush1.bf16.msra.mxu1 %v6841_v14  ;;  %4124 = vmatpush1.bf16.msra.mxu0 %v6842_v15  ;;  %v6879_v14 = vld [vmem:[%s8745_s5 + $0x138] sm:$0xff]  }
 0x43a   : > { %4252 = vmatprep.subr.bf16.mxu1 %v6995_v2  ;;  %4125 = vmatprep.subr.bf16.mxu0 %v6995_v2 }
 0x43d   : > { %4253 = vmatpush1.bf16.msra.mxu1 %v6843_v16  ;;  %4126 = vmatpush1.bf16.msra.mxu0 %v6844_v17  ;;  %v6880_v16 = vld [vmem:[%s8745_s5 + $0x1b0] sm:$0xff]  }
 0x43e   : > { %4254 = vmatprep.subr.bf16.mxu1 %v6995_v2  ;;  %4127 = vmatprep.subr.bf16.mxu0 %v6995_v2 }
 0x441   : > { %4255 = vmatpush1.bf16.msra.mxu1 %v6845_v19  ;;  %4128 = vmatpush1.bf16.msra.mxu0 %v6846_v20  ;;  %v6881_v19 = vld [vmem:[%s8745_s5 + $0x140] sm:$0xff]  }
 0x442   : > { %4256 = vmatprep.subr.bf16.mxu1 %v6995_v2  ;;  %4129 = vmatprep.subr.bf16.mxu0 %v6995_v2 }
 0x445   : > { %4257 = vmatpush1.bf16.msra.mxu1 %v6847_v61  ;;  %4130 = vmatpush1.bf16.msra.mxu0 %v6848_v1  ;;  %v6882_v61 = vld [vmem:[%s8745_s5 + $0x1b8] sm:$0xff]  }
 0x446   : > { %4258 = vmatprep.subr.bf16.mxu1 %v6995_v2  ;;  %4131 = vmatprep.subr.bf16.mxu0 %v6995_v2 }
 0x449   : > { %4259 = vmatpush1.bf16.msra.mxu1 %v6849_v21  ;;  %4132 = vmatpush1.bf16.msra.mxu0 %v6850_v22  ;;  %v6883_v21 = vld [vmem:[%s8745_s5 + $0x148] sm:$0xff]  }
 0x44a   : > { %4260 = vmatprep.subr.bf16.mxu1 %v6995_v2  ;;  %4133 = vmatprep.subr.bf16.mxu0 %v6995_v2 }
 0x44d   : > { %4261 = vmatpush1.bf16.msra.mxu1 %v6851_v23  ;;  %4134 = vmatpush1.bf16.msra.mxu0 %v6852_v24  ;;  %v6885_v23 = vld [vmem:[%s8745_s5 + $0x230] sm:$0xff]  }
 0x44e   : > { %4565 = vmatprep.subr.bf16.mxu1 %v6995_v2  ;;  %4399 = vmatprep.subr.bf16.mxu0 %v6995_v2 }
 0x4eb   : > { %v3836_v27 = vpop.f32.mrb[12].mxu0  ;;  %v3910_v28 = vpop.f32.mrb[32].mxu1 }
 0x4ec   : > { %v3915_v31 = vmax.f32 %v3836_v27, %v3910_v28  ;;  %v3838_v32 = vpop.f32.mrb[13].mxu0  ;;  %v3912_v33 = vpop.f32.mrb[33].mxu1  ;;  %v6888_v27 = vld [vmem:[%s8745_s5 + $0x238] sm:$0xff]   ;;  %v6889_v28 = vld [vmem:[%s8745_s5 + $0x1c8] sm:$0xff]  }
 0x4ed   : > { %v3916_v34 = vmax.f32 %v3838_v32, %v3912_v33  ;;  %v6892_v32 = vld [vmem:[%s8745_s5 + $0x248] sm:$0xff]   ;;  %v6893_v33 = vld [vmem:[%s8745_s5 + $0x1d8] sm:$0xff]  }
 0x4ee   : > { %v3929_v35 = vadd.f32 %v3922_v26, %v3915_v31  ;;  %v6891_v31 = vld [vmem:[%s8745_s5 + $0x1d0] sm:$0xff]  }
 0x4ef   : > { %v3930_v36 = vadd.f32 %v3926_v29, %v3916_v34  ;;  %v6890_v29 = vld [vmem:[%s8745_s5 + $0x240] sm:$0xff]   ;;  %v6894_v34 = vld [vmem:[%s8745_s5 + $0x250] sm:$0xff]  }
 0x4f0   : > { %v3931_v37 = vmax.f32 %v3929_v35, 0.0  ;;  %v6895_v35 = vld [vmem:[%s8745_s5 + $0x1e0] sm:$0xff]  }
 0x4f1   : > { %v3932_v38 = vmax.f32 %v3930_v36, 0.0  ;;  %v6896_v36 = vld [vmem:[%s8745_s5 + $0x258] sm:$0xff]  }
 0x4f3   : > { %v6156_v39 = vpack.c.bf16 %v3932_v38, %v3931_v37  ;;  %v6897_v37 = vld [vmem:[%s8745_s5 + $0x1e8] sm:$0xff]   ;;  %v6898_v38 = vld [vmem:[%s8745_s5 + $0x260] sm:$0xff]  }
 0x4f5   : > { %v3948_v62 = vsel %vm3946_vm14, %v6156_v39, %v3947_v57  ;;  %v6899_v57 = vld [vmem:[%s8745_s5 + $0x1f0] sm:$0xff]   ;;  %v6900_v39 = vld [vmem:[%s8745_s5 + $0x268] sm:$0xff]  }
 0x4f6   : > { %3949 = vst [vmem:[#allocation3] sm:$0xff] %v3948_v62  ;;  %v6901_v62 = vld [vmem:[%s8745_s5 + $0x1f8] sm:$0xff]  }
 0x4fd   : > { %v3950_v30 = vld [vmem:[#allocation3] sm:$0x11]  ;;  %v8393_v40 = vld [vmem:[#allocation3] sm:$0x22]  ;;  %v8495_v15 = vld [vmem:[#allocation3] sm:$0x44] }
 0x4fe   : > { %v5897_v41 = vcombine.high %v3950_v30, %v3950_v30  ;;  %v5896_v8 = vcombine.low %v3950_v30, %v3950_v30  ;;  %v5957_v43 = vcombine.high %v8393_v40, %v8393_v40  ;;  %v5956_v17 = vcombine.low %v8393_v40, %v8393_v40  ;;  %v6902_v30 = vld [vmem:[%s8745_s5 + $0x270] sm:$0xff]   ;;  %v6903_v40 = vld [vmem:[%s8745_s5 + $0x200] sm:$0xff]  }
 0x4ff   : > { %v6045_v20 = vcombine.high %v8495_v15, %v8495_v15 }
 0x500   : > { %5927 = vmatprep.mubr.msk.bf16.mxu1 %vm1743_vm9, %v5897_v41  ;;  %v4017_v13 = vshrl.u32 %v5897_v41, 16  ;;  %v4014_v44 = vshrl.u32 %v5896_v8, 16  ;;  %v4474_v46 = vshrl.u32 %v5957_v43, 16  ;;  %v4310_v48 = vrot.slane %v5957_v43, 1  ;;  %v6904_v41 = vld [vmem:[%s8745_s5 + $0x278] sm:$0xff]   ;;  %v6907_v43 = vld [vmem:[%s8745_s5 + $0x210] sm:$0xff]  }
 0x501   : > { %4267 = vmatmul.mubr.bf16.vlgmr.msra.gmra.mrb[36].mxu1 %v5896_v8  ;;  %v4470_v1 = vshrl.u32 %v5956_v17, 16  ;;  %v4806_v22 = vshrl.u32 %v6045_v20, 16  ;;  %v4309_v11 = vrot.slane %v5956_v17, 1  ;;  %v4642_v26 = vrot.slane %v6045_v20, 2  ;;  %v6905_v8 = vld [vmem:[%s8745_s5 + $0x208] sm:$0xff]  }
 0x502   : > { %4566 = vmatpush1.bf16.msra.mxu1 %v6855_v42  ;;  %5912 = vmatprep.mubr.msk.bf16.mxu0 %vm1743_vm9, %v4017_v13  ;;  %v4476_v49 = vrot.slane %v4474_v46, 1  ;;  %v6906_v42 = vld [vmem:[%s8745_s5 + $0x280] sm:$0xff]   ;;  %v6908_v13 = vld [vmem:[%s8745_s5 + $0x288] sm:$0xff]   ;;  %v6044_v46 = vcombine.low %v8495_v15, %v8495_v15 }
 0x503   : > { %4140 = vmatmul.mubr.bf16.vlgmr.msra.gmra.mrb[16].mxu0 %v4014_v44  ;;  %4567 = vmatprep.subr.bf16.mxu1 %v6995_v2  ;;  %v4472_v24 = vrot.slane %v4470_v1, 1  ;;  %v4808_v3 = vrot.slane %v4806_v22, 2  ;;  %v6909_v44 = vld [vmem:[%s8745_s5 + $0x218] sm:$0xff]  }
 0x504   : > { %4400 = vmatpush1.bf16.msra.mxu0 %v6856_v45  ;;  %5972 = vmatprep.mubr.msk.bf16.mxu0 %vm1743_vm9, %v4310_v48  ;;  %v6910_v45 = vld [vmem:[%s8745_s5 + $0x290] sm:$0xff]   ;;  %v6912_v48 = vld [vmem:[%s8745_s5 + $0x298] sm:$0xff]  }
 0x505   : > { %4401 = vmatprep.subr.bf16.mxu0 %v6995_v2  ;;  %6015 = vmatprep.mubr.msk.bf16.mxu1 %vm1743_vm9, %v4476_v49  ;;  %v4802_v49 = vshrl.u32 %v6044_v46, 16 }
 0x506   : > { %4568 = vmatpush1.bf16.msra.mxu1 %v6857_v47  ;;  %v6911_v47 = vld [vmem:[%s8745_s5 + $0x220] sm:$0xff]  }
 0x507   : > { %4569 = vmatprep.subr.bf16.mxu1 %v6995_v2 }
 0x508   : > { %4402 = vmatpush1.bf16.msra.mxu0 %v6859_v50  ;;  %v4938_v50 = vld [vmem:[#allocation3] sm:$0x88] }
 0x509   : > { %4403 = vmatprep.subr.bf16.mxu0 %v6995_v2 }
 0x50a   : > { %4570 = vmatpush1.bf16.msra.mxu1 %v6860_v51  ;;  %v6913_v51 = vld [vmem:[%s8745_s5 + $0x228] sm:$0xff]  }
 0x50b   : > { %4571 = vmatprep.subr.bf16.mxu1 %v6995_v2 }
 0x50c   : > { %4404 = vmatpush1.bf16.msra.mxu0 %v6861_v52  ;;  %v6133_v52 = vcombine.high %v4938_v50, %v4938_v50 }
 0x50d   : > { %4405 = vmatprep.subr.bf16.mxu0 %v6995_v2 }
 0x50e   : > { %4572 = vmatpush1.bf16.msra.mxu1 %v6862_v53  ;;  %v4804_v53 = vrot.slane %v4802_v49, 2 }
 0x50f   : > { %4573 = vmatprep.subr.bf16.mxu1 %v6995_v2 }
 0x510   : > { %4406 = vmatpush1.bf16.msra.mxu0 %v6863_v54  ;;  %v6915_v54 = vld [vmem:[%s8745_s5 + $0x2a0] sm:$0xff]  }
 0x511   : > { %4407 = vmatprep.subr.bf16.mxu0 %v6995_v2 }
 0x512   : > { %4574 = vmatpush1.bf16.msra.mxu1 %v6864_v55  ;;  %v4641_v55 = vrot.slane %v6044_v46, 2 }
 0x513   : > { %4575 = vmatprep.subr.bf16.mxu1 %v6995_v2 }
 0x514   : > { %4408 = vmatpush1.bf16.msra.mxu0 %v6865_v18  ;;  %v4974_v18 = vrot.slane %v6133_v52, 3 }
 0x515   : > { %4409 = vmatprep.subr.bf16.mxu0 %v6995_v2 }
 0x516   : > { %4576 = vmatpush1.bf16.msra.mxu1 %v6866_v5  ;;  %v6917_v5 = vld [vmem:[%s8745_s5 + $0x2a8] sm:$0xff]  }
 0x517   : > { %4577 = vmatprep.subr.bf16.mxu1 %v6995_v2 }
 0x518   : > { %4410 = vmatpush1.bf16.msra.mxu0 %v6867_v56  ;;  %v6918_v56 = vld [vmem:[%s8745_s5 + $0x2b0] sm:$0xff]  }
 0x519   : > { %4411 = vmatprep.subr.bf16.mxu0 %v6995_v2 }
 0x51a   : > { %4578 = vmatpush1.bf16.msra.mxu1 %v6868_v58  ;;  %v6919_v58 = vld [vmem:[%s8745_s5 + $0x2b8] sm:$0xff]  }
 0x51b   : > { %4579 = vmatprep.subr.bf16.mxu1 %v6995_v2 }
 0x51c   : > { %4412 = vmatpush1.bf16.msra.mxu0 %v6869_v59  ;;  %v6920_v59 = vld [vmem:[%s8745_s5 + $0x2c0] sm:$0xff]  }
 0x51d   : > { %4413 = vmatprep.subr.bf16.mxu0 %v6995_v2 }
 0x51e   : > { %4580 = vmatpush1.bf16.msra.mxu1 %v6870_v60  ;;  %v6921_v60 = vld [vmem:[%s8745_s5 + $0x2c8] sm:$0xff]  }
 0x51f   : > { %4581 = vmatprep.subr.bf16.mxu1 %v6995_v2 }
 0x520   : > { %4414 = vmatpush1.bf16.msra.mxu0 %v6871_v63  ;;  %v6922_v63 = vld [vmem:[%s8745_s5 + $0x2d0] sm:$0xff]  }
 0x521   : > { %4415 = vmatprep.subr.bf16.mxu0 %v6995_v2 }
 0x522   : > { %4582 = vmatpush1.bf16.msra.mxu1 %v6872_v0  ;;  %v6923_v0 = vld [vmem:[%s8745_s5 + $0x2d8] sm:$0xff]  }
 0x523   : > { %4583 = vmatprep.subr.bf16.mxu1 %v6995_v2 }
 0x524   : > { %4416 = vmatpush1.bf16.msra.mxu0 %v6873_v4  ;;  %v6924_v4 = vld [vmem:[%s8745_s5 + $0x2e0] sm:$0xff]  }
 0x525   : > { %4417 = vmatprep.subr.bf16.mxu0 %v6995_v2 }
 0x526   : > { %4584 = vmatpush1.bf16.msra.mxu1 %v6874_v6  ;;  %v6925_v6 = vld [vmem:[%s8745_s5 + $0x2e8] sm:$0xff]  }
 0x527   : > { %4585 = vmatprep.subr.bf16.mxu1 %v6995_v2 }
 0x528   : > { %4418 = vmatpush1.bf16.msra.mxu0 %v6875_v7  ;;  %v6926_v7 = vld [vmem:[%s8745_s5 + $0x2f0] sm:$0xff]  }
 0x529   : > { %4419 = vmatprep.subr.bf16.mxu0 %v6995_v2 }
 0x52a   : > { %4586 = vmatpush1.bf16.msra.mxu1 %v6876_v9  ;;  %v6927_v9 = vld [vmem:[%s8745_s5 + $0x2f8] sm:$0xff]  }
 0x52b   : > { %4587 = vmatprep.subr.bf16.mxu1 %v6995_v2 }
 0x52c   : > { %4420 = vmatpush1.bf16.msra.mxu0 %v6877_v10  ;;  %v6928_v10 = vld [vmem:[%s8745_s5 + $0x300] sm:$0xff]  }
 0x52d   : > { %4421 = vmatprep.subr.bf16.mxu0 %v6995_v2 }
 0x52e   : > { %4588 = vmatpush1.bf16.msra.mxu1 %v6878_v12  ;;  %v6929_v12 = vld [vmem:[%s8745_s5 + $0x308] sm:$0xff]  }
 0x52f   : > { %4589 = vmatprep.subr.bf16.mxu1 %v6995_v2 }
 0x530   : > { %4422 = vmatpush1.bf16.msra.mxu0 %v6879_v14  ;;  %v6132_v14 = vcombine.low %v4938_v50, %v4938_v50 }
 0x531   : > { %4423 = vmatprep.subr.bf16.mxu0 %v6995_v2 }
 0x532   : > { %4590 = vmatpush1.bf16.msra.mxu1 %v6880_v16  ;;  %v4973_v15 = vrot.slane %v6132_v14, 3 }
 0x533   : > { %4591 = vmatprep.subr.bf16.mxu1 %v6995_v2 }
 0x534   : > { %4424 = vmatpush1.bf16.msra.mxu0 %v6881_v19 }
 0x535   : > { %4425 = vmatprep.subr.bf16.mxu0 %v6995_v2 }
 0x536   : > { %4592 = vmatpush1.bf16.msra.mxu1 %v6882_v61 }
 0x537   : > { %4897 = vmatprep.subr.bf16.mxu1 %v6995_v2 }
 0x538   : > { %4426 = vmatpush1.bf16.msra.mxu0 %v6883_v21 }
 0x539   : > { %4598 = vmatmul.mubr.bf16.vlgmr.msra.gmra.mrb[40].mxu1 %v4472_v24  ;;  %4731 = vmatprep.subr.bf16.mxu0 %v6995_v2 }
 0x53a   : > { %4898 = vmatpush1.bf16.msra.mxu1 %v6885_v23  ;;  %6103 = vmatprep.mubr.msk.bf16.mxu1 %vm1743_vm9, %v4808_v3 }
 0x53b   : > { %4432 = vmatmul.mubr.bf16.vlgmr.msra.gmra.mrb[20].mxu0 %v4309_v11  ;;  %4899 = vmatprep.subr.bf16.mxu1 %v6995_v2 }
 0x53c   : > { %4732 = vmatpush1.bf16.msra.mxu0 %v6887_v25  ;;  %6060 = vmatprep.mubr.msk.bf16.mxu0 %vm1743_vm9, %v4642_v26 }
 0x53d   : > { %4733 = vmatprep.subr.bf16.mxu0 %v6995_v2 }
 0x53e   : > { %4900 = vmatpush1.bf16.msra.mxu1 %v6888_v27 }
 0x53f   : > { %4901 = vmatprep.subr.bf16.mxu1 %v6995_v2 }
 0x540   : > { %4734 = vmatpush1.bf16.msra.mxu0 %v6889_v28 }
 0x541   : > { %4735 = vmatprep.subr.bf16.mxu0 %v6995_v2 }
 0x542   : > { %4902 = vmatpush1.bf16.msra.mxu1 %v6890_v29 }
 0x543   : > { %4903 = vmatprep.subr.bf16.mxu1 %v6995_v2 }
 0x544   : > { %4736 = vmatpush1.bf16.msra.mxu0 %v6891_v31 }
 0x545   : > { %4737 = vmatprep.subr.bf16.mxu0 %v6995_v2 }
 0x546   : > { %4904 = vmatpush1.bf16.msra.mxu1 %v6892_v32 }
 0x547   : > { %4905 = vmatprep.subr.bf16.mxu1 %v6995_v2 }
 0x548   : > { %4738 = vmatpush1.bf16.msra.mxu0 %v6893_v33 }
 0x549   : > { %4739 = vmatprep.subr.bf16.mxu0 %v6995_v2 }
 0x54a   : > { %4906 = vmatpush1.bf16.msra.mxu1 %v6894_v34 }
 0x54b   : > { %4907 = vmatprep.subr.bf16.mxu1 %v6995_v2 }
 0x54c   : > { %4740 = vmatpush1.bf16.msra.mxu0 %v6895_v35 }
 0x54d   : > { %4741 = vmatprep.subr.bf16.mxu0 %v6995_v2 }
 0x54e   : > { %4908 = vmatpush1.bf16.msra.mxu1 %v6896_v36 }
 0x54f   : > { %4909 = vmatprep.subr.bf16.mxu1 %v6995_v2 }
 0x550   : > { %4742 = vmatpush1.bf16.msra.mxu0 %v6897_v37 }
 0x551   : > { %4743 = vmatprep.subr.bf16.mxu0 %v6995_v2 }
 0x552   : > { %4910 = vmatpush1.bf16.msra.mxu1 %v6898_v38 }
 0x553   : > { %4911 = vmatprep.subr.bf16.mxu1 %v6995_v2 }
 0x554   : > { %4744 = vmatpush1.bf16.msra.mxu0 %v6899_v57 }
 0x555   : > { %4745 = vmatprep.subr.bf16.mxu0 %v6995_v2 }
 0x556   : > { %4912 = vmatpush1.bf16.msra.mxu1 %v6900_v39 }
 0x557   : > { %4913 = vmatprep.subr.bf16.mxu1 %v6995_v2 }
 0x558   : > { %4746 = vmatpush1.bf16.msra.mxu0 %v6901_v62 }
 0x559   : > { %4747 = vmatprep.subr.bf16.mxu0 %v6995_v2 }
 0x55a   : > { %4914 = vmatpush1.bf16.msra.mxu1 %v6902_v30 }
 0x55b   : > { %4915 = vmatprep.subr.bf16.mxu1 %v6995_v2 }
 0x55c   : > { %4748 = vmatpush1.bf16.msra.mxu0 %v6903_v40  ;;  %v5104_v40 = vld [vmem:[%s8746_s6] sm:$0x1] }
 0x55d   : > { %4749 = vmatprep.subr.bf16.mxu0 %v6995_v2 }
 0x55e   : > { %4916 = vmatpush1.bf16.msra.mxu1 %v6904_v41 }
 0x55f   : > { %4917 = vmatprep.subr.bf16.mxu1 %v6995_v2 }
 0x560   : > { %4750 = vmatpush1.bf16.msra.mxu0 %v6905_v8 }
 0x561   : > { %4751 = vmatprep.subr.bf16.mxu0 %v6995_v2 }
 0x562   : > { %4918 = vmatpush1.bf16.msra.mxu1 %v6906_v42 }
 0x563   : > { %4919 = vmatprep.subr.bf16.mxu1 %v6995_v2 }
 0x564   : > { %4752 = vmatpush1.bf16.msra.mxu0 %v6907_v43 }
 0x565   : > { %4753 = vmatprep.subr.bf16.mxu0 %v6995_v2 }
 0x566   : > { %4920 = vmatpush1.bf16.msra.mxu1 %v6908_v13 }
 0x567   : > { %4921 = vmatprep.subr.bf16.mxu1 %v6995_v2 }
 0x568   : > { %4754 = vmatpush1.bf16.msra.mxu0 %v6909_v44 }
 0x569   : > { %4755 = vmatprep.subr.bf16.mxu0 %v6995_v2 }
 0x56a   : > { %4922 = vmatpush1.bf16.msra.mxu1 %v6910_v45 }
 0x56b   : > { %4923 = vmatprep.subr.bf16.mxu1 %v6995_v2 }
 0x56c   : > { %4756 = vmatpush1.bf16.msra.mxu0 %v6911_v47 }
 0x56d   : > { %4757 = vmatprep.subr.bf16.mxu0 %v6995_v2 }
 0x56e   : > { %4924 = vmatpush1.bf16.msra.mxu1 %v6912_v48 }
 0x570   : > { %4758 = vmatpush1.bf16.msra.mxu0 %v6913_v51 }
 0x571   : > { %4930 = vmatmul.mubr.bf16.vlgmr.msra.gmra.mrb[44].mxu1 %v4804_v53  ;;  %5063 = vmatprep.subr.bf16.mxu0 %v6995_v2 }
 0x573   : > { %4764 = vmatmul.mubr.bf16.vlgmr.msra.gmra.mrb[24].mxu0 %v4641_v55 }
 0x574   : > { %5064 = vmatpush1.bf16.msra.mxu0 %v6915_v54  ;;  %6148 = vmatprep.mubr.msk.bf16.mxu0 %vm1743_vm9, %v4974_v18 }
 0x575   : > { %5065 = vmatprep.subr.bf16.mxu0 %v6995_v2 }
 0x578   : > { %5066 = vmatpush1.bf16.msra.mxu0 %v6917_v5 }
 0x579   : > { %5067 = vmatprep.subr.bf16.mxu0 %v6995_v2 }
 0x57c   : > { %5068 = vmatpush1.bf16.msra.mxu0 %v6918_v56 }
 0x57d   : > { %5069 = vmatprep.subr.bf16.mxu0 %v6995_v2 }
 0x580   : > { %5070 = vmatpush1.bf16.msra.mxu0 %v6919_v58 }
 0x581   : > { %5071 = vmatprep.subr.bf16.mxu0 %v6995_v2 }
 0x584   : > { %5072 = vmatpush1.bf16.msra.mxu0 %v6920_v59 }
 0x585   : > { %5073 = vmatprep.subr.bf16.mxu0 %v6995_v2 }
 0x588   : > { %5074 = vmatpush1.bf16.msra.mxu0 %v6921_v60 }
 0x589   : > { %5075 = vmatprep.subr.bf16.mxu0 %v6995_v2 }
 0x58c   : > { %5076 = vmatpush1.bf16.msra.mxu0 %v6922_v63 }
 0x58d   : > { %5077 = vmatprep.subr.bf16.mxu0 %v6995_v2 }
 0x590   : > { %5078 = vmatpush1.bf16.msra.mxu0 %v6923_v0 }
 0x591   : > { %5079 = vmatprep.subr.bf16.mxu0 %v6995_v2 }
 0x594   : > { %5080 = vmatpush1.bf16.msra.mxu0 %v6924_v4 }
 0x595   : > { %5081 = vmatprep.subr.bf16.mxu0 %v6995_v2 }
 0x598   : > { %5082 = vmatpush1.bf16.msra.mxu0 %v6925_v6 }
 0x599   : > { %5083 = vmatprep.subr.bf16.mxu0 %v6995_v2 }
 0x59c   : > { %5084 = vmatpush1.bf16.msra.mxu0 %v6926_v7 }
 0x59d   : > { %5085 = vmatprep.subr.bf16.mxu0 %v6995_v2 }
 0x5a0   : > { %5086 = vmatpush1.bf16.msra.mxu0 %v6927_v9 }
 0x5a1   : > { %5087 = vmatprep.subr.bf16.mxu0 %v6995_v2 }
 0x5a4   : > { %5088 = vmatpush1.bf16.msra.mxu0 %v6928_v10 }
 0x5a5   : > { %5089 = vmatprep.subr.bf16.mxu0 %v6995_v2 }
 0x5a8   : > { %5090 = vmatpush1.bf16.msra.mxu0 %v6929_v12 }
 0x5ab   : > { %5096 = vmatmul.mubr.bf16.vlgmr.msra.gmra.mrb[28].mxu0 %v4973_v15 }
 0x5d4   : > { %v4268_v16 = vpop.f32.mrb[36].mxu1 }
 0x5d5   : > { %v4270_v17 = vpop.f32.mrb[37].mxu1 }
 0x5d6   : > { %v4141_v19 = vpop.f32.mrb[16].mxu0  ;;  %v4271_v20 = vpop.f32.mrb[38].mxu1 }
 0x5d7   : > { %v4269_v61 = vadd.f32 %v4268_v16, %v4141_v19  ;;  %v4143_v1 = vpop.f32.mrb[17].mxu0  ;;  %v4272_v21 = vpop.f32.mrb[39].mxu1 }
 0x5d8   : > { %v4144_v22 = vpop.f32.mrb[18].mxu0 }
 0x5d9   : > { %v4145_v23 = vpop.f32.mrb[19].mxu0 }
 0x60c   : > { %v4599_v24 = vpop.f32.mrb[40].mxu1 }
 0x60d   : > { %v4601_v3 = vpop.f32.mrb[41].mxu1 }
 0x60e   : > { %v4433_v25 = vpop.f32.mrb[20].mxu0  ;;  %v4602_v11 = vpop.f32.mrb[42].mxu1 }
 0x60f   : > { %v4439_v26 = vadd.f32 %v4433_v25, %v4269_v61  ;;  %v4435_v2 = vpop.f32.mrb[21].mxu0  ;;  %v4603_v27 = vpop.f32.mrb[43].mxu1 }
 0x610   : > { %v4436_v28 = vpop.f32.mrb[22].mxu0 }
 0x611   : > { %v4437_v29 = vpop.f32.mrb[23].mxu0  ;;  %v4605_v31 = vadd.f32 %v4599_v24, %v4439_v26 }
 0x644   : > { %v4931_v32 = vpop.f32.mrb[44].mxu1 }
 0x645   : > { %v4933_v33 = vpop.f32.mrb[45].mxu1 }
 0x646   : > { %v4765_v34 = vpop.f32.mrb[24].mxu0  ;;  %v4934_v35 = vpop.f32.mrb[46].mxu1 }
 0x647   : > { %v4771_v36 = vadd.f32 %v4765_v34, %v4605_v31  ;;  %v4767_v37 = vpop.f32.mrb[25].mxu0  ;;  %v4935_v38 = vpop.f32.mrb[47].mxu1 }
 0x648   : > { %v4768_v57 = vpop.f32.mrb[26].mxu0 }
 0x649   : > { %v4769_v39 = vpop.f32.mrb[27].mxu0  ;;  %v4937_v62 = vadd.f32 %v4931_v32, %v4771_v36 }
 0x67e   : > { %v5097_v30 = vpop.f32.mrb[28].mxu0 }
 0x67f   : > { %v5103_v41 = vadd.f32 %v5097_v30, %v4937_v62  ;;  %v5099_v8 = vpop.f32.mrb[29].mxu0 }
 0x680   : > { %v5100_v42 = vpop.f32.mrb[30].mxu0 }
 0x681   : > { %v5105_v43 = vadd.f32 %v5104_v40, %v5103_v41  ;;  %v5101_v13 = vpop.f32.mrb[31].mxu0 }
 0x683   : > { %5106 = vst [vmem:[%s270_s21] sm:$0x1] %v5105_v43 }
 0x684   : > { %6944 = shalt.err (!%p6941_p3)
}
 0x685   : > { %s6945_s15 = scalar_lea.hbm %s8698_s8, 16  ;;  %s6949_s19 = scalar_lea.hbm %s8747_s7, 32 }
 0x686   : > { %p6946_p4 = scmp.ne.s32.totalorder %s8698_s8, %s6945_s15  ;;  %p6950_p9 = scmp.lt.u32.totalorder %s8698_s8, %s8747_s7 }
 0x687   : > { %p6951_p10 = scmp.lt.u32.totalorder %s6949_s19, %s6945_s15  ;;  %p6953_p12 = scmp.lt.u32.totalorder %s6945_s15, %s8698_s8 }
 0x688   : > { %p6947_p7 = pnand %p6946_p4, %p7077_p5 }
 0x689   : > { %p6952_p11 = por %p6951_p10, %p6950_p9 }
 0x68a   : > { %p6948_p8 = pneg %p6947_p7 }
 0x68b   : > { %p6954_p13 = por %p6953_p12, %p6952_p11 }
 0x68d   : > { %p6955_p0 = pnand %p6954_p13, %p6948_p8 }
 0x68f   : > { %6958 = shalt.err (!%p6955_p0)
}
 0x690   : > { %6285 = dma.vmem_to_hbm [thread:$0]  (%p7077_p5), %s8700_s22, 16, %s8698_s8, %s5108_s9  }
 0x691 PF: > { %p6291_p1 = scmp.ge.s32.totalorder %s6993_s27, 2  ;;  %s5132_s23 = sand.u32 1, %s6981_s24  }
 0x692   : > { %s5133_s29 = scalar_lea.sflag [#allocation5], %s5132_s23 }
 0x693   : > { %p6288_p2 = pnand %p6291_p1, %p7081_p6 }
 0x695   : > { %6976 = dma.done.wait (!%p6288_p2), %s5133_s29, 16  }
 0x696   : > { %6978 = vsyncadd (!%p6288_p2), %s5133_s29, 4294967280  ;;  %p17_p3 = scmp.ge.s32.totalorder %s7064_s30, 4   ;;  %s8754_s24 = smov %s6985_s25 }
 0x697   : > { %s8755_s25 = smov %s6989_s26  ;;  %s8756_s26 = smov %s7075_s10 }
 0x698   : > { %s8757_s27 = smov %s7064_s30  ;;  %19 = sbr.rel (!%p17_p3) target bundleno = 3 (0x3), region = 107 }
 0x69f   :  { %5137 = vsyncpa [#allocation5], 1 }
 0x6a0   :  { %5139 = vsyncpa [#allocation5 + $0x1], 1 }

</bundles_post_ra>
